<compile_context>
chip_gen: v6e
topology: v6e:2x2x1
jax: 0.10.0
libtpu: 0.0.40
codegen_flags: <defaults>
</compile_context>

<pallas_src>
import functools
import math

import jax
import jax.numpy as jnp
from jax.experimental import pallas as pl
from jax.experimental.pallas import tpu as pltpu

LN_EPS = 1e-12  # config.layer_norm_eps


def _pick_tile(total, target):
    """Largest divisor of `total` that is <= target (robust tile selection)."""
    t = max(1, min(int(target), int(total)))
    while total % t != 0:
        t -= 1
    return t


def _gelu_exact(x):
    # HF ACT2FN["gelu"] (erf-based, non-approximate)
    return 0.5 * x * (1.0 + jax.lax.erf(x * (1.0 / math.sqrt(2.0))))


def _layernorm(x, gamma, beta, eps):
    mu = jnp.mean(x, axis=-1, keepdims=True)
    var = jnp.mean((x - mu) ** 2, axis=-1, keepdims=True)
    return (x - mu) * jax.lax.rsqrt(var + eps) * gamma + beta


# --------------------- kernel 1: Q/K/V projections (once per batch/layer) ---------------------
def _qkv_kernel(hs_ref, wq_ref, bq_ref, wk_ref, bk_ref, wv_ref, bv_ref,
                q_ref, k_ref, v_ref):
    x = hs_ref[0].astype(jnp.bfloat16)                          # (TQ, H)
    q = jnp.dot(x, wq_ref[...], preferred_element_type=jnp.float32) + bq_ref[...]
    k = jnp.dot(x, wk_ref[...], preferred_element_type=jnp.float32) + bk_ref[...]
    v = jnp.dot(x, wv_ref[...], preferred_element_type=jnp.float32) + bv_ref[...]
    q_ref[0] = q.astype(jnp.bfloat16)
    k_ref[0] = k.astype(jnp.bfloat16)
    v_ref[0] = v.astype(jnp.bfloat16)


def _qkv_projection(hs, p, *, q_tile, vmem_limit_bytes):
    B, S, H = hs.shape
    TQ = _pick_tile(S, q_tile)
    nQ = S // TQ

    def const(shape):
        return pl.BlockSpec(shape, lambda b, qi: (0,) * len(shape))

    out_sd = jax.ShapeDtypeStruct((B, S, H), jnp.bfloat16)
    flops = int(6 * B * S * H * H)
    bytes_accessed = int(4 * B * S * H + 3 * 2 * H * H + 3 * 2 * B * S * H)

    return pl.pallas_call(
        _qkv_kernel,
        out_shape=(out_sd, out_sd, out_sd),
        grid=(B, nQ),
        in_specs=[
            pl.BlockSpec((1, TQ, H), lambda b, qi: (b, qi, 0)),   # hidden tile (f32)
            const((H, H)), const((1, H)),                         # query (pre-scaled)
            const((H, H)), const((1, H)),                         # key
            const((H, H)), const((1, H)),                         # value
        ],
        out_specs=(pl.BlockSpec((1, TQ, H), lambda b, qi: (b, qi, 0)),
                   pl.BlockSpec((1, TQ, H), lambda b, qi: (b, qi, 0)),
                   pl.BlockSpec((1, TQ, H), lambda b, qi: (b, qi, 0))),
        compiler_params=pltpu.CompilerParams(
            dimension_semantics=("parallel", "parallel"),
            vmem_limit_bytes=vmem_limit_bytes),
        cost_estimate=pl.CostEstimate(flops=flops, transcendentals=0,
                                      bytes_accessed=bytes_accessed),
    )(hs, p["wq"], p["bq"], p["wk"], p["bk"], p["wv"], p["bv"])


# --------------------- kernel 2: attention + FFN (fused, streamed FFN weights) ---------------------
def _attn_ffn_kernel(hsq_ref, q_ref, k_ref, v_ref, mask_ref,
                     wao_ref, bao_ref, g1_ref, b1_ref,
                     wi_ref, bi_ref, wo_ref, bo_ref, g2_ref, b2_ref,
                     out_ref,
                     x1_sc, x1b_sc, acc_sc,
                     *, num_heads, eps, approx_recip):
    ii = pl.program_id(2)
    n_i = pl.num_programs(2)

    # ---------------- attention (runs once per (batch, query-tile)) ----------------
    @pl.when(ii == 0)
    def _attention():
        x_q = hsq_ref[0]                 # (TQ, H) f32 residual input
        q = q_ref[0]                     # (TQ, H) bf16, 1/sqrt(dh) already folded in
        k = k_ref[0]                     # (S,  H) bf16
        v = v_ref[0]                     # (S,  H) bf16
        TQ, H = q.shape
        S = k.shape[0]
        dh = H // num_heads

        # Hoisted once (JAX doesn't CSE broadcast_in_dim inside the head loop).
        mask_b = jnp.broadcast_to(mask_ref[0], (TQ, S)).astype(jnp.float32)

        # q @ k^T via dot_general contracting axis 1 of both operands:
        # no materialized per-head transpose / relayout.
        dn = (((1,), (1,)), ((), ()))
        ctx_parts = []
        for h in range(num_heads):
            lo = h * dh
            qh = q[:, lo:lo + dh]                               # (TQ, dh) bf16
            kh = k[:, lo:lo + dh]                               # (S,  dh) bf16
            vh = v[:, lo:lo + dh]                               # (S,  dh) bf16

            sc = jax.lax.dot_general(qh, kh, dn,
                                     preferred_element_type=jnp.float32)  # (TQ, S)
            sc = sc + mask_b
            sc = sc - jnp.max(sc, axis=-1, keepdims=True)
            prob = jnp.exp(sc)
            denom = jnp.sum(prob, axis=-1, keepdims=True)
            if approx_recip:
                prob = prob * pl.reciprocal(denom, approx=True)
            else:
                prob = prob / denom

            ctx_parts.append(jnp.dot(prob.astype(jnp.bfloat16), vh,
                                     preferred_element_type=jnp.float32))  # (TQ, dh)

        # Lane-dense (TQ, H) context consumed by ONE K=H matmul.
        ctx = jnp.concatenate(ctx_parts, axis=-1)

        attn = jnp.dot(ctx.astype(jnp.bfloat16), wao_ref[...],
                       preferred_element_type=jnp.float32) + bao_ref[...]
        x1 = _layernorm(attn + x_q, g1_ref[...], b1_ref[...], eps)
        x1_sc[...] = x1                              # f32 copy for the final residual
        x1b_sc[...] = x1.astype(jnp.bfloat16)        # bf16 copy for the streamed FFN
        acc_sc[...] = jnp.zeros_like(acc_sc)

    # ---------------- FFN: stream one intermediate-dim tile per grid step ----------------
    inter = _gelu_exact(
        jnp.dot(x1b_sc[...], wi_ref[...], preferred_element_type=jnp.float32)
        + bi_ref[...])
    acc_sc[...] += jnp.dot(inter.astype(jnp.bfloat16), wo_ref[...],
                           preferred_element_type=jnp.float32)

    @pl.when(ii == n_i - 1)
    def _finalize():
        ff = acc_sc[...] + bo_ref[...]
        out_ref[0] = _layernorm(ff + x1_sc[...], g2_ref[...], b2_ref[...], eps)


def _attn_ffn_layer(hs, q, k, v, add_mask, p, *, num_heads, q_tile, i_tile,
                    eps, approx_recip, vmem_limit_bytes):
    B, S, H = hs.shape
    I = p["wi"].shape[1]
    TQ = _pick_tile(S, q_tile)
    TI = _pick_tile(I, i_tile)
    nQ, nI = S // TQ, I // TI

    def const(shape):
        # Per-layer-constant weights/biases: block index never changes.
        # TODO(synk): on v7x (64 MiB VMEM) single-buffer these via
        # pipeline_mode=pl.Buffered(1) to reclaim VMEM for larger TQ/TI.
        return pl.BlockSpec(shape, lambda b, qi, ii: (0,) * len(shape))

    in_specs = [
        pl.BlockSpec((1, TQ, H), lambda b, qi, ii: (b, qi, 0)),   # residual tile (f32)
        pl.BlockSpec((1, TQ, H), lambda b, qi, ii: (b, qi, 0)),   # Q tile (bf16, pre-scaled)
        pl.BlockSpec((1, S, H),  lambda b, qi, ii: (b, 0, 0)),    # K full seq (bf16)
        pl.BlockSpec((1, S, H),  lambda b, qi, ii: (b, 0, 0)),    # V full seq (bf16)
        pl.BlockSpec((1, 1, S),  lambda b, qi, ii: (b, 0, 0)),    # additive mask (f32)
        const((H, H)), const((1, H)),                             # attention output dense
        const((1, H)), const((1, H)),                             # LayerNorm 1
        pl.BlockSpec((H, TI), lambda b, qi, ii: (0, ii)),         # intermediate weight tile
        pl.BlockSpec((1, TI), lambda b, qi, ii: (0, ii)),         # intermediate bias tile
        pl.BlockSpec((TI, H), lambda b, qi, ii: (ii, 0)),         # output dense weight tile
        const((1, H)),                                            # output dense bias
        const((1, H)), const((1, H)),                             # LayerNorm 2
    ]

    # Advisory cost hint (K/V projections counted in the QKV kernel, not here).
    flops = int(2 * B * S * (2 * S * H + H * H + 2 * H * I))
    transcendentals = int(B * num_heads * S * S + B * S * I)
    bytes_accessed = int(2 * (H * H + 2 * H * I)                 # bf16 weights
                         + 2 * 3 * B * S * H                     # bf16 q/k/v
                         + 4 * 2 * B * S * H + 4 * B * S)        # f32 residual/out + mask

    kernel = functools.partial(_attn_ffn_kernel, num_heads=num_heads, eps=eps,
                               approx_recip=approx_recip)
    return pl.pallas_call(
        kernel,
        out_shape=jax.ShapeDtypeStruct((B, S, H), jnp.float32),
        grid=(B, nQ, nI),
        in_specs=in_specs,
        out_specs=pl.BlockSpec((1, TQ, H), lambda b, qi, ii: (b, qi, 0)),
        scratch_shapes=[
            pltpu.VMEM((TQ, H), jnp.float32),    # x1 (f32, final residual)
            pltpu.VMEM((TQ, H), jnp.bfloat16),   # x1 (bf16, FFN operand)
            pltpu.VMEM((TQ, H), jnp.float32),    # FFN output accumulator
        ],
        compiler_params=pltpu.CompilerParams(
            dimension_semantics=("parallel", "parallel", "arbitrary"),
            vmem_limit_bytes=vmem_limit_bytes),
        cost_estimate=pl.CostEstimate(flops=flops,
                                      transcendentals=transcendentals,
                                      bytes_accessed=bytes_accessed),
    )(hs, q, k, v, add_mask,
      p["wao"], p["bao"], p["g1"], p["b1"],
      p["wi"], p["bi"], p["wo"], p["bo"], p["g2"], p["b2"])


# --------------------- parameter preparation (call ONCE, outside the forward) ---------------------
def prepare_encoder_params(layer_params, num_heads):
    """Fold 1/sqrt(dh) into the query projection and pre-cast weights to bf16."""
    prepared = []
    for p in layer_params:
        H = p["wq"].shape[0]
        dh = H // num_heads
        scale = 1.0 / math.sqrt(dh)
        f32, bf16 = jnp.float32, jnp.bfloat16
        prepared.append(dict(
            wq=(p["wq"] * scale).astype(bf16), bq=(p["bq"] * scale).astype(f32),
            wk=p["wk"].astype(bf16), bk=p["bk"].astype(f32),
            wv=p["wv"].astype(bf16), bv=p["bv"].astype(f32),
            wao=p["wao"].astype(bf16), bao=p["bao"].astype(f32),
            g1=p["g1"].astype(f32), b1=p["b1"].astype(f32),
            wi=p["wi"].astype(bf16), bi=p["bi"].astype(f32),
            wo=p["wo"].astype(bf16), bo=p["bo"].astype(f32),
            g2=p["g2"].astype(f32), b2=p["b2"].astype(f32),
        ))
    return prepared


@functools.partial(jax.jit, static_argnames=("num_heads", "q_tile", "i_tile",
                                              "approx_softmax_recip",
                                              "vmem_limit_bytes"))
def alt_roberta_encoder(hidden_states, attention_mask, layer_params, *,
                        num_heads, q_tile=256, i_tile=2048,
                        approx_softmax_recip=True,
                        vmem_limit_bytes=64 * 1024 * 1024):
    """AltRobertaEncoder.forward (last_hidden_state only); layer_params must be
    pre-processed with prepare_encoder_params."""
    # HF-style extended additive mask: (1 - mask) * finfo.min over heads/queries.
    add_mask = (1.0 - attention_mask.astype(jnp.float32))[:, None, :] \
        * jnp.finfo(jnp.float32).min                      # (B, 1, S)
    hs = hidden_states.astype(jnp.float32)
    # TODO(synk): cross-layer weight prefetch (P10) of layer l+1 weights while
    # layer l computes is not wired up; layers run as sequential pallas_calls
    # inside this single jitted program.
    for p in layer_params:
        q, k, v = _qkv_projection(hs, p, q_tile=q_tile,
                                  vmem_limit_bytes=vmem_limit_bytes)
        hs = _attn_ffn_layer(hs, q, k, v, add_mask, p,
                             num_heads=num_heads, q_tile=q_tile, i_tile=i_tile,
                             eps=LN_EPS, approx_recip=approx_softmax_recip,
                             vmem_limit_bytes=vmem_limit_bytes)
    return hs


# ------------------------- pure-JAX reference (for checking) -------------------------
def _ref_layer(x, add_mask, p, num_heads, eps=LN_EPS):
    B, S, H = x.shape
    dh = H // num_heads
    q = (x @ p["wq"] + p["bq"]).reshape(B, S, num_heads, dh).transpose(0, 2, 1, 3)
    k = (x @ p["wk"] + p["bk"]).reshape(B, S, num_heads, dh).transpose(0, 2, 1, 3)
    v = (x @ p["wv"] + p["bv"]).reshape(B, S, num_heads, dh).transpose(0, 2, 1, 3)
    sc = jnp.einsum('bhqd,bhkd->bhqk', q, k) / math.sqrt(dh) + add_mask[:, None, :, :]
    pr = jax.nn.softmax(sc, axis=-1)
    ctx = jnp.einsum('bhqk,bhkd->bhqd', pr, v).transpose(0, 2, 1, 3).reshape(B, S, H)
    attn = ctx @ p["wao"] + p["bao"]
    x1 = _layernorm(attn + x, p["g1"], p["b1"], eps)
    inter = _gelu_exact(x1 @ p["wi"] + p["bi"])
    return _layernorm(inter @ p["wo"] + p["bo"] + x1, p["g2"], p["b2"], eps)


def _ref_encoder(hs, attention_mask, layer_params, num_heads):
    add_mask = (1.0 - attention_mask.astype(jnp.float32))[:, None, :] \
        * jnp.finfo(jnp.float32).min
    for p in layer_params:
        hs = _ref_layer(hs, add_mask, p, num_heads)
    return hs


# ------------------------------------ main ------------------------------------
if __name__ == "__main__":
    # batch, seq, hidden, heads, intermediate, layers / query tile, intermediate tile
    B, S, H, NH, I, L = 2, 32, 64, 4, 256, 2
    TQ, TI = 16, 128          # exercises the sequence-tile and I-tile grid axes

    key = jax.random.PRNGKey(0)
    k_hs, k_params = jax.random.split(key)
    hidden_states = jax.random.normal(k_hs, (B, S, H), jnp.float32)
    # last two tokens of the second sequence are padding
    attention_mask = jnp.ones((B, S), jnp.float32).at[1, S - 2:].set(0.0)

    def make_layer_params(lk):
        ks = jax.random.split(lk, 12)
        w = lambda k_, di, do: jax.random.normal(k_, (di, do), jnp.float32) * 0.05
        b = lambda k_, do: jax.random.normal(k_, (1, do), jnp.float32) * 0.05
        return dict(
            wq=w(ks[0], H, H), bq=b(ks[1], H),
            wk=w(ks[2], H, H), bk=b(ks[3], H),
            wv=w(ks[4], H, H), bv=b(ks[5], H),
            wao=w(ks[6], H, H), bao=b(ks[7], H),
            g1=jnp.ones((1, H), jnp.float32), b1=jnp.zeros((1, H), jnp.float32),
            wi=w(ks[8], H, I), bi=b(ks[9], I),
            wo=w(ks[10], I, H), bo=b(ks[11], H),
            g2=jnp.ones((1, H), jnp.float32), b2=jnp.zeros((1, H), jnp.float32),
        )

    layer_params = [make_layer_params(k) for k in jax.random.split(k_params, L)]

    # Weight scale-fold + bf16 casts done ONCE, outside the forward path.
    prepared = prepare_encoder_params(layer_params, NH)

    out = alt_roberta_encoder(hidden_states, attention_mask, prepared,
                              num_heads=NH, q_tile=TQ, i_tile=TI)
    out = jax.block_until_ready(out)

    ref = _ref_encoder(hidden_states, attention_mask, layer_params, NH)
    # Tolerance reflects bf16 MXU operands / bf16 Q,K,V storage (f32 accumulation,
    # f32 softmax & LayerNorm) and the EUP approximate softmax reciprocal.
    err = jnp.max(jnp.abs(out - ref))
    if not jnp.allclose(out, ref, atol=3e-2, rtol=3e-2):
        raise AssertionError(f"mismatch vs reference: max abs err = {err}")

    # TODO(synk): output_attentions / output_hidden_states tuple outputs, head_mask
    # and the 'relative_key'/'relative_key_query' position-embedding branches are
    # not wired up (defaults used).
    print("KERNEL_OK")
</pallas_src>

<mosaic_0001>
module attributes {stable_mosaic.version = 11 : i64} {
  func.func @_qkv_kernel(%arg0: i32, %arg1: i32, %arg2: memref<1x16x64xf32, #tpu.memory_space<vmem>>, %arg3: memref<64x64xbf16, #tpu.memory_space<vmem>>, %arg4: memref<1x64xf32, #tpu.memory_space<vmem>>, %arg5: memref<64x64xbf16, #tpu.memory_space<vmem>>, %arg6: memref<1x64xf32, #tpu.memory_space<vmem>>, %arg7: memref<64x64xbf16, #tpu.memory_space<vmem>>, %arg8: memref<1x64xf32, #tpu.memory_space<vmem>>, %arg9: memref<1x16x64xbf16, #tpu.memory_space<vmem>>, %arg10: memref<1x16x64xbf16, #tpu.memory_space<vmem>>, %arg11: memref<1x16x64xbf16, #tpu.memory_space<vmem>>) attributes {dimension_semantics = [#tpu.dimension_semantics<parallel>, #tpu.dimension_semantics<parallel>], iteration_bounds = array<i64: 2, 2>, scalar_prefetch = 0 : i64, scratch_operands = 0 : i64, tpu.core_type = #tpu.core_type<tc>, window_params = [{transform_indices = @transform_0, window_bounds = array<i64: 1, 16, 64>}, {pipeline_mode = #tpu.pipeline_mode<synchronous>, transform_indices = @transform_1, window_bounds = array<i64: 64, 64>}, {pipeline_mode = #tpu.pipeline_mode<synchronous>, transform_indices = @transform_2, window_bounds = array<i64: 1, 64>}, {pipeline_mode = #tpu.pipeline_mode<synchronous>, transform_indices = @transform_3, window_bounds = array<i64: 64, 64>}, {pipeline_mode = #tpu.pipeline_mode<synchronous>, transform_indices = @transform_4, window_bounds = array<i64: 1, 64>}, {pipeline_mode = #tpu.pipeline_mode<synchronous>, transform_indices = @transform_5, window_bounds = array<i64: 64, 64>}, {pipeline_mode = #tpu.pipeline_mode<synchronous>, transform_indices = @transform_6, window_bounds = array<i64: 1, 64>}, {transform_indices = @transform_7, window_bounds = array<i64: 1, 16, 64>}, {transform_indices = @transform_8, window_bounds = array<i64: 1, 16, 64>}, {transform_indices = @transform_9, window_bounds = array<i64: 1, 16, 64>}]} {
    %c0 = arith.constant 0 : index
    %c0_0 = arith.constant 0 : index
    %c0_1 = arith.constant 0 : index
    %0 = vector.load %arg2[%c0, %c0_0, %c0_1] : memref<1x16x64xf32, #tpu.memory_space<vmem>>, vector<1x16x64xf32>
    %1 = vector.shape_cast %0 : vector<1x16x64xf32> to vector<16x64xf32>
    %2 = arith.truncf %1 : vector<16x64xf32> to vector<16x64xbf16>
    %c0_2 = arith.constant 0 : index
    %c0_3 = arith.constant 0 : index
    %3 = vector.load %arg3[%c0_2, %c0_3] : memref<64x64xbf16, #tpu.memory_space<vmem>>, vector<64x64xbf16>
    %cst = arith.constant dense<0.000000e+00> : vector<16x64xf32>
    %4 = tpu.matmul %2, %3, %cst {dimension_numbers = #tpu.dot_dimension_numbers<[1], [0], [0], [1], [0, 0, 1, 1], [], []>} : vector<16x64xbf16>, vector<64x64xbf16>, vector<16x64xf32> -> vector<16x64xf32>
    %c0_4 = arith.constant 0 : index
    %c0_5 = arith.constant 0 : index
    %5 = vector.load %arg4[%c0_4, %c0_5] : memref<1x64xf32, #tpu.memory_space<vmem>>, vector<1x64xf32>
    %6 = vector.broadcast %5 : vector<1x64xf32> to vector<16x64xf32>
    %7 = arith.addf %4, %6 : vector<16x64xf32>
    %c0_6 = arith.constant 0 : index
    %c0_7 = arith.constant 0 : index
    %8 = vector.load %arg5[%c0_6, %c0_7] : memref<64x64xbf16, #tpu.memory_space<vmem>>, vector<64x64xbf16>
    %cst_8 = arith.constant dense<0.000000e+00> : vector<16x64xf32>
    %9 = tpu.matmul %2, %8, %cst_8 {dimension_numbers = #tpu.dot_dimension_numbers<[1], [0], [0], [1], [0, 0, 1, 1], [], []>} : vector<16x64xbf16>, vector<64x64xbf16>, vector<16x64xf32> -> vector<16x64xf32>
    %c0_9 = arith.constant 0 : index
    %c0_10 = arith.constant 0 : index
    %10 = vector.load %arg6[%c0_9, %c0_10] : memref<1x64xf32, #tpu.memory_space<vmem>>, vector<1x64xf32>
    %11 = vector.broadcast %10 : vector<1x64xf32> to vector<16x64xf32>
    %12 = arith.addf %9, %11 : vector<16x64xf32>
    %c0_11 = arith.constant 0 : index
    %c0_12 = arith.constant 0 : index
    %13 = vector.load %arg7[%c0_11, %c0_12] : memref<64x64xbf16, #tpu.memory_space<vmem>>, vector<64x64xbf16>
    %cst_13 = arith.constant dense<0.000000e+00> : vector<16x64xf32>
    %14 = tpu.matmul %2, %13, %cst_13 {dimension_numbers = #tpu.dot_dimension_numbers<[1], [0], [0], [1], [0, 0, 1, 1], [], []>} : vector<16x64xbf16>, vector<64x64xbf16>, vector<16x64xf32> -> vector<16x64xf32>
    %c0_14 = arith.constant 0 : index
    %c0_15 = arith.constant 0 : index
    %15 = vector.load %arg8[%c0_14, %c0_15] : memref<1x64xf32, #tpu.memory_space<vmem>>, vector<1x64xf32>
    %16 = vector.broadcast %15 : vector<1x64xf32> to vector<16x64xf32>
    %17 = arith.addf %14, %16 : vector<16x64xf32>
    %18 = arith.truncf %7 : vector<16x64xf32> to vector<16x64xbf16>
    %c0_16 = arith.constant 0 : index
    %c0_17 = arith.constant 0 : index
    %c0_18 = arith.constant 0 : index
    %19 = vector.load %arg9[%c0_16, %c0_17, %c0_18] : memref<1x16x64xbf16, #tpu.memory_space<vmem>>, vector<1x16x64xbf16>
    %20 = vector.shape_cast %19 : vector<1x16x64xbf16> to vector<16x64xbf16>
    %21 = vector.shape_cast %18 : vector<16x64xbf16> to vector<1x16x64xbf16>
    tpu.vector_store %arg9[%c0_16, %c0_17, %c0_18], %21 {strides = array<i32>} : memref<1x16x64xbf16, #tpu.memory_space<vmem>>, vector<1x16x64xbf16>,
    %22 = arith.truncf %12 : vector<16x64xf32> to vector<16x64xbf16>
    %c0_19 = arith.constant 0 : index
    %c0_20 = arith.constant 0 : index
    %c0_21 = arith.constant 0 : index
    %23 = vector.load %arg10[%c0_19, %c0_20, %c0_21] : memref<1x16x64xbf16, #tpu.memory_space<vmem>>, vector<1x16x64xbf16>
    %24 = vector.shape_cast %23 : vector<1x16x64xbf16> to vector<16x64xbf16>
    %25 = vector.shape_cast %22 : vector<16x64xbf16> to vector<1x16x64xbf16>
    tpu.vector_store %arg10[%c0_19, %c0_20, %c0_21], %25 {strides = array<i32>} : memref<1x16x64xbf16, #tpu.memory_space<vmem>>, vector<1x16x64xbf16>,
    %26 = arith.truncf %17 : vector<16x64xf32> to vector<16x64xbf16>
    %c0_22 = arith.constant 0 : index
    %c0_23 = arith.constant 0 : index
    %c0_24 = arith.constant 0 : index
    %27 = vector.load %arg11[%c0_22, %c0_23, %c0_24] : memref<1x16x64xbf16, #tpu.memory_space<vmem>>, vector<1x16x64xbf16>
    %28 = vector.shape_cast %27 : vector<1x16x64xbf16> to vector<16x64xbf16>
    %29 = vector.shape_cast %26 : vector<16x64xbf16> to vector<1x16x64xbf16>
    tpu.vector_store %arg11[%c0_22, %c0_23, %c0_24], %29 {strides = array<i32>} : memref<1x16x64xbf16, #tpu.memory_space<vmem>>, vector<1x16x64xbf16>,
    return
  }
  func.func @transform_0(%arg0: i32, %arg1: i32) -> (i32, i32, i32) {
    %c0_i32 = arith.constant 0 : i32
    %c0_i32_0 = arith.constant 0 : i32
    return %arg0, %arg1, %c0_i32 : i32, i32, i32
  }
  func.func @transform_1(%arg0: i32, %arg1: i32) -> (i32, i32) {
    %c0_i32 = arith.constant 0 : i32
    %c0_i32_0 = arith.constant 0 : i32
    %c0_i32_1 = arith.constant 0 : i32
    return %c0_i32, %c0_i32_0 : i32, i32
  }
  func.func @transform_2(%arg0: i32, %arg1: i32) -> (i32, i32) {
    %c0_i32 = arith.constant 0 : i32
    %c0_i32_0 = arith.constant 0 : i32
    %c0_i32_1 = arith.constant 0 : i32
    return %c0_i32, %c0_i32_0 : i32, i32
  }
  func.func @transform_3(%arg0: i32, %arg1: i32) -> (i32, i32) {
    %c0_i32 = arith.constant 0 : i32
    %c0_i32_0 = arith.constant 0 : i32
    %c0_i32_1 = arith.constant 0 : i32
    return %c0_i32, %c0_i32_0 : i32, i32
  }
  func.func @transform_4(%arg0: i32, %arg1: i32) -> (i32, i32) {
    %c0_i32 = arith.constant 0 : i32
    %c0_i32_0 = arith.constant 0 : i32
    %c0_i32_1 = arith.constant 0 : i32
    return %c0_i32, %c0_i32_0 : i32, i32
  }
  func.func @transform_5(%arg0: i32, %arg1: i32) -> (i32, i32) {
    %c0_i32 = arith.constant 0 : i32
    %c0_i32_0 = arith.constant 0 : i32
    %c0_i32_1 = arith.constant 0 : i32
    return %c0_i32, %c0_i32_0 : i32, i32
  }
  func.func @transform_6(%arg0: i32, %arg1: i32) -> (i32, i32) {
    %c0_i32 = arith.constant 0 : i32
    %c0_i32_0 = arith.constant 0 : i32
    %c0_i32_1 = arith.constant 0 : i32
    return %c0_i32, %c0_i32_0 : i32, i32
  }
  func.func @transform_7(%arg0: i32, %arg1: i32) -> (i32, i32, i32) {
    %c0_i32 = arith.constant 0 : i32
    %c0_i32_0 = arith.constant 0 : i32
    return %arg0, %arg1, %c0_i32 : i32, i32, i32
  }
  func.func @transform_8(%arg0: i32, %arg1: i32) -> (i32, i32, i32) {
    %c0_i32 = arith.constant 0 : i32
    %c0_i32_0 = arith.constant 0 : i32
    return %arg0, %arg1, %c0_i32 : i32, i32, i32
  }
  func.func @transform_9(%arg0: i32, %arg1: i32) -> (i32, i32, i32) {
    %c0_i32 = arith.constant 0 : i32
    %c0_i32_0 = arith.constant 0 : i32
    return %arg0, %arg1, %c0_i32 : i32, i32, i32
  }
}

module attributes {stable_mosaic.version = 11 : i64} {
  func.func @_attn_ffn_kernel(%arg0: i32, %arg1: i32, %arg2: i32, %arg3: memref<1x16x64xf32, #tpu.memory_space<vmem>>, %arg4: memref<1x16x64xbf16, #tpu.memory_space<vmem>>, %arg5: memref<1x32x64xbf16, #tpu.memory_space<vmem>>, %arg6: memref<1x32x64xbf16, #tpu.memory_space<vmem>>, %arg7: memref<1x1x32xf32, #tpu.memory_space<vmem>>, %arg8: memref<64x64xbf16, #tpu.memory_space<vmem>>, %arg9: memref<1x64xf32, #tpu.memory_space<vmem>>, %arg10: memref<1x64xf32, #tpu.memory_space<vmem>>, %arg11: memref<1x64xf32, #tpu.memory_space<vmem>>, %arg12: memref<64x128xbf16, #tpu.memory_space<vmem>>, %arg13: memref<1x128xf32, #tpu.memory_space<vmem>>, %arg14: memref<128x64xbf16, #tpu.memory_space<vmem>>, %arg15: memref<1x64xf32, #tpu.memory_space<vmem>>, %arg16: memref<1x64xf32, #tpu.memory_space<vmem>>, %arg17: memref<1x64xf32, #tpu.memory_space<vmem>>, %arg18: memref<1x16x64xf32, #tpu.memory_space<vmem>>, %arg19: memref<16x64xf32, #tpu.memory_space<vmem>>, %arg20: memref<16x64xbf16, #tpu.memory_space<vmem>>, %arg21: memref<16x64xf32, #tpu.memory_space<vmem>>) attributes {dimension_semantics = [#tpu.dimension_semantics<parallel>, #tpu.dimension_semantics<parallel>, #tpu.dimension_semantics<arbitrary>], iteration_bounds = array<i64: 2, 2, 2>, scalar_prefetch = 0 : i64, scratch_operands = 3 : i64, tpu.core_type = #tpu.core_type<tc>, window_params = [{transform_indices = @transform_0, window_bounds = array<i64: 1, 16, 64>}, {transform_indices = @transform_1, window_bounds = array<i64: 1, 16, 64>}, {transform_indices = @transform_2, window_bounds = array<i64: 1, 32, 64>}, {transform_indices = @transform_3, window_bounds = array<i64: 1, 32, 64>}, {transform_indices = @transform_4, window_bounds = array<i64: 1, 1, 32>}, {pipeline_mode = #tpu.pipeline_mode<synchronous>, transform_indices = @transform_5, window_bounds = array<i64: 64, 64>}, {pipeline_mode = #tpu.pipeline_mode<synchronous>, transform_indices = @transform_6, window_bounds = array<i64: 1, 64>}, {pipeline_mode = #tpu.pipeline_mode<synchronous>, transform_indices = @transform_7, window_bounds = array<i64: 1, 64>}, {pipeline_mode = #tpu.pipeline_mode<synchronous>, transform_indices = @transform_8, window_bounds = array<i64: 1, 64>}, {transform_indices = @transform_9, window_bounds = array<i64: 64, 128>}, {transform_indices = @transform_10, window_bounds = array<i64: 1, 128>}, {transform_indices = @transform_11, window_bounds = array<i64: 128, 64>}, {pipeline_mode = #tpu.pipeline_mode<synchronous>, transform_indices = @transform_12, window_bounds = array<i64: 1, 64>}, {pipeline_mode = #tpu.pipeline_mode<synchronous>, transform_indices = @transform_13, window_bounds = array<i64: 1, 64>}, {pipeline_mode = #tpu.pipeline_mode<synchronous>, transform_indices = @transform_14, window_bounds = array<i64: 1, 64>}, {transform_indices = @transform_15, window_bounds = array<i64: 1, 16, 64>}]} {
    %c0_i32 = arith.constant 0 : i32
    %0 = arith.cmpi eq, %arg2, %c0_i32 : i32
    %1 = arith.extui %0 : i1 to i32
    %c0_i32_0 = arith.constant 0 : i32
    %2 = arith.cmpi ne, %1, %c0_i32_0 : i32
    scf.if %2 {
      %c0_17 = arith.constant 0 : index
      %c0_18 = arith.constant 0 : index
      %c0_19 = arith.constant 0 : index
      %26 = vector.load %arg3[%c0_17, %c0_18, %c0_19] : memref<1x16x64xf32, #tpu.memory_space<vmem>>, vector<1x16x64xf32>
      %27 = vector.shape_cast %26 : vector<1x16x64xf32> to vector<16x64xf32>
      %c0_20 = arith.constant 0 : index
      %c0_21 = arith.constant 0 : index
      %c0_22 = arith.constant 0 : index
      %28 = vector.load %arg4[%c0_20, %c0_21, %c0_22] : memref<1x16x64xbf16, #tpu.memory_space<vmem>>, vector<1x16x64xbf16>
      %29 = vector.shape_cast %28 : vector<1x16x64xbf16> to vector<16x64xbf16>
      %c0_23 = arith.constant 0 : index
      %c0_24 = arith.constant 0 : index
      %c0_25 = arith.constant 0 : index
      %30 = vector.load %arg5[%c0_23, %c0_24, %c0_25] : memref<1x32x64xbf16, #tpu.memory_space<vmem>>, vector<1x32x64xbf16>
      %31 = vector.shape_cast %30 : vector<1x32x64xbf16> to vector<32x64xbf16>
      %c0_26 = arith.constant 0 : index
      %c0_27 = arith.constant 0 : index
      %c0_28 = arith.constant 0 : index
      %32 = vector.load %arg6[%c0_26, %c0_27, %c0_28] : memref<1x32x64xbf16, #tpu.memory_space<vmem>>, vector<1x32x64xbf16>
      %33 = vector.shape_cast %32 : vector<1x32x64xbf16> to vector<32x64xbf16>
      %c0_29 = arith.constant 0 : index
      %c0_30 = arith.constant 0 : index
      %c0_31 = arith.constant 0 : index
      %34 = vector.load %arg7[%c0_29, %c0_30, %c0_31] : memref<1x1x32xf32, #tpu.memory_space<vmem>>, vector<1x1x32xf32>
      %35 = vector.shape_cast %34 : vector<1x1x32xf32> to vector<1x32xf32>
      %36 = vector.shape_cast %35 : vector<1x32xf32> to vector<1x32xf32>
      %37 = vector.broadcast %36 : vector<1x32xf32> to vector<16x32xf32>
      %38 = vector.extract_strided_slice %29 {offsets = [0, 0], sizes = [16, 16], strides = [1, 1]} : vector<16x64xbf16> to vector<16x16xbf16>
      %39 = vector.extract_strided_slice %31 {offsets = [0, 0], sizes = [32, 16], strides = [1, 1]} : vector<32x64xbf16> to vector<32x16xbf16>
      %40 = vector.extract_strided_slice %33 {offsets = [0, 0], sizes = [32, 16], strides = [1, 1]} : vector<32x64xbf16> to vector<32x16xbf16>
      %cst_32 = arith.constant dense<0.000000e+00> : vector<16x32xf32>
      %41 = tpu.matmul %38, %39, %cst_32 {dimension_numbers = #tpu.dot_dimension_numbers<[1], [1], [0], [0], [0, 0, 1, 0], [], []>} : vector<16x16xbf16>, vector<32x16xbf16>, vector<16x32xf32> -> vector<16x32xf32>
      %42 = arith.addf %41, %37 : vector<16x32xf32>
      %cst_33 = arith.constant dense<0xFF800000> : vector<16xf32>
      %43 = vector.multi_reduction <maximumf>, %42, %cst_33 [1] : vector<16x32xf32> to vector<16xf32>
      %44 = vector.shape_cast %43 : vector<16xf32> to vector<16x1xf32>
      %45 = vector.broadcast %44 : vector<16x1xf32> to vector<16x32xf32>
      %46 = arith.subf %42, %45 : vector<16x32xf32>
      %47 = math.exp %46 : vector<16x32xf32>
      %cst_34 = arith.constant dense<0.000000e+00> : vector<16xf32>
      %48 = vector.multi_reduction <add>, %47, %cst_34 [1] : vector<16x32xf32> to vector<16xf32>
      %49 = vector.shape_cast %48 : vector<16xf32> to vector<16x1xf32>
      %50 = tpu.reciprocal %49 {approx = true} : vector<16x1xf32> -> vector<16x1xf32>
      %51 = vector.broadcast %50 : vector<16x1xf32> to vector<16x32xf32>
      %52 = arith.mulf %47, %51 : vector<16x32xf32>
      %53 = arith.truncf %52 : vector<16x32xf32> to vector<16x32xbf16>
      %cst_35 = arith.constant dense<0.000000e+00> : vector<16x16xf32>
      %54 = tpu.matmul %53, %40, %cst_35 {dimension_numbers = #tpu.dot_dimension_numbers<[1], [0], [0], [1], [0, 0, 1, 1], [], []>} : vector<16x32xbf16>, vector<32x16xbf16>, vector<16x16xf32> -> vector<16x16xf32>
      %55 = vector.extract_strided_slice %29 {offsets = [0, 16], sizes = [16, 16], strides = [1, 1]} : vector<16x64xbf16> to vector<16x16xbf16>
      %56 = vector.extract_strided_slice %31 {offsets = [0, 16], sizes = [32, 16], strides = [1, 1]} : vector<32x64xbf16> to vector<32x16xbf16>
      %57 = vector.extract_strided_slice %33 {offsets = [0, 16], sizes = [32, 16], strides = [1, 1]} : vector<32x64xbf16> to vector<32x16xbf16>
      %cst_36 = arith.constant dense<0.000000e+00> : vector<16x32xf32>
      %58 = tpu.matmul %55, %56, %cst_36 {dimension_numbers = #tpu.dot_dimension_numbers<[1], [1], [0], [0], [0, 0, 1, 0], [], []>} : vector<16x16xbf16>, vector<32x16xbf16>, vector<16x32xf32> -> vector<16x32xf32>
      %59 = arith.addf %58, %37 : vector<16x32xf32>
      %cst_37 = arith.constant dense<0xFF800000> : vector<16xf32>
      %60 = vector.multi_reduction <maximumf>, %59, %cst_37 [1] : vector<16x32xf32> to vector<16xf32>
      %61 = vector.shape_cast %60 : vector<16xf32> to vector<16x1xf32>
      %62 = vector.broadcast %61 : vector<16x1xf32> to vector<16x32xf32>
      %63 = arith.subf %59, %62 : vector<16x32xf32>
      %64 = math.exp %63 : vector<16x32xf32>
      %cst_38 = arith.constant dense<0.000000e+00> : vector<16xf32>
      %65 = vector.multi_reduction <add>, %64, %cst_38 [1] : vector<16x32xf32> to vector<16xf32>
      %66 = vector.shape_cast %65 : vector<16xf32> to vector<16x1xf32>
      %67 = tpu.reciprocal %66 {approx = true} : vector<16x1xf32> -> vector<16x1xf32>
      %68 = vector.broadcast %67 : vector<16x1xf32> to vector<16x32xf32>
      %69 = arith.mulf %64, %68 : vector<16x32xf32>
      %70 = arith.truncf %69 : vector<16x32xf32> to vector<16x32xbf16>
      %cst_39 = arith.constant dense<0.000000e+00> : vector<16x16xf32>
      %71 = tpu.matmul %70, %57, %cst_39 {dimension_numbers = #tpu.dot_dimension_numbers<[1], [0], [0], [1], [0, 0, 1, 1], [], []>} : vector<16x32xbf16>, vector<32x16xbf16>, vector<16x16xf32> -> vector<16x16xf32>
      %72 = vector.extract_strided_slice %29 {offsets = [0, 32], sizes = [16, 16], strides = [1, 1]} : vector<16x64xbf16> to vector<16x16xbf16>
      %73 = vector.extract_strided_slice %31 {offsets = [0, 32], sizes = [32, 16], strides = [1, 1]} : vector<32x64xbf16> to vector<32x16xbf16>
      %74 = vector.extract_strided_slice %33 {offsets = [0, 32], sizes = [32, 16], strides = [1, 1]} : vector<32x64xbf16> to vector<32x16xbf16>
      %cst_40 = arith.constant dense<0.000000e+00> : vector<16x32xf32>
      %75 = tpu.matmul %72, %73, %cst_40 {dimension_numbers = #tpu.dot_dimension_numbers<[1], [1], [0], [0], [0, 0, 1, 0], [], []>} : vector<16x16xbf16>, vector<32x16xbf16>, vector<16x32xf32> -> vector<16x32xf32>
      %76 = arith.addf %75, %37 : vector<16x32xf32>
      %cst_41 = arith.constant dense<0xFF800000> : vector<16xf32>
      %77 = vector.multi_reduction <maximumf>, %76, %cst_41 [1] : vector<16x32xf32> to vector<16xf32>
      %78 = vector.shape_cast %77 : vector<16xf32> to vector<16x1xf32>
      %79 = vector.broadcast %78 : vector<16x1xf32> to vector<16x32xf32>
      %80 = arith.subf %76, %79 : vector<16x32xf32>
      %81 = math.exp %80 : vector<16x32xf32>
      %cst_42 = arith.constant dense<0.000000e+00> : vector<16xf32>
      %82 = vector.multi_reduction <add>, %81, %cst_42 [1] : vector<16x32xf32> to vector<16xf32>
      %83 = vector.shape_cast %82 : vector<16xf32> to vector<16x1xf32>
      %84 = tpu.reciprocal %83 {approx = true} : vector<16x1xf32> -> vector<16x1xf32>
      %85 = vector.broadcast %84 : vector<16x1xf32> to vector<16x32xf32>
      %86 = arith.mulf %81, %85 : vector<16x32xf32>
      %87 = arith.truncf %86 : vector<16x32xf32> to vector<16x32xbf16>
      %cst_43 = arith.constant dense<0.000000e+00> : vector<16x16xf32>
      %88 = tpu.matmul %87, %74, %cst_43 {dimension_numbers = #tpu.dot_dimension_numbers<[1], [0], [0], [1], [0, 0, 1, 1], [], []>} : vector<16x32xbf16>, vector<32x16xbf16>, vector<16x16xf32> -> vector<16x16xf32>
      %89 = vector.extract_strided_slice %29 {offsets = [0, 48], sizes = [16, 16], strides = [1, 1]} : vector<16x64xbf16> to vector<16x16xbf16>
      %90 = vector.extract_strided_slice %31 {offsets = [0, 48], sizes = [32, 16], strides = [1, 1]} : vector<32x64xbf16> to vector<32x16xbf16>
      %91 = vector.extract_strided_slice %33 {offsets = [0, 48], sizes = [32, 16], strides = [1, 1]} : vector<32x64xbf16> to vector<32x16xbf16>
      %cst_44 = arith.constant dense<0.000000e+00> : vector<16x32xf32>
      %92 = tpu.matmul %89, %90, %cst_44 {dimension_numbers = #tpu.dot_dimension_numbers<[1], [1], [0], [0], [0, 0, 1, 0], [], []>} : vector<16x16xbf16>, vector<32x16xbf16>, vector<16x32xf32> -> vector<16x32xf32>
      %93 = arith.addf %92, %37 : vector<16x32xf32>
      %cst_45 = arith.constant dense<0xFF800000> : vector<16xf32>
      %94 = vector.multi_reduction <maximumf>, %93, %cst_45 [1] : vector<16x32xf32> to vector<16xf32>
      %95 = vector.shape_cast %94 : vector<16xf32> to vector<16x1xf32>
      %96 = vector.broadcast %95 : vector<16x1xf32> to vector<16x32xf32>
      %97 = arith.subf %93, %96 : vector<16x32xf32>
      %98 = math.exp %97 : vector<16x32xf32>
      %cst_46 = arith.constant dense<0.000000e+00> : vector<16xf32>
      %99 = vector.multi_reduction <add>, %98, %cst_46 [1] : vector<16x32xf32> to vector<16xf32>
      %100 = vector.shape_cast %99 : vector<16xf32> to vector<16x1xf32>
      %101 = tpu.reciprocal %100 {approx = true} : vector<16x1xf32> -> vector<16x1xf32>
      %102 = vector.broadcast %101 : vector<16x1xf32> to vector<16x32xf32>
      %103 = arith.mulf %98, %102 : vector<16x32xf32>
      %104 = arith.truncf %103 : vector<16x32xf32> to vector<16x32xbf16>
      %cst_47 = arith.constant dense<0.000000e+00> : vector<16x16xf32>
      %105 = tpu.matmul %104, %91, %cst_47 {dimension_numbers = #tpu.dot_dimension_numbers<[1], [0], [0], [1], [0, 0, 1, 1], [], []>} : vector<16x32xbf16>, vector<32x16xbf16>, vector<16x16xf32> -> vector<16x16xf32>
      %106 = tpu.concatenate %54, %71, %88, %105 in 1 : vector<16x16xf32>, vector<16x16xf32>, vector<16x16xf32>, vector<16x16xf32> -> vector<16x64xf32>
      %107 = arith.truncf %106 : vector<16x64xf32> to vector<16x64xbf16>
      %c0_48 = arith.constant 0 : index
      %c0_49 = arith.constant 0 : index
      %108 = vector.load %arg8[%c0_48, %c0_49] : memref<64x64xbf16, #tpu.memory_space<vmem>>, vector<64x64xbf16>
      %cst_50 = arith.constant dense<0.000000e+00> : vector<16x64xf32>
      %109 = tpu.matmul %107, %108, %cst_50 {dimension_numbers = #tpu.dot_dimension_numbers<[1], [0], [0], [1], [0, 0, 1, 1], [], []>} : vector<16x64xbf16>, vector<64x64xbf16>, vector<16x64xf32> -> vector<16x64xf32>
      %c0_51 = arith.constant 0 : index
      %c0_52 = arith.constant 0 : index
      %110 = vector.load %arg9[%c0_51, %c0_52] : memref<1x64xf32, #tpu.memory_space<vmem>>, vector<1x64xf32>
      %111 = vector.broadcast %110 : vector<1x64xf32> to vector<16x64xf32>
      %112 = arith.addf %109, %111 : vector<16x64xf32>
      %113 = arith.addf %112, %27 : vector<16x64xf32>
      %c0_53 = arith.constant 0 : index
      %c0_54 = arith.constant 0 : index
      %114 = vector.load %arg10[%c0_53, %c0_54] : memref<1x64xf32, #tpu.memory_space<vmem>>, vector<1x64xf32>
      %c0_55 = arith.constant 0 : index
      %c0_56 = arith.constant 0 : index
      %115 = vector.load %arg11[%c0_55, %c0_56] : memref<1x64xf32, #tpu.memory_space<vmem>>, vector<1x64xf32>
      %cst_57 = arith.constant dense<0.000000e+00> : vector<16xf32>
      %116 = vector.multi_reduction <add>, %113, %cst_57 [1] : vector<16x64xf32> to vector<16xf32>
      %117 = vector.shape_cast %116 : vector<16xf32> to vector<16x1xf32>
      %cst_58 = arith.constant 6.400000e+01 : f32
      %118 = vector.broadcast %cst_58 : f32 to vector<16x1xf32>
      %119 = arith.divf %117, %118 : vector<16x1xf32>
      %120 = vector.broadcast %119 : vector<16x1xf32> to vector<16x64xf32>
      %121 = arith.subf %113, %120 : vector<16x64xf32>
      %122 = arith.mulf %121, %121 : vector<16x64xf32>
      %cst_59 = arith.constant dense<0.000000e+00> : vector<16xf32>
      %123 = vector.multi_reduction <add>, %122, %cst_59 [1] : vector<16x64xf32> to vector<16xf32>
      %124 = vector.shape_cast %123 : vector<16xf32> to vector<16x1xf32>
      %cst_60 = arith.constant 6.400000e+01 : f32
      %125 = vector.broadcast %cst_60 : f32 to vector<16x1xf32>
      %126 = arith.divf %124, %125 : vector<16x1xf32>
      %127 = vector.broadcast %119 : vector<16x1xf32> to vector<16x64xf32>
      %128 = arith.subf %113, %127 : vector<16x64xf32>
      %cst_61 = arith.constant 9.99999996E-13 : f32
      %129 = vector.broadcast %cst_61 : f32 to vector<16x1xf32>
      %130 = arith.addf %126, %129 : vector<16x1xf32>
      %131 = math.rsqrt %130 : vector<16x1xf32>
      %132 = vector.broadcast %131 : vector<16x1xf32> to vector<16x64xf32>
      %133 = arith.mulf %128, %132 : vector<16x64xf32>
      %134 = vector.broadcast %114 : vector<1x64xf32> to vector<16x64xf32>
      %135 = arith.mulf %133, %134 : vector<16x64xf32>
      %136 = vector.broadcast %115 : vector<1x64xf32> to vector<16x64xf32>
      %137 = arith.addf %135, %136 : vector<16x64xf32>
      %c0_62 = arith.constant 0 : index
      %c0_63 = arith.constant 0 : index
      %138 = vector.load %arg19[%c0_62, %c0_63] : memref<16x64xf32, #tpu.memory_space<vmem>>, vector<16x64xf32>
      tpu.vector_store %arg19[%c0_62, %c0_63], %137 {strides = array<i32>} : memref<16x64xf32, #tpu.memory_space<vmem>>, vector<16x64xf32>,
      %139 = arith.truncf %137 : vector<16x64xf32> to vector<16x64xbf16>
      %c0_64 = arith.constant 0 : index
      %c0_65 = arith.constant 0 : index
      %140 = vector.load %arg20[%c0_64, %c0_65] : memref<16x64xbf16, #tpu.memory_space<vmem>>, vector<16x64xbf16>
      tpu.vector_store %arg20[%c0_64, %c0_65], %139 {strides = array<i32>} : memref<16x64xbf16, #tpu.memory_space<vmem>>, vector<16x64xbf16>,
      %cst_66 = arith.constant 0.000000e+00 : f32
      %141 = vector.broadcast %cst_66 : f32 to vector<16x64xf32>
      %c0_67 = arith.constant 0 : index
      %c0_68 = arith.constant 0 : index
      %142 = vector.load %arg21[%c0_67, %c0_68] : memref<16x64xf32, #tpu.memory_space<vmem>>, vector<16x64xf32>
      tpu.vector_store %arg21[%c0_67, %c0_68], %141 {strides = array<i32>} : memref<16x64xf32, #tpu.memory_space<vmem>>, vector<16x64xf32>,
    } else {
    }
    %c0 = arith.constant 0 : index
    %c0_1 = arith.constant 0 : index
    %3 = vector.load %arg20[%c0, %c0_1] : memref<16x64xbf16, #tpu.memory_space<vmem>>, vector<16x64xbf16>
    %c0_2 = arith.constant 0 : index
    %c0_3 = arith.constant 0 : index
    %4 = vector.load %arg12[%c0_2, %c0_3] : memref<64x128xbf16, #tpu.memory_space<vmem>>, vector<64x128xbf16>
    %cst = arith.constant dense<0.000000e+00> : vector<16x128xf32>
    %5 = tpu.matmul %3, %4, %cst {dimension_numbers = #tpu.dot_dimension_numbers<[1], [0], [0], [1], [0, 0, 1, 1], [], []>} : vector<16x64xbf16>, vector<64x128xbf16>, vector<16x128xf32> -> vector<16x128xf32>
    %c0_4 = arith.constant 0 : index
    %c0_5 = arith.constant 0 : index
    %6 = vector.load %arg13[%c0_4, %c0_5] : memref<1x128xf32, #tpu.memory_space<vmem>>, vector<1x128xf32>
    %7 = vector.broadcast %6 : vector<1x128xf32> to vector<16x128xf32>
    %8 = arith.addf %5, %7 : vector<16x128xf32>
    %cst_6 = arith.constant 5.000000e-01 : f32
    %9 = vector.broadcast %cst_6 : f32 to vector<16x128xf32>
    %10 = arith.mulf %9, %8 : vector<16x128xf32>
    %cst_7 = arith.constant 0.707106769 : f32
    %11 = vector.broadcast %cst_7 : f32 to vector<16x128xf32>
    %12 = arith.mulf %8, %11 : vector<16x128xf32>
    %13 = math.erf %12 : vector<16x128xf32>
    %cst_8 = arith.constant 1.000000e+00 : f32
    %14 = vector.broadcast %cst_8 : f32 to vector<16x128xf32>
    %15 = arith.addf %14, %13 : vector<16x128xf32>
    %16 = arith.mulf %10, %15 : vector<16x128xf32>
    %c0_9 = arith.constant 0 : index
    %c0_10 = arith.constant 0 : index
    %17 = vector.load %arg21[%c0_9, %c0_10] : memref<16x64xf32, #tpu.memory_space<vmem>>, vector<16x64xf32>
    %18 = arith.truncf %16 : vector<16x128xf32> to vector<16x128xbf16>
    %c0_11 = arith.constant 0 : index
    %c0_12 = arith.constant 0 : index
    %19 = vector.load %arg14[%c0_11, %c0_12] : memref<128x64xbf16, #tpu.memory_space<vmem>>, vector<128x64xbf16>
    %cst_13 = arith.constant dense<0.000000e+00> : vector<16x64xf32>
    %20 = tpu.matmul %18, %19, %cst_13 {dimension_numbers = #tpu.dot_dimension_numbers<[1], [0], [0], [1], [0, 0, 1, 1], [], []>} : vector<16x128xbf16>, vector<128x64xbf16>, vector<16x64xf32> -> vector<16x64xf32>
    %21 = arith.addf %17, %20 : vector<16x64xf32>
    %c0_14 = arith.constant 0 : index
    %c0_15 = arith.constant 0 : index
    %22 = vector.load %arg21[%c0_14, %c0_15] : memref<16x64xf32, #tpu.memory_space<vmem>>, vector<16x64xf32>
    tpu.vector_store %arg21[%c0_14, %c0_15], %21 {strides = array<i32>} : memref<16x64xf32, #tpu.memory_space<vmem>>, vector<16x64xf32>,
    %c1_i32 = arith.constant 1 : i32
    %23 = arith.cmpi eq, %arg2, %c1_i32 : i32
    %24 = arith.extui %23 : i1 to i32
    %c0_i32_16 = arith.constant 0 : i32
    %25 = arith.cmpi ne, %24, %c0_i32_16 : i32
    scf.if %25 {
      %c0_17 = arith.constant 0 : index
      %c0_18 = arith.constant 0 : index
      %26 = vector.load %arg21[%c0_17, %c0_18] : memref<16x64xf32, #tpu.memory_space<vmem>>, vector<16x64xf32>
      %c0_19 = arith.constant 0 : index
      %c0_20 = arith.constant 0 : index
      %27 = vector.load %arg15[%c0_19, %c0_20] : memref<1x64xf32, #tpu.memory_space<vmem>>, vector<1x64xf32>
      %28 = vector.broadcast %27 : vector<1x64xf32> to vector<16x64xf32>
      %29 = arith.addf %26, %28 : vector<16x64xf32>
      %c0_21 = arith.constant 0 : index
      %c0_22 = arith.constant 0 : index
      %30 = vector.load %arg19[%c0_21, %c0_22] : memref<16x64xf32, #tpu.memory_space<vmem>>, vector<16x64xf32>
      %31 = arith.addf %29, %30 : vector<16x64xf32>
      %c0_23 = arith.constant 0 : index
      %c0_24 = arith.constant 0 : index
      %32 = vector.load %arg16[%c0_23, %c0_24] : memref<1x64xf32, #tpu.memory_space<vmem>>, vector<1x64xf32>
      %c0_25 = arith.constant 0 : index
      %c0_26 = arith.constant 0 : index
      %33 = vector.load %arg17[%c0_25, %c0_26] : memref<1x64xf32, #tpu.memory_space<vmem>>, vector<1x64xf32>
      %cst_27 = arith.constant dense<0.000000e+00> : vector<16xf32>
      %34 = vector.multi_reduction <add>, %31, %cst_27 [1] : vector<16x64xf32> to vector<16xf32>
      %35 = vector.shape_cast %34 : vector<16xf32> to vector<16x1xf32>
      %cst_28 = arith.constant 6.400000e+01 : f32
      %36 = vector.broadcast %cst_28 : f32 to vector<16x1xf32>
      %37 = arith.divf %35, %36 : vector<16x1xf32>
      %38 = vector.broadcast %37 : vector<16x1xf32> to vector<16x64xf32>
      %39 = arith.subf %31, %38 : vector<16x64xf32>
      %40 = arith.mulf %39, %39 : vector<16x64xf32>
      %cst_29 = arith.constant dense<0.000000e+00> : vector<16xf32>
      %41 = vector.multi_reduction <add>, %40, %cst_29 [1] : vector<16x64xf32> to vector<16xf32>
      %42 = vector.shape_cast %41 : vector<16xf32> to vector<16x1xf32>
      %cst_30 = arith.constant 6.400000e+01 : f32
      %43 = vector.broadcast %cst_30 : f32 to vector<16x1xf32>
      %44 = arith.divf %42, %43 : vector<16x1xf32>
      %45 = vector.broadcast %37 : vector<16x1xf32> to vector<16x64xf32>
      %46 = arith.subf %31, %45 : vector<16x64xf32>
      %cst_31 = arith.constant 9.99999996E-13 : f32
      %47 = vector.broadcast %cst_31 : f32 to vector<16x1xf32>
      %48 = arith.addf %44, %47 : vector<16x1xf32>
      %49 = math.rsqrt %48 : vector<16x1xf32>
      %50 = vector.broadcast %49 : vector<16x1xf32> to vector<16x64xf32>
      %51 = arith.mulf %46, %50 : vector<16x64xf32>
      %52 = vector.broadcast %32 : vector<1x64xf32> to vector<16x64xf32>
      %53 = arith.mulf %51, %52 : vector<16x64xf32>
      %54 = vector.broadcast %33 : vector<1x64xf32> to vector<16x64xf32>
      %55 = arith.addf %53, %54 : vector<16x64xf32>
      %c0_32 = arith.constant 0 : index
      %c0_33 = arith.constant 0 : index
      %c0_34 = arith.constant 0 : index
      %56 = vector.load %arg18[%c0_32, %c0_33, %c0_34] : memref<1x16x64xf32, #tpu.memory_space<vmem>>, vector<1x16x64xf32>
      %57 = vector.shape_cast %56 : vector<1x16x64xf32> to vector<16x64xf32>
      %58 = vector.shape_cast %55 : vector<16x64xf32> to vector<1x16x64xf32>
      tpu.vector_store %arg18[%c0_32, %c0_33, %c0_34], %58 {strides = array<i32>} : memref<1x16x64xf32, #tpu.memory_space<vmem>>, vector<1x16x64xf32>,
    } else {
    }
    return
  }
  func.func @transform_0(%arg0: i32, %arg1: i32, %arg2: i32) -> (i32, i32, i32) {
    %c0_i32 = arith.constant 0 : i32
    %c0_i32_0 = arith.constant 0 : i32
    return %arg0, %arg1, %c0_i32 : i32, i32, i32
  }
  func.func @transform_1(%arg0: i32, %arg1: i32, %arg2: i32) -> (i32, i32, i32) {
    %c0_i32 = arith.constant 0 : i32
    %c0_i32_0 = arith.constant 0 : i32
    return %arg0, %arg1, %c0_i32 : i32, i32, i32
  }
  func.func @transform_2(%arg0: i32, %arg1: i32, %arg2: i32) -> (i32, i32, i32) {
    %c0_i32 = arith.constant 0 : i32
    %c0_i32_0 = arith.constant 0 : i32
    %c0_i32_1 = arith.constant 0 : i32
    return %arg0, %c0_i32, %c0_i32_0 : i32, i32, i32
  }
  func.func @transform_3(%arg0: i32, %arg1: i32, %arg2: i32) -> (i32, i32, i32) {
    %c0_i32 = arith.constant 0 : i32
    %c0_i32_0 = arith.constant 0 : i32
    %c0_i32_1 = arith.constant 0 : i32
    return %arg0, %c0_i32, %c0_i32_0 : i32, i32, i32
  }
  func.func @transform_4(%arg0: i32, %arg1: i32, %arg2: i32) -> (i32, i32, i32) {
    %c0_i32 = arith.constant 0 : i32
    %c0_i32_0 = arith.constant 0 : i32
    %c0_i32_1 = arith.constant 0 : i32
    return %arg0, %c0_i32, %c0_i32_0 : i32, i32, i32
  }
  func.func @transform_5(%arg0: i32, %arg1: i32, %arg2: i32) -> (i32, i32) {
    %c0_i32 = arith.constant 0 : i32
    %c0_i32_0 = arith.constant 0 : i32
    %c0_i32_1 = arith.constant 0 : i32
    return %c0_i32, %c0_i32_0 : i32, i32
  }
  func.func @transform_6(%arg0: i32, %arg1: i32, %arg2: i32) -> (i32, i32) {
    %c0_i32 = arith.constant 0 : i32
    %c0_i32_0 = arith.constant 0 : i32
    %c0_i32_1 = arith.constant 0 : i32
    return %c0_i32, %c0_i32_0 : i32, i32
  }
  func.func @transform_7(%arg0: i32, %arg1: i32, %arg2: i32) -> (i32, i32) {
    %c0_i32 = arith.constant 0 : i32
    %c0_i32_0 = arith.constant 0 : i32
    %c0_i32_1 = arith.constant 0 : i32
    return %c0_i32, %c0_i32_0 : i32, i32
  }
  func.func @transform_8(%arg0: i32, %arg1: i32, %arg2: i32) -> (i32, i32) {
    %c0_i32 = arith.constant 0 : i32
    %c0_i32_0 = arith.constant 0 : i32
    %c0_i32_1 = arith.constant 0 : i32
    return %c0_i32, %c0_i32_0 : i32, i32
  }
  func.func @transform_9(%arg0: i32, %arg1: i32, %arg2: i32) -> (i32, i32) {
    %c0_i32 = arith.constant 0 : i32
    %c0_i32_0 = arith.constant 0 : i32
    return %c0_i32, %arg2 : i32, i32
  }
  func.func @transform_10(%arg0: i32, %arg1: i32, %arg2: i32) -> (i32, i32) {
    %c0_i32 = arith.constant 0 : i32
    %c0_i32_0 = arith.constant 0 : i32
    return %c0_i32, %arg2 : i32, i32
  }
  func.func @transform_11(%arg0: i32, %arg1: i32, %arg2: i32) -> (i32, i32) {
    %c0_i32 = arith.constant 0 : i32
    %c0_i32_0 = arith.constant 0 : i32
    return %arg2, %c0_i32 : i32, i32
  }
  func.func @transform_12(%arg0: i32, %arg1: i32, %arg2: i32) -> (i32, i32) {
    %c0_i32 = arith.constant 0 : i32
    %c0_i32_0 = arith.constant 0 : i32
    %c0_i32_1 = arith.constant 0 : i32
    return %c0_i32, %c0_i32_0 : i32, i32
  }
  func.func @transform_13(%arg0: i32, %arg1: i32, %arg2: i32) -> (i32, i32) {
    %c0_i32 = arith.constant 0 : i32
    %c0_i32_0 = arith.constant 0 : i32
    %c0_i32_1 = arith.constant 0 : i32
    return %c0_i32, %c0_i32_0 : i32, i32
  }
  func.func @transform_14(%arg0: i32, %arg1: i32, %arg2: i32) -> (i32, i32) {
    %c0_i32 = arith.constant 0 : i32
    %c0_i32_0 = arith.constant 0 : i32
    %c0_i32_1 = arith.constant 0 : i32
    return %c0_i32, %c0_i32_0 : i32, i32
  }
  func.func @transform_15(%arg0: i32, %arg1: i32, %arg2: i32) -> (i32, i32, i32) {
    %c0_i32 = arith.constant 0 : i32
    %c0_i32_0 = arith.constant 0 : i32
    return %arg0, %arg1, %c0_i32 : i32, i32, i32
  }
}

module attributes {stable_mosaic.version = 11 : i64} {
  func.func @_qkv_kernel(%arg0: i32, %arg1: i32, %arg2: memref<1x16x64xf32, #tpu.memory_space<vmem>>, %arg3: memref<64x64xbf16, #tpu.memory_space<vmem>>, %arg4: memref<1x64xf32, #tpu.memory_space<vmem>>, %arg5: memref<64x64xbf16, #tpu.memory_space<vmem>>, %arg6: memref<1x64xf32, #tpu.memory_space<vmem>>, %arg7: memref<64x64xbf16, #tpu.memory_space<vmem>>, %arg8: memref<1x64xf32, #tpu.memory_space<vmem>>, %arg9: memref<1x16x64xbf16, #tpu.memory_space<vmem>>, %arg10: memref<1x16x64xbf16, #tpu.memory_space<vmem>>, %arg11: memref<1x16x64xbf16, #tpu.memory_space<vmem>>) attributes {dimension_semantics = [#tpu.dimension_semantics<parallel>, #tpu.dimension_semantics<parallel>], iteration_bounds = array<i64: 2, 2>, scalar_prefetch = 0 : i64, scratch_operands = 0 : i64, tpu.core_type = #tpu.core_type<tc>, window_params = [{transform_indices = @transform_0, window_bounds = array<i64: 1, 16, 64>}, {pipeline_mode = #tpu.pipeline_mode<synchronous>, transform_indices = @transform_1, window_bounds = array<i64: 64, 64>}, {pipeline_mode = #tpu.pipeline_mode<synchronous>, transform_indices = @transform_2, window_bounds = array<i64: 1, 64>}, {pipeline_mode = #tpu.pipeline_mode<synchronous>, transform_indices = @transform_3, window_bounds = array<i64: 64, 64>}, {pipeline_mode = #tpu.pipeline_mode<synchronous>, transform_indices = @transform_4, window_bounds = array<i64: 1, 64>}, {pipeline_mode = #tpu.pipeline_mode<synchronous>, transform_indices = @transform_5, window_bounds = array<i64: 64, 64>}, {pipeline_mode = #tpu.pipeline_mode<synchronous>, transform_indices = @transform_6, window_bounds = array<i64: 1, 64>}, {transform_indices = @transform_7, window_bounds = array<i64: 1, 16, 64>}, {transform_indices = @transform_8, window_bounds = array<i64: 1, 16, 64>}, {transform_indices = @transform_9, window_bounds = array<i64: 1, 16, 64>}]} {
    %c0 = arith.constant 0 : index
    %c0_0 = arith.constant 0 : index
    %c0_1 = arith.constant 0 : index
    %0 = vector.load %arg2[%c0, %c0_0, %c0_1] : memref<1x16x64xf32, #tpu.memory_space<vmem>>, vector<1x16x64xf32>
    %1 = vector.shape_cast %0 : vector<1x16x64xf32> to vector<16x64xf32>
    %2 = arith.truncf %1 : vector<16x64xf32> to vector<16x64xbf16>
    %c0_2 = arith.constant 0 : index
    %c0_3 = arith.constant 0 : index
    %3 = vector.load %arg3[%c0_2, %c0_3] : memref<64x64xbf16, #tpu.memory_space<vmem>>, vector<64x64xbf16>
    %cst = arith.constant dense<0.000000e+00> : vector<16x64xf32>
    %4 = tpu.matmul %2, %3, %cst {dimension_numbers = #tpu.dot_dimension_numbers<[1], [0], [0], [1], [0, 0, 1, 1], [], []>} : vector<16x64xbf16>, vector<64x64xbf16>, vector<16x64xf32> -> vector<16x64xf32>
    %c0_4 = arith.constant 0 : index
    %c0_5 = arith.constant 0 : index
    %5 = vector.load %arg4[%c0_4, %c0_5] : memref<1x64xf32, #tpu.memory_space<vmem>>, vector<1x64xf32>
    %6 = vector.broadcast %5 : vector<1x64xf32> to vector<16x64xf32>
    %7 = arith.addf %4, %6 : vector<16x64xf32>
    %c0_6 = arith.constant 0 : index
    %c0_7 = arith.constant 0 : index
    %8 = vector.load %arg5[%c0_6, %c0_7] : memref<64x64xbf16, #tpu.memory_space<vmem>>, vector<64x64xbf16>
    %cst_8 = arith.constant dense<0.000000e+00> : vector<16x64xf32>
    %9 = tpu.matmul %2, %8, %cst_8 {dimension_numbers = #tpu.dot_dimension_numbers<[1], [0], [0], [1], [0, 0, 1, 1], [], []>} : vector<16x64xbf16>, vector<64x64xbf16>, vector<16x64xf32> -> vector<16x64xf32>
    %c0_9 = arith.constant 0 : index
    %c0_10 = arith.constant 0 : index
    %10 = vector.load %arg6[%c0_9, %c0_10] : memref<1x64xf32, #tpu.memory_space<vmem>>, vector<1x64xf32>
    %11 = vector.broadcast %10 : vector<1x64xf32> to vector<16x64xf32>
    %12 = arith.addf %9, %11 : vector<16x64xf32>
    %c0_11 = arith.constant 0 : index
    %c0_12 = arith.constant 0 : index
    %13 = vector.load %arg7[%c0_11, %c0_12] : memref<64x64xbf16, #tpu.memory_space<vmem>>, vector<64x64xbf16>
    %cst_13 = arith.constant dense<0.000000e+00> : vector<16x64xf32>
    %14 = tpu.matmul %2, %13, %cst_13 {dimension_numbers = #tpu.dot_dimension_numbers<[1], [0], [0], [1], [0, 0, 1, 1], [], []>} : vector<16x64xbf16>, vector<64x64xbf16>, vector<16x64xf32> -> vector<16x64xf32>
    %c0_14 = arith.constant 0 : index
    %c0_15 = arith.constant 0 : index
    %15 = vector.load %arg8[%c0_14, %c0_15] : memref<1x64xf32, #tpu.memory_space<vmem>>, vector<1x64xf32>
    %16 = vector.broadcast %15 : vector<1x64xf32> to vector<16x64xf32>
    %17 = arith.addf %14, %16 : vector<16x64xf32>
    %18 = arith.truncf %7 : vector<16x64xf32> to vector<16x64xbf16>
    %c0_16 = arith.constant 0 : index
    %c0_17 = arith.constant 0 : index
    %c0_18 = arith.constant 0 : index
    %19 = vector.load %arg9[%c0_16, %c0_17, %c0_18] : memref<1x16x64xbf16, #tpu.memory_space<vmem>>, vector<1x16x64xbf16>
    %20 = vector.shape_cast %19 : vector<1x16x64xbf16> to vector<16x64xbf16>
    %21 = vector.shape_cast %18 : vector<16x64xbf16> to vector<1x16x64xbf16>
    tpu.vector_store %arg9[%c0_16, %c0_17, %c0_18], %21 {strides = array<i32>} : memref<1x16x64xbf16, #tpu.memory_space<vmem>>, vector<1x16x64xbf16>,
    %22 = arith.truncf %12 : vector<16x64xf32> to vector<16x64xbf16>
    %c0_19 = arith.constant 0 : index
    %c0_20 = arith.constant 0 : index
    %c0_21 = arith.constant 0 : index
    %23 = vector.load %arg10[%c0_19, %c0_20, %c0_21] : memref<1x16x64xbf16, #tpu.memory_space<vmem>>, vector<1x16x64xbf16>
    %24 = vector.shape_cast %23 : vector<1x16x64xbf16> to vector<16x64xbf16>
    %25 = vector.shape_cast %22 : vector<16x64xbf16> to vector<1x16x64xbf16>
    tpu.vector_store %arg10[%c0_19, %c0_20, %c0_21], %25 {strides = array<i32>} : memref<1x16x64xbf16, #tpu.memory_space<vmem>>, vector<1x16x64xbf16>,
    %26 = arith.truncf %17 : vector<16x64xf32> to vector<16x64xbf16>
    %c0_22 = arith.constant 0 : index
    %c0_23 = arith.constant 0 : index
    %c0_24 = arith.constant 0 : index
    %27 = vector.load %arg11[%c0_22, %c0_23, %c0_24] : memref<1x16x64xbf16, #tpu.memory_space<vmem>>, vector<1x16x64xbf16>
    %28 = vector.shape_cast %27 : vector<1x16x64xbf16> to vector<16x64xbf16>
    %29 = vector.shape_cast %26 : vector<16x64xbf16> to vector<1x16x64xbf16>
    tpu.vector_store %arg11[%c0_22, %c0_23, %c0_24], %29 {strides = array<i32>} : memref<1x16x64xbf16, #tpu.memory_space<vmem>>, vector<1x16x64xbf16>,
    return
  }
  func.func @transform_0(%arg0: i32, %arg1: i32) -> (i32, i32, i32) {
    %c0_i32 = arith.constant 0 : i32
    %c0_i32_0 = arith.constant 0 : i32
    return %arg0, %arg1, %c0_i32 : i32, i32, i32
  }
  func.func @transform_1(%arg0: i32, %arg1: i32) -> (i32, i32) {
    %c0_i32 = arith.constant 0 : i32
    %c0_i32_0 = arith.constant 0 : i32
    %c0_i32_1 = arith.constant 0 : i32
    return %c0_i32, %c0_i32_0 : i32, i32
  }
  func.func @transform_2(%arg0: i32, %arg1: i32) -> (i32, i32) {
    %c0_i32 = arith.constant 0 : i32
    %c0_i32_0 = arith.constant 0 : i32
    %c0_i32_1 = arith.constant 0 : i32
    return %c0_i32, %c0_i32_0 : i32, i32
  }
  func.func @transform_3(%arg0: i32, %arg1: i32) -> (i32, i32) {
    %c0_i32 = arith.constant 0 : i32
    %c0_i32_0 = arith.constant 0 : i32
    %c0_i32_1 = arith.constant 0 : i32
    return %c0_i32, %c0_i32_0 : i32, i32
  }
  func.func @transform_4(%arg0: i32, %arg1: i32) -> (i32, i32) {
    %c0_i32 = arith.constant 0 : i32
    %c0_i32_0 = arith.constant 0 : i32
    %c0_i32_1 = arith.constant 0 : i32
    return %c0_i32, %c0_i32_0 : i32, i32
  }
  func.func @transform_5(%arg0: i32, %arg1: i32) -> (i32, i32) {
    %c0_i32 = arith.constant 0 : i32
    %c0_i32_0 = arith.constant 0 : i32
    %c0_i32_1 = arith.constant 0 : i32
    return %c0_i32, %c0_i32_0 : i32, i32
  }
  func.func @transform_6(%arg0: i32, %arg1: i32) -> (i32, i32) {
    %c0_i32 = arith.constant 0 : i32
    %c0_i32_0 = arith.constant 0 : i32
    %c0_i32_1 = arith.constant 0 : i32
    return %c0_i32, %c0_i32_0 : i32, i32
  }
  func.func @transform_7(%arg0: i32, %arg1: i32) -> (i32, i32, i32) {
    %c0_i32 = arith.constant 0 : i32
    %c0_i32_0 = arith.constant 0 : i32
    return %arg0, %arg1, %c0_i32 : i32, i32, i32
  }
  func.func @transform_8(%arg0: i32, %arg1: i32) -> (i32, i32, i32) {
    %c0_i32 = arith.constant 0 : i32
    %c0_i32_0 = arith.constant 0 : i32
    return %arg0, %arg1, %c0_i32 : i32, i32, i32
  }
  func.func @transform_9(%arg0: i32, %arg1: i32) -> (i32, i32, i32) {
    %c0_i32 = arith.constant 0 : i32
    %c0_i32_0 = arith.constant 0 : i32
    return %arg0, %arg1, %c0_i32 : i32, i32, i32
  }
}

module attributes {stable_mosaic.version = 11 : i64} {
  func.func @_attn_ffn_kernel(%arg0: i32, %arg1: i32, %arg2: i32, %arg3: memref<1x16x64xf32, #tpu.memory_space<vmem>>, %arg4: memref<1x16x64xbf16, #tpu.memory_space<vmem>>, %arg5: memref<1x32x64xbf16, #tpu.memory_space<vmem>>, %arg6: memref<1x32x64xbf16, #tpu.memory_space<vmem>>, %arg7: memref<1x1x32xf32, #tpu.memory_space<vmem>>, %arg8: memref<64x64xbf16, #tpu.memory_space<vmem>>, %arg9: memref<1x64xf32, #tpu.memory_space<vmem>>, %arg10: memref<1x64xf32, #tpu.memory_space<vmem>>, %arg11: memref<1x64xf32, #tpu.memory_space<vmem>>, %arg12: memref<64x128xbf16, #tpu.memory_space<vmem>>, %arg13: memref<1x128xf32, #tpu.memory_space<vmem>>, %arg14: memref<128x64xbf16, #tpu.memory_space<vmem>>, %arg15: memref<1x64xf32, #tpu.memory_space<vmem>>, %arg16: memref<1x64xf32, #tpu.memory_space<vmem>>, %arg17: memref<1x64xf32, #tpu.memory_space<vmem>>, %arg18: memref<1x16x64xf32, #tpu.memory_space<vmem>>, %arg19: memref<16x64xf32, #tpu.memory_space<vmem>>, %arg20: memref<16x64xbf16, #tpu.memory_space<vmem>>, %arg21: memref<16x64xf32, #tpu.memory_space<vmem>>) attributes {dimension_semantics = [#tpu.dimension_semantics<parallel>, #tpu.dimension_semantics<parallel>, #tpu.dimension_semantics<arbitrary>], iteration_bounds = array<i64: 2, 2, 2>, scalar_prefetch = 0 : i64, scratch_operands = 3 : i64, tpu.core_type = #tpu.core_type<tc>, window_params = [{transform_indices = @transform_0, window_bounds = array<i64: 1, 16, 64>}, {transform_indices = @transform_1, window_bounds = array<i64: 1, 16, 64>}, {transform_indices = @transform_2, window_bounds = array<i64: 1, 32, 64>}, {transform_indices = @transform_3, window_bounds = array<i64: 1, 32, 64>}, {transform_indices = @transform_4, window_bounds = array<i64: 1, 1, 32>}, {pipeline_mode = #tpu.pipeline_mode<synchronous>, transform_indices = @transform_5, window_bounds = array<i64: 64, 64>}, {pipeline_mode = #tpu.pipeline_mode<synchronous>, transform_indices = @transform_6, window_bounds = array<i64: 1, 64>}, {pipeline_mode = #tpu.pipeline_mode<synchronous>, transform_indices = @transform_7, window_bounds = array<i64: 1, 64>}, {pipeline_mode = #tpu.pipeline_mode<synchronous>, transform_indices = @transform_8, window_bounds = array<i64: 1, 64>}, {transform_indices = @transform_9, window_bounds = array<i64: 64, 128>}, {transform_indices = @transform_10, window_bounds = array<i64: 1, 128>}, {transform_indices = @transform_11, window_bounds = array<i64: 128, 64>}, {pipeline_mode = #tpu.pipeline_mode<synchronous>, transform_indices = @transform_12, window_bounds = array<i64: 1, 64>}, {pipeline_mode = #tpu.pipeline_mode<synchronous>, transform_indices = @transform_13, window_bounds = array<i64: 1, 64>}, {pipeline_mode = #tpu.pipeline_mode<synchronous>, transform_indices = @transform_14, window_bounds = array<i64: 1, 64>}, {transform_indices = @transform_15, window_bounds = array<i64: 1, 16, 64>}]} {
    %c0_i32 = arith.constant 0 : i32
    %0 = arith.cmpi eq, %arg2, %c0_i32 : i32
    %1 = arith.extui %0 : i1 to i32
    %c0_i32_0 = arith.constant 0 : i32
    %2 = arith.cmpi ne, %1, %c0_i32_0 : i32
    scf.if %2 {
      %c0_17 = arith.constant 0 : index
      %c0_18 = arith.constant 0 : index
      %c0_19 = arith.constant 0 : index
      %26 = vector.load %arg3[%c0_17, %c0_18, %c0_19] : memref<1x16x64xf32, #tpu.memory_space<vmem>>, vector<1x16x64xf32>
      %27 = vector.shape_cast %26 : vector<1x16x64xf32> to vector<16x64xf32>
      %c0_20 = arith.constant 0 : index
      %c0_21 = arith.constant 0 : index
      %c0_22 = arith.constant 0 : index
      %28 = vector.load %arg4[%c0_20, %c0_21, %c0_22] : memref<1x16x64xbf16, #tpu.memory_space<vmem>>, vector<1x16x64xbf16>
      %29 = vector.shape_cast %28 : vector<1x16x64xbf16> to vector<16x64xbf16>
      %c0_23 = arith.constant 0 : index
      %c0_24 = arith.constant 0 : index
      %c0_25 = arith.constant 0 : index
      %30 = vector.load %arg5[%c0_23, %c0_24, %c0_25] : memref<1x32x64xbf16, #tpu.memory_space<vmem>>, vector<1x32x64xbf16>
      %31 = vector.shape_cast %30 : vector<1x32x64xbf16> to vector<32x64xbf16>
      %c0_26 = arith.constant 0 : index
      %c0_27 = arith.constant 0 : index
      %c0_28 = arith.constant 0 : index
      %32 = vector.load %arg6[%c0_26, %c0_27, %c0_28] : memref<1x32x64xbf16, #tpu.memory_space<vmem>>, vector<1x32x64xbf16>
      %33 = vector.shape_cast %32 : vector<1x32x64xbf16> to vector<32x64xbf16>
      %c0_29 = arith.constant 0 : index
      %c0_30 = arith.constant 0 : index
      %c0_31 = arith.constant 0 : index
      %34 = vector.load %arg7[%c0_29, %c0_30, %c0_31] : memref<1x1x32xf32, #tpu.memory_space<vmem>>, vector<1x1x32xf32>
      %35 = vector.shape_cast %34 : vector<1x1x32xf32> to vector<1x32xf32>
      %36 = vector.shape_cast %35 : vector<1x32xf32> to vector<1x32xf32>
      %37 = vector.broadcast %36 : vector<1x32xf32> to vector<16x32xf32>
      %38 = vector.extract_strided_slice %29 {offsets = [0, 0], sizes = [16, 16], strides = [1, 1]} : vector<16x64xbf16> to vector<16x16xbf16>
      %39 = vector.extract_strided_slice %31 {offsets = [0, 0], sizes = [32, 16], strides = [1, 1]} : vector<32x64xbf16> to vector<32x16xbf16>
      %40 = vector.extract_strided_slice %33 {offsets = [0, 0], sizes = [32, 16], strides = [1, 1]} : vector<32x64xbf16> to vector<32x16xbf16>
      %cst_32 = arith.constant dense<0.000000e+00> : vector<16x32xf32>
      %41 = tpu.matmul %38, %39, %cst_32 {dimension_numbers = #tpu.dot_dimension_numbers<[1], [1], [0], [0], [0, 0, 1, 0], [], []>} : vector<16x16xbf16>, vector<32x16xbf16>, vector<16x32xf32> -> vector<16x32xf32>
      %42 = arith.addf %41, %37 : vector<16x32xf32>
      %cst_33 = arith.constant dense<0xFF800000> : vector<16xf32>
      %43 = vector.multi_reduction <maximumf>, %42, %cst_33 [1] : vector<16x32xf32> to vector<16xf32>
      %44 = vector.shape_cast %43 : vector<16xf32> to vector<16x1xf32>
      %45 = vector.broadcast %44 : vector<16x1xf32> to vector<16x32xf32>
      %46 = arith.subf %42, %45 : vector<16x32xf32>
      %47 = math.exp %46 : vector<16x32xf32>
      %cst_34 = arith.constant dense<0.000000e+00> : vector<16xf32>
      %48 = vector.multi_reduction <add>, %47, %cst_34 [1] : vector<16x32xf32> to vector<16xf32>
      %49 = vector.shape_cast %48 : vector<16xf32> to vector<16x1xf32>
      %50 = tpu.reciprocal %49 {approx = true} : vector<16x1xf32> -> vector<16x1xf32>
      %51 = vector.broadcast %50 : vector<16x1xf32> to vector<16x32xf32>
      %52 = arith.mulf %47, %51 : vector<16x32xf32>
      %53 = arith.truncf %52 : vector<16x32xf32> to vector<16x32xbf16>
      %cst_35 = arith.constant dense<0.000000e+00> : vector<16x16xf32>
      %54 = tpu.matmul %53, %40, %cst_35 {dimension_numbers = #tpu.dot_dimension_numbers<[1], [0], [0], [1], [0, 0, 1, 1], [], []>} : vector<16x32xbf16>, vector<32x16xbf16>, vector<16x16xf32> -> vector<16x16xf32>
      %55 = vector.extract_strided_slice %29 {offsets = [0, 16], sizes = [16, 16], strides = [1, 1]} : vector<16x64xbf16> to vector<16x16xbf16>
      %56 = vector.extract_strided_slice %31 {offsets = [0, 16], sizes = [32, 16], strides = [1, 1]} : vector<32x64xbf16> to vector<32x16xbf16>
      %57 = vector.extract_strided_slice %33 {offsets = [0, 16], sizes = [32, 16], strides = [1, 1]} : vector<32x64xbf16> to vector<32x16xbf16>
      %cst_36 = arith.constant dense<0.000000e+00> : vector<16x32xf32>
      %58 = tpu.matmul %55, %56, %cst_36 {dimension_numbers = #tpu.dot_dimension_numbers<[1], [1], [0], [0], [0, 0, 1, 0], [], []>} : vector<16x16xbf16>, vector<32x16xbf16>, vector<16x32xf32> -> vector<16x32xf32>
      %59 = arith.addf %58, %37 : vector<16x32xf32>
      %cst_37 = arith.constant dense<0xFF800000> : vector<16xf32>
      %60 = vector.multi_reduction <maximumf>, %59, %cst_37 [1] : vector<16x32xf32> to vector<16xf32>
      %61 = vector.shape_cast %60 : vector<16xf32> to vector<16x1xf32>
      %62 = vector.broadcast %61 : vector<16x1xf32> to vector<16x32xf32>
      %63 = arith.subf %59, %62 : vector<16x32xf32>
      %64 = math.exp %63 : vector<16x32xf32>
      %cst_38 = arith.constant dense<0.000000e+00> : vector<16xf32>
      %65 = vector.multi_reduction <add>, %64, %cst_38 [1] : vector<16x32xf32> to vector<16xf32>
      %66 = vector.shape_cast %65 : vector<16xf32> to vector<16x1xf32>
      %67 = tpu.reciprocal %66 {approx = true} : vector<16x1xf32> -> vector<16x1xf32>
      %68 = vector.broadcast %67 : vector<16x1xf32> to vector<16x32xf32>
      %69 = arith.mulf %64, %68 : vector<16x32xf32>
      %70 = arith.truncf %69 : vector<16x32xf32> to vector<16x32xbf16>
      %cst_39 = arith.constant dense<0.000000e+00> : vector<16x16xf32>
      %71 = tpu.matmul %70, %57, %cst_39 {dimension_numbers = #tpu.dot_dimension_numbers<[1], [0], [0], [1], [0, 0, 1, 1], [], []>} : vector<16x32xbf16>, vector<32x16xbf16>, vector<16x16xf32> -> vector<16x16xf32>
      %72 = vector.extract_strided_slice %29 {offsets = [0, 32], sizes = [16, 16], strides = [1, 1]} : vector<16x64xbf16> to vector<16x16xbf16>
      %73 = vector.extract_strided_slice %31 {offsets = [0, 32], sizes = [32, 16], strides = [1, 1]} : vector<32x64xbf16> to vector<32x16xbf16>
      %74 = vector.extract_strided_slice %33 {offsets = [0, 32], sizes = [32, 16], strides = [1, 1]} : vector<32x64xbf16> to vector<32x16xbf16>
      %cst_40 = arith.constant dense<0.000000e+00> : vector<16x32xf32>
      %75 = tpu.matmul %72, %73, %cst_40 {dimension_numbers = #tpu.dot_dimension_numbers<[1], [1], [0], [0], [0, 0, 1, 0], [], []>} : vector<16x16xbf16>, vector<32x16xbf16>, vector<16x32xf32> -> vector<16x32xf32>
      %76 = arith.addf %75, %37 : vector<16x32xf32>
      %cst_41 = arith.constant dense<0xFF800000> : vector<16xf32>
      %77 = vector.multi_reduction <maximumf>, %76, %cst_41 [1] : vector<16x32xf32> to vector<16xf32>
      %78 = vector.shape_cast %77 : vector<16xf32> to vector<16x1xf32>
      %79 = vector.broadcast %78 : vector<16x1xf32> to vector<16x32xf32>
      %80 = arith.subf %76, %79 : vector<16x32xf32>
      %81 = math.exp %80 : vector<16x32xf32>
      %cst_42 = arith.constant dense<0.000000e+00> : vector<16xf32>
      %82 = vector.multi_reduction <add>, %81, %cst_42 [1] : vector<16x32xf32> to vector<16xf32>
      %83 = vector.shape_cast %82 : vector<16xf32> to vector<16x1xf32>
      %84 = tpu.reciprocal %83 {approx = true} : vector<16x1xf32> -> vector<16x1xf32>
      %85 = vector.broadcast %84 : vector<16x1xf32> to vector<16x32xf32>
      %86 = arith.mulf %81, %85 : vector<16x32xf32>
      %87 = arith.truncf %86 : vector<16x32xf32> to vector<16x32xbf16>
      %cst_43 = arith.constant dense<0.000000e+00> : vector<16x16xf32>
      %88 = tpu.matmul %87, %74, %cst_43 {dimension_numbers = #tpu.dot_dimension_numbers<[1], [0], [0], [1], [0, 0, 1, 1], [], []>} : vector<16x32xbf16>, vector<32x16xbf16>, vector<16x16xf32> -> vector<16x16xf32>
      %89 = vector.extract_strided_slice %29 {offsets = [0, 48], sizes = [16, 16], strides = [1, 1]} : vector<16x64xbf16> to vector<16x16xbf16>
      %90 = vector.extract_strided_slice %31 {offsets = [0, 48], sizes = [32, 16], strides = [1, 1]} : vector<32x64xbf16> to vector<32x16xbf16>
      %91 = vector.extract_strided_slice %33 {offsets = [0, 48], sizes = [32, 16], strides = [1, 1]} : vector<32x64xbf16> to vector<32x16xbf16>
      %cst_44 = arith.constant dense<0.000000e+00> : vector<16x32xf32>
      %92 = tpu.matmul %89, %90, %cst_44 {dimension_numbers = #tpu.dot_dimension_numbers<[1], [1], [0], [0], [0, 0, 1, 0], [], []>} : vector<16x16xbf16>, vector<32x16xbf16>, vector<16x32xf32> -> vector<16x32xf32>
      %93 = arith.addf %92, %37 : vector<16x32xf32>
      %cst_45 = arith.constant dense<0xFF800000> : vector<16xf32>
      %94 = vector.multi_reduction <maximumf>, %93, %cst_45 [1] : vector<16x32xf32> to vector<16xf32>
      %95 = vector.shape_cast %94 : vector<16xf32> to vector<16x1xf32>
      %96 = vector.broadcast %95 : vector<16x1xf32> to vector<16x32xf32>
      %97 = arith.subf %93, %96 : vector<16x32xf32>
      %98 = math.exp %97 : vector<16x32xf32>
      %cst_46 = arith.constant dense<0.000000e+00> : vector<16xf32>
      %99 = vector.multi_reduction <add>, %98, %cst_46 [1] : vector<16x32xf32> to vector<16xf32>
      %100 = vector.shape_cast %99 : vector<16xf32> to vector<16x1xf32>
      %101 = tpu.reciprocal %100 {approx = true} : vector<16x1xf32> -> vector<16x1xf32>
      %102 = vector.broadcast %101 : vector<16x1xf32> to vector<16x32xf32>
      %103 = arith.mulf %98, %102 : vector<16x32xf32>
      %104 = arith.truncf %103 : vector<16x32xf32> to vector<16x32xbf16>
      %cst_47 = arith.constant dense<0.000000e+00> : vector<16x16xf32>
      %105 = tpu.matmul %104, %91, %cst_47 {dimension_numbers = #tpu.dot_dimension_numbers<[1], [0], [0], [1], [0, 0, 1, 1], [], []>} : vector<16x32xbf16>, vector<32x16xbf16>, vector<16x16xf32> -> vector<16x16xf32>
      %106 = tpu.concatenate %54, %71, %88, %105 in 1 : vector<16x16xf32>, vector<16x16xf32>, vector<16x16xf32>, vector<16x16xf32> -> vector<16x64xf32>
      %107 = arith.truncf %106 : vector<16x64xf32> to vector<16x64xbf16>
      %c0_48 = arith.constant 0 : index
      %c0_49 = arith.constant 0 : index
      %108 = vector.load %arg8[%c0_48, %c0_49] : memref<64x64xbf16, #tpu.memory_space<vmem>>, vector<64x64xbf16>
      %cst_50 = arith.constant dense<0.000000e+00> : vector<16x64xf32>
      %109 = tpu.matmul %107, %108, %cst_50 {dimension_numbers = #tpu.dot_dimension_numbers<[1], [0], [0], [1], [0, 0, 1, 1], [], []>} : vector<16x64xbf16>, vector<64x64xbf16>, vector<16x64xf32> -> vector<16x64xf32>
      %c0_51 = arith.constant 0 : index
      %c0_52 = arith.constant 0 : index
      %110 = vector.load %arg9[%c0_51, %c0_52] : memref<1x64xf32, #tpu.memory_space<vmem>>, vector<1x64xf32>
      %111 = vector.broadcast %110 : vector<1x64xf32> to vector<16x64xf32>
      %112 = arith.addf %109, %111 : vector<16x64xf32>
      %113 = arith.addf %112, %27 : vector<16x64xf32>
      %c0_53 = arith.constant 0 : index
      %c0_54 = arith.constant 0 : index
      %114 = vector.load %arg10[%c0_53, %c0_54] : memref<1x64xf32, #tpu.memory_space<vmem>>, vector<1x64xf32>
      %c0_55 = arith.constant 0 : index
      %c0_56 = arith.constant 0 : index
      %115 = vector.load %arg11[%c0_55, %c0_56] : memref<1x64xf32, #tpu.memory_space<vmem>>, vector<1x64xf32>
      %cst_57 = arith.constant dense<0.000000e+00> : vector<16xf32>
      %116 = vector.multi_reduction <add>, %113, %cst_57 [1] : vector<16x64xf32> to vector<16xf32>
      %117 = vector.shape_cast %116 : vector<16xf32> to vector<16x1xf32>
      %cst_58 = arith.constant 6.400000e+01 : f32
      %118 = vector.broadcast %cst_58 : f32 to vector<16x1xf32>
      %119 = arith.divf %117, %118 : vector<16x1xf32>
      %120 = vector.broadcast %119 : vector<16x1xf32> to vector<16x64xf32>
      %121 = arith.subf %113, %120 : vector<16x64xf32>
      %122 = arith.mulf %121, %121 : vector<16x64xf32>
      %cst_59 = arith.constant dense<0.000000e+00> : vector<16xf32>
      %123 = vector.multi_reduction <add>, %122, %cst_59 [1] : vector<16x64xf32> to vector<16xf32>
      %124 = vector.shape_cast %123 : vector<16xf32> to vector<16x1xf32>
      %cst_60 = arith.constant 6.400000e+01 : f32
      %125 = vector.broadcast %cst_60 : f32 to vector<16x1xf32>
      %126 = arith.divf %124, %125 : vector<16x1xf32>
      %127 = vector.broadcast %119 : vector<16x1xf32> to vector<16x64xf32>
      %128 = arith.subf %113, %127 : vector<16x64xf32>
      %cst_61 = arith.constant 9.99999996E-13 : f32
      %129 = vector.broadcast %cst_61 : f32 to vector<16x1xf32>
      %130 = arith.addf %126, %129 : vector<16x1xf32>
      %131 = math.rsqrt %130 : vector<16x1xf32>
      %132 = vector.broadcast %131 : vector<16x1xf32> to vector<16x64xf32>
      %133 = arith.mulf %128, %132 : vector<16x64xf32>
      %134 = vector.broadcast %114 : vector<1x64xf32> to vector<16x64xf32>
      %135 = arith.mulf %133, %134 : vector<16x64xf32>
      %136 = vector.broadcast %115 : vector<1x64xf32> to vector<16x64xf32>
      %137 = arith.addf %135, %136 : vector<16x64xf32>
      %c0_62 = arith.constant 0 : index
      %c0_63 = arith.constant 0 : index
      %138 = vector.load %arg19[%c0_62, %c0_63] : memref<16x64xf32, #tpu.memory_space<vmem>>, vector<16x64xf32>
      tpu.vector_store %arg19[%c0_62, %c0_63], %137 {strides = array<i32>} : memref<16x64xf32, #tpu.memory_space<vmem>>, vector<16x64xf32>,
      %139 = arith.truncf %137 : vector<16x64xf32> to vector<16x64xbf16>
      %c0_64 = arith.constant 0 : index
      %c0_65 = arith.constant 0 : index
      %140 = vector.load %arg20[%c0_64, %c0_65] : memref<16x64xbf16, #tpu.memory_space<vmem>>, vector<16x64xbf16>
      tpu.vector_store %arg20[%c0_64, %c0_65], %139 {strides = array<i32>} : memref<16x64xbf16, #tpu.memory_space<vmem>>, vector<16x64xbf16>,
      %cst_66 = arith.constant 0.000000e+00 : f32
      %141 = vector.broadcast %cst_66 : f32 to vector<16x64xf32>
      %c0_67 = arith.constant 0 : index
      %c0_68 = arith.constant 0 : index
      %142 = vector.load %arg21[%c0_67, %c0_68] : memref<16x64xf32, #tpu.memory_space<vmem>>, vector<16x64xf32>
      tpu.vector_store %arg21[%c0_67, %c0_68], %141 {strides = array<i32>} : memref<16x64xf32, #tpu.memory_space<vmem>>, vector<16x64xf32>,
    } else {
    }
    %c0 = arith.constant 0 : index
    %c0_1 = arith.constant 0 : index
    %3 = vector.load %arg20[%c0, %c0_1] : memref<16x64xbf16, #tpu.memory_space<vmem>>, vector<16x64xbf16>
    %c0_2 = arith.constant 0 : index
    %c0_3 = arith.constant 0 : index
    %4 = vector.load %arg12[%c0_2, %c0_3] : memref<64x128xbf16, #tpu.memory_space<vmem>>, vector<64x128xbf16>
    %cst = arith.constant dense<0.000000e+00> : vector<16x128xf32>
    %5 = tpu.matmul %3, %4, %cst {dimension_numbers = #tpu.dot_dimension_numbers<[1], [0], [0], [1], [0, 0, 1, 1], [], []>} : vector<16x64xbf16>, vector<64x128xbf16>, vector<16x128xf32> -> vector<16x128xf32>
    %c0_4 = arith.constant 0 : index
    %c0_5 = arith.constant 0 : index
    %6 = vector.load %arg13[%c0_4, %c0_5] : memref<1x128xf32, #tpu.memory_space<vmem>>, vector<1x128xf32>
    %7 = vector.broadcast %6 : vector<1x128xf32> to vector<16x128xf32>
    %8 = arith.addf %5, %7 : vector<16x128xf32>
    %cst_6 = arith.constant 5.000000e-01 : f32
    %9 = vector.broadcast %cst_6 : f32 to vector<16x128xf32>
    %10 = arith.mulf %9, %8 : vector<16x128xf32>
    %cst_7 = arith.constant 0.707106769 : f32
    %11 = vector.broadcast %cst_7 : f32 to vector<16x128xf32>
    %12 = arith.mulf %8, %11 : vector<16x128xf32>
    %13 = math.erf %12 : vector<16x128xf32>
    %cst_8 = arith.constant 1.000000e+00 : f32
    %14 = vector.broadcast %cst_8 : f32 to vector<16x128xf32>
    %15 = arith.addf %14, %13 : vector<16x128xf32>
    %16 = arith.mulf %10, %15 : vector<16x128xf32>
    %c0_9 = arith.constant 0 : index
    %c0_10 = arith.constant 0 : index
    %17 = vector.load %arg21[%c0_9, %c0_10] : memref<16x64xf32, #tpu.memory_space<vmem>>, vector<16x64xf32>
    %18 = arith.truncf %16 : vector<16x128xf32> to vector<16x128xbf16>
    %c0_11 = arith.constant 0 : index
    %c0_12 = arith.constant 0 : index
    %19 = vector.load %arg14[%c0_11, %c0_12] : memref<128x64xbf16, #tpu.memory_space<vmem>>, vector<128x64xbf16>
    %cst_13 = arith.constant dense<0.000000e+00> : vector<16x64xf32>
    %20 = tpu.matmul %18, %19, %cst_13 {dimension_numbers = #tpu.dot_dimension_numbers<[1], [0], [0], [1], [0, 0, 1, 1], [], []>} : vector<16x128xbf16>, vector<128x64xbf16>, vector<16x64xf32> -> vector<16x64xf32>
    %21 = arith.addf %17, %20 : vector<16x64xf32>
    %c0_14 = arith.constant 0 : index
    %c0_15 = arith.constant 0 : index
    %22 = vector.load %arg21[%c0_14, %c0_15] : memref<16x64xf32, #tpu.memory_space<vmem>>, vector<16x64xf32>
    tpu.vector_store %arg21[%c0_14, %c0_15], %21 {strides = array<i32>} : memref<16x64xf32, #tpu.memory_space<vmem>>, vector<16x64xf32>,
    %c1_i32 = arith.constant 1 : i32
    %23 = arith.cmpi eq, %arg2, %c1_i32 : i32
    %24 = arith.extui %23 : i1 to i32
    %c0_i32_16 = arith.constant 0 : i32
    %25 = arith.cmpi ne, %24, %c0_i32_16 : i32
    scf.if %25 {
      %c0_17 = arith.constant 0 : index
      %c0_18 = arith.constant 0 : index
      %26 = vector.load %arg21[%c0_17, %c0_18] : memref<16x64xf32, #tpu.memory_space<vmem>>, vector<16x64xf32>
      %c0_19 = arith.constant 0 : index
      %c0_20 = arith.constant 0 : index
      %27 = vector.load %arg15[%c0_19, %c0_20] : memref<1x64xf32, #tpu.memory_space<vmem>>, vector<1x64xf32>
      %28 = vector.broadcast %27 : vector<1x64xf32> to vector<16x64xf32>
      %29 = arith.addf %26, %28 : vector<16x64xf32>
      %c0_21 = arith.constant 0 : index
      %c0_22 = arith.constant 0 : index
      %30 = vector.load %arg19[%c0_21, %c0_22] : memref<16x64xf32, #tpu.memory_space<vmem>>, vector<16x64xf32>
      %31 = arith.addf %29, %30 : vector<16x64xf32>
      %c0_23 = arith.constant 0 : index
      %c0_24 = arith.constant 0 : index
      %32 = vector.load %arg16[%c0_23, %c0_24] : memref<1x64xf32, #tpu.memory_space<vmem>>, vector<1x64xf32>
      %c0_25 = arith.constant 0 : index
      %c0_26 = arith.constant 0 : index
      %33 = vector.load %arg17[%c0_25, %c0_26] : memref<1x64xf32, #tpu.memory_space<vmem>>, vector<1x64xf32>
      %cst_27 = arith.constant dense<0.000000e+00> : vector<16xf32>
      %34 = vector.multi_reduction <add>, %31, %cst_27 [1] : vector<16x64xf32> to vector<16xf32>
      %35 = vector.shape_cast %34 : vector<16xf32> to vector<16x1xf32>
      %cst_28 = arith.constant 6.400000e+01 : f32
      %36 = vector.broadcast %cst_28 : f32 to vector<16x1xf32>
      %37 = arith.divf %35, %36 : vector<16x1xf32>
      %38 = vector.broadcast %37 : vector<16x1xf32> to vector<16x64xf32>
      %39 = arith.subf %31, %38 : vector<16x64xf32>
      %40 = arith.mulf %39, %39 : vector<16x64xf32>
      %cst_29 = arith.constant dense<0.000000e+00> : vector<16xf32>
      %41 = vector.multi_reduction <add>, %40, %cst_29 [1] : vector<16x64xf32> to vector<16xf32>
      %42 = vector.shape_cast %41 : vector<16xf32> to vector<16x1xf32>
      %cst_30 = arith.constant 6.400000e+01 : f32
      %43 = vector.broadcast %cst_30 : f32 to vector<16x1xf32>
      %44 = arith.divf %42, %43 : vector<16x1xf32>
      %45 = vector.broadcast %37 : vector<16x1xf32> to vector<16x64xf32>
      %46 = arith.subf %31, %45 : vector<16x64xf32>
      %cst_31 = arith.constant 9.99999996E-13 : f32
      %47 = vector.broadcast %cst_31 : f32 to vector<16x1xf32>
      %48 = arith.addf %44, %47 : vector<16x1xf32>
      %49 = math.rsqrt %48 : vector<16x1xf32>
      %50 = vector.broadcast %49 : vector<16x1xf32> to vector<16x64xf32>
      %51 = arith.mulf %46, %50 : vector<16x64xf32>
      %52 = vector.broadcast %32 : vector<1x64xf32> to vector<16x64xf32>
      %53 = arith.mulf %51, %52 : vector<16x64xf32>
      %54 = vector.broadcast %33 : vector<1x64xf32> to vector<16x64xf32>
      %55 = arith.addf %53, %54 : vector<16x64xf32>
      %c0_32 = arith.constant 0 : index
      %c0_33 = arith.constant 0 : index
      %c0_34 = arith.constant 0 : index
      %56 = vector.load %arg18[%c0_32, %c0_33, %c0_34] : memref<1x16x64xf32, #tpu.memory_space<vmem>>, vector<1x16x64xf32>
      %57 = vector.shape_cast %56 : vector<1x16x64xf32> to vector<16x64xf32>
      %58 = vector.shape_cast %55 : vector<16x64xf32> to vector<1x16x64xf32>
      tpu.vector_store %arg18[%c0_32, %c0_33, %c0_34], %58 {strides = array<i32>} : memref<1x16x64xf32, #tpu.memory_space<vmem>>, vector<1x16x64xf32>,
    } else {
    }
    return
  }
  func.func @transform_0(%arg0: i32, %arg1: i32, %arg2: i32) -> (i32, i32, i32) {
    %c0_i32 = arith.constant 0 : i32
    %c0_i32_0 = arith.constant 0 : i32
    return %arg0, %arg1, %c0_i32 : i32, i32, i32
  }
  func.func @transform_1(%arg0: i32, %arg1: i32, %arg2: i32) -> (i32, i32, i32) {
    %c0_i32 = arith.constant 0 : i32
    %c0_i32_0 = arith.constant 0 : i32
    return %arg0, %arg1, %c0_i32 : i32, i32, i32
  }
  func.func @transform_2(%arg0: i32, %arg1: i32, %arg2: i32) -> (i32, i32, i32) {
    %c0_i32 = arith.constant 0 : i32
    %c0_i32_0 = arith.constant 0 : i32
    %c0_i32_1 = arith.constant 0 : i32
    return %arg0, %c0_i32, %c0_i32_0 : i32, i32, i32
  }
  func.func @transform_3(%arg0: i32, %arg1: i32, %arg2: i32) -> (i32, i32, i32) {
    %c0_i32 = arith.constant 0 : i32
    %c0_i32_0 = arith.constant 0 : i32
    %c0_i32_1 = arith.constant 0 : i32
    return %arg0, %c0_i32, %c0_i32_0 : i32, i32, i32
  }
  func.func @transform_4(%arg0: i32, %arg1: i32, %arg2: i32) -> (i32, i32, i32) {
    %c0_i32 = arith.constant 0 : i32
    %c0_i32_0 = arith.constant 0 : i32
    %c0_i32_1 = arith.constant 0 : i32
    return %arg0, %c0_i32, %c0_i32_0 : i32, i32, i32
  }
  func.func @transform_5(%arg0: i32, %arg1: i32, %arg2: i32) -> (i32, i32) {
    %c0_i32 = arith.constant 0 : i32
    %c0_i32_0 = arith.constant 0 : i32
    %c0_i32_1 = arith.constant 0 : i32
    return %c0_i32, %c0_i32_0 : i32, i32
  }
  func.func @transform_6(%arg0: i32, %arg1: i32, %arg2: i32) -> (i32, i32) {
    %c0_i32 = arith.constant 0 : i32
    %c0_i32_0 = arith.constant 0 : i32
    %c0_i32_1 = arith.constant 0 : i32
    return %c0_i32, %c0_i32_0 : i32, i32
  }
  func.func @transform_7(%arg0: i32, %arg1: i32, %arg2: i32) -> (i32, i32) {
    %c0_i32 = arith.constant 0 : i32
    %c0_i32_0 = arith.constant 0 : i32
    %c0_i32_1 = arith.constant 0 : i32
    return %c0_i32, %c0_i32_0 : i32, i32
  }
  func.func @transform_8(%arg0: i32, %arg1: i32, %arg2: i32) -> (i32, i32) {
    %c0_i32 = arith.constant 0 : i32
    %c0_i32_0 = arith.constant 0 : i32
    %c0_i32_1 = arith.constant 0 : i32
    return %c0_i32, %c0_i32_0 : i32, i32
  }
  func.func @transform_9(%arg0: i32, %arg1: i32, %arg2: i32) -> (i32, i32) {
    %c0_i32 = arith.constant 0 : i32
    %c0_i32_0 = arith.constant 0 : i32
    return %c0_i32, %arg2 : i32, i32
  }
  func.func @transform_10(%arg0: i32, %arg1: i32, %arg2: i32) -> (i32, i32) {
    %c0_i32 = arith.constant 0 : i32
    %c0_i32_0 = arith.constant 0 : i32
    return %c0_i32, %arg2 : i32, i32
  }
  func.func @transform_11(%arg0: i32, %arg1: i32, %arg2: i32) -> (i32, i32) {
    %c0_i32 = arith.constant 0 : i32
    %c0_i32_0 = arith.constant 0 : i32
    return %arg2, %c0_i32 : i32, i32
  }
  func.func @transform_12(%arg0: i32, %arg1: i32, %arg2: i32) -> (i32, i32) {
    %c0_i32 = arith.constant 0 : i32
    %c0_i32_0 = arith.constant 0 : i32
    %c0_i32_1 = arith.constant 0 : i32
    return %c0_i32, %c0_i32_0 : i32, i32
  }
  func.func @transform_13(%arg0: i32, %arg1: i32, %arg2: i32) -> (i32, i32) {
    %c0_i32 = arith.constant 0 : i32
    %c0_i32_0 = arith.constant 0 : i32
    %c0_i32_1 = arith.constant 0 : i32
    return %c0_i32, %c0_i32_0 : i32, i32
  }
  func.func @transform_14(%arg0: i32, %arg1: i32, %arg2: i32) -> (i32, i32) {
    %c0_i32 = arith.constant 0 : i32
    %c0_i32_0 = arith.constant 0 : i32
    %c0_i32_1 = arith.constant 0 : i32
    return %c0_i32, %c0_i32_0 : i32, i32
  }
  func.func @transform_15(%arg0: i32, %arg1: i32, %arg2: i32) -> (i32, i32, i32) {
    %c0_i32 = arith.constant 0 : i32
    %c0_i32_0 = arith.constant 0 : i32
    return %arg0, %arg1, %c0_i32 : i32, i32, i32
  }
}

</mosaic_0001>

<bundles_post_ra>
// kernel: alt_roberta_encoder.4
= control target key start
LH: loop header
LB: loop body
LE: loop exit
PB: predicated region body
PF: predicated region fallthrough
CT: control target
= control target key end

     0   :  { %15 = vsyncpa [#allocation3], 0  ;;  %s1565_s0 = inlined_call_operand.vmem [shape: f32[2,32,64], index: 0, kind: input, shape index: {}]   ;;  %s1566_s1 = inlined_call_operand.hbm [shape: bf16[64,64], index: 1, kind: input, shape index: {}]   ;;  %s1567_s2 = inlined_call_operand.vmem [shape: f32[1,64], index: 2, kind: input, shape index: {}]   ;;  %s1568_s3 = inlined_call_operand.hbm [shape: bf16[64,64], index: 3, kind: input, shape index: {}]   ;;  %s1569_s4 = inlined_call_operand.vmem [shape: f32[1,64], index: 4, kind: input, shape index: {}]   ;;  %s1570_s5 = inlined_call_operand.hbm [shape: bf16[64,64], index: 5, kind: input, shape index: {}]   ;;  %s1571_s6 = inlined_call_operand.hbm [shape: f32[1,64], index: 6, kind: input, shape index: {}]   ;;  %s1572_s7 = inlined_call_operand.vmem [shape: bf16[2,32,64], index: 7, kind: output, shape index: {0}]   ;;  %s1573_s8 = inlined_call_operand.vmem [shape: bf16[2,32,64], index: 8, kind: output, shape index: {1}]   ;;  %s1574_s9 = inlined_call_operand.vmem [shape: bf16[2,32,64], index: 9, kind: output, shape index: {2}]  }
   0x1   :  { %16 = vsyncpa [#allocation5], 0 }
   0x2   :  { %17 = vsyncpa [#allocation8], 0  ;;  %s1405_s30 = smov 0   ;;  %s1407_s10 = smov 0  }
   0x3   :  { %s1409_s11 = smov 0   ;;  %s1411_s12 = smov 0  }
   0x4   :  { %s1413_s13 = smov 0  }
   0x5 LB: > { %s986_s14 = sadd.s32 4294967295, %s1345_s13   ;;  %p988_p0 = scmp.ge.s32.totalorder %s1345_s13, 1  ;;  %s1345_s13 = sphi %s1413_s13, %s23_s13   ;;  %s1341_s12 = sphi %s1411_s12, %s1581_s12   ;;  %s1337_s11 = sphi %s1409_s11, %s1580_s11   ;;  %s1333_s10 = sphi %s1407_s10, %s1579_s10   ;;  %s1329_s30 = sphi %s1405_s30, %s1578_s30  }
   0x6   : > { %p278_p1 = scmp.lt.s32.totalorder %s1345_s13, 5  ;;  %p1433_p2 = scmp.eq.s32.totalorder %s986_s14, 0 }
   0x7   : > { %s1347_s17 = smov [#allocation4]  }
   0x8   : > { %p1437_p3 = pnand %p988_p0, %p278_p1  ;;  %s306_s18 = sshll.u32 %s1347_s17, 4  ;;  %s307_s18 = int_to_ptr.vmem [resolvable:$true] %s306_s18 }
   0x9   : > { %s1202_s20 = scalar_lea.vmem %s307_s18, 512  ;;  %p1210_p10 = scmp.lt.s32.totalorder %s307_s18, %s307_s18 }
   0xa   : > { %p1110_p4 = pneg %p1437_p3  ;;  %p1203_p7 = scmp.ne.s32.totalorder %s307_s18, %s1202_s20 }
   0xb   : > { %p1211_p11 = scmp.lt.s32.totalorder %s1202_s20, %s1202_s20 }
   0xc   : > { %p1445_p5 = pnand %p1433_p2, %p1110_p4 }
   0xd   : > { %p1212_p12 = por %p1211_p11, %p1210_p10 }
   0xe   : > { %p1193_p6 = pneg %p1445_p5 }
  0x10   : > { %p1205_p8 = pnand %p1203_p7, %p1193_p6 }
  0x12   : > { %p1206_p9 = pneg %p1205_p8 }
  0x14   : > { %p1213_p13 = pnand %p1212_p12, %p1206_p9 }
  0x16   : > { %1216 = shalt.err (!%p1213_p13)
}
  0x17   : > { %s1348_s21 = smov 64   ;;  %s1349_s22 = smov 4  }
  0x18   : > { %1116 = dma.hbm_to_vmem [thread:$0]  (!%p1445_p5), %s1568_s3, 512, %s307_s18, [#allocation5], %s1348_s21, %s1348_s21, %s1349_s22  }
  0x19   : > { %s32_s25 = sadd.s32 1, %s1337_s11  ;;  %s35_s26 = sadd.s32 1, %s1341_s12 }
  0x1a   : > { %p33_p0 = scmp.ge.s32.totalorder %s32_s25, 2  ;;  %s1350_s27 = smov [#allocation2]  }
  0x1b   : > { %s290_s28 = sshll.u32 %s1350_s27, 4  ;;  %s1351_s29 = smov [#allocation6]   ;;  %s291_s28 = int_to_ptr.vmem [resolvable:$true] %s290_s28 }
  0x1c   : > { %s1583_s25 = smov (%p33_p0, %s32_s25), 0  ;;  %s1585_s26 = smov (!%p33_p0, %s35_s26), %s1341_s12 }
  0x1d   : > { %s322_s14 = sshll.u32 %s1351_s29, 4  ;;  %p37_p1 = scmp.ge.s32.totalorder %s1585_s26, 2  ;;  %s323_s14 = int_to_ptr.vmem [resolvable:$true] %s322_s14 }
  0x1e   : > { %s1228_s17 = scalar_lea.vmem %s291_s28, 512  ;;  %p1236_p9 = scmp.lt.s32.totalorder %s291_s28, %s291_s28 }
  0x1f   : > { %p1229_p4 = scmp.ne.s32.totalorder %s291_s28, %s1228_s17  ;;  %p1237_p10 = scmp.lt.s32.totalorder %s1228_s17, %s1228_s17 }
  0x21   : > { %p1231_p7 = pnand %p1229_p4, %p1193_p6  ;;  %p1238_p11 = por %p1237_p10, %p1236_p9 }
  0x23   : > { %p1232_p8 = pneg %p1231_p7 }
  0x25   : > { %p1239_p12 = pnand %p1238_p11, %p1232_p8 }
  0x27   : > { %1242 = shalt.err (!%p1239_p12)
}
  0x28   : > { %1113 = dma.hbm_to_vmem [thread:$0]  (!%p1445_p5), %s1566_s1, 512, %s291_s28, [#allocation3], %s1348_s21, %s1348_s21, %s1349_s22  }
  0x29   : > { %s1587_s26 = smov (%p37_p1, %s1585_s26), 0  ;;  %s1254_s23 = scalar_lea.vmem %s323_s14, 512 }
  0x2a   : > { %p1255_p13 = scmp.ne.s32.totalorder %s323_s14, %s1254_s23  ;;  %p1262_p7 = scmp.lt.s32.totalorder %s323_s14, %s323_s14 }
  0x2b   : > { %p1263_p8 = scmp.lt.s32.totalorder %s1254_s23, %s1254_s23 }
  0x2c   : > { %p1257_p0 = pnand %p1255_p13, %p1193_p6 }
  0x2d   : > { %p1264_p9 = por %p1263_p8, %p1262_p7 }
  0x2e   : > { %p1258_p4 = pneg %p1257_p0 }
  0x30   : > { %p1265_p10 = pnand %p1264_p9, %p1258_p4 }
  0x32   : > { %1268 = shalt.err (!%p1265_p10)
}
  0x33   : > { %1119 = dma.hbm_to_vmem [thread:$0]  (!%p1445_p5), %s1570_s5, 512, %s323_s14, [#allocation5], %s1348_s21, %s1348_s21, %s1349_s22  }
  0x34   : > { %s1352_s28 = smov [#allocation7]  }
  0x35   : > { %s336_s29 = sshll.u32 %s1352_s28, 4  ;;  %s337_s29 = int_to_ptr.vmem [resolvable:$true] %s336_s29 }
  0x36   : > { %s1280_s17 = scalar_lea.vmem %s337_s29, 16  ;;  %s1287_s18 = scalar_lea.vmem %s337_s29, 32 }
  0x37   : > { %p1281_p1 = scmp.ne.s32.totalorder %s337_s29, %s1280_s17  ;;  %p1288_p13 = scmp.lt.s32.totalorder %s337_s29, %s337_s29 }
  0x38   : > { %p1289_p0 = scmp.lt.s32.totalorder %s1287_s18, %s1280_s17 }
  0x39   : > { %p1283_p11 = pnand %p1281_p1, %p1193_p6 }
  0x3a   : > { %p1290_p4 = por %p1289_p0, %p1288_p13 }
  0x3b   : > { %p1284_p12 = pneg %p1283_p11 }
  0x3d   : > { %p1291_p7 = pnand %p1290_p4, %p1284_p12 }
  0x3f   : > { %1294 = shalt.err (!%p1291_p7)
}
  0x40   : > { %1122 = dma.hbm_to_vmem [thread:$0]  (!%p1445_p5), %s1571_s6, 16, %s337_s29, [#allocation8]  }
  0x41   : > { %362 = sbr.rel (%p1437_p3) target bundleno = 311 (0x137), region = 48 }
  0x46   : > { %1316 = dma.done.wait (%p1433_p2), [#allocation3], 512  }
  0x47   : > { %1318 = vsyncadd (%p1433_p2), [#allocation3], 4294966784 }
  0x48   : > { %1320 = dma.done.wait (%p1433_p2), [#allocation5], 1024  }
  0x49   : > { %1322 = vsyncadd (%p1433_p2), [#allocation5], 4294966272 }
  0x4a   : > { %1324 = dma.done.wait (%p1433_p2), [#allocation8], 16  }
  0x4b   : > { %1326 = vsyncadd (%p1433_p2), [#allocation8], 4294967280  ;;  %s999_s16 = sshll.u32 %s1329_s30, 1  ;;  %p437_p3 = scmp.lt.s32.totalorder %s1333_s10, 1  ;;  %v1353_v0 = vmov 0.0   ;;  %vm1354_vm0 = vmmov 0  }
  0x4c   : > { %1058 = vmatprep.subr.bf16.mxu0 %v1353_v0  ;;  %1070 = vmatprep.subr.bf16.mxu1 %v1353_v0  ;;  %p439_p5 = scmp.lt.s32.totalorder %s999_s16, 3  ;;  %v1179_v1 = vld [vmem:[#allocation2 + $0x18] sm:$0xff]   ;;  %v1180_v2 = vld [vmem:[#allocation2 + $0x10] sm:$0xff]   ;;  %v1181_v5 = vld [vmem:[#allocation2 + $0x8] sm:$0xff]   ;;  %vm519_vm1 = vcmask 523264   ;;  %vm732_vm2 = vcmask 519168  }
  0x4d   : > { %1066 = vmatprep.mubr.msk.bf16.mxu0 %vm1354_vm0, %v1353_v0  ;;  %s1589_s10 = smov (!%p437_p3, %s1333_s10), 1  ;;  %1078 = vmatprep.mubr.msk.bf16.mxu1 %vm1354_vm0, %v1353_v0  ;;  %v1182_v3 = vld [vmem:[#allocation4 + $0x18] sm:$0xff]   ;;  %v1184_v4 = vld [vmem:[#allocation4 + $0x10] sm:$0xff]   ;;  %v1183_v6 = vld [vmem:[#allocation2] sm:$0xff]  }
  0x4e   : > { %s1591_s16 = smov (!%p439_p5, %s999_s16), 3  ;;  %s1000_s19 = sshll.u32 %s1589_s10, 2  ;;  %1059 = vmatpush3.bf16.msra.mxu0 %v1179_v1  ;;  %1071 = vmatpush3.bf16.msra.mxu1 %v1182_v3  ;;  %v1186_v8 = vld [vmem:[#allocation4 + $0x8] sm:$0xff]   ;;  %v1188_v11 = vld [vmem:[#allocation4] sm:$0xff]   ;;  %v1185_v12 = vld [vmem:[#allocation6 + $0x18] sm:$0xff]  }
  0x4f   : > { %s1518_s21 = sadd.s32 %s1000_s19, %s1591_s16  ;;  %1060 = vmatprep.subr.bf16.mxu0 %v1353_v0  ;;  %1072 = vmatprep.subr.bf16.mxu1 %v1353_v0  ;;  %v1187_v13 = vld [vmem:[#allocation6 + $0x10] sm:$0xff]   ;;  %v1189_v14 = vld [vmem:[#allocation6 + $0x8] sm:$0xff]   ;;  %v1190_v15 = vld [vmem:[#allocation6] sm:$0xff]  }
  0x50   : > { %s1001_s30 = sshll.u32 %s1518_s21, 3  ;;  %v1011_v16 = vld [vmem:[%s1567_s2] ss:$0 sm:$0xff]  ;;  %s1004_s27 = sshll.u32 %s1518_s21, 2 }
  0x51   : > { %s444_s14 = scalar_lea.vmem %s1565_s0, %s1001_s30  ;;  %v1017_v19 = vld [vmem:[%s1569_s4] ss:$0 sm:$0xff]  ;;  %s454_s20 = scalar_lea.vmem %s1572_s7, %s1004_s27 }
  0x52   : > { %1061 = vmatpush3.bf16.msra.mxu0 %v1180_v2  ;;  %v477_v7 = vld [vmem:[%s444_s14] sm:$0xff]  ;;  %1073 = vmatpush3.bf16.msra.mxu1 %v1184_v4  ;;  %v478_v9 = vld [vmem:[%s444_s14 + $0x8] sm:$0xff]  ;;  %s464_s19 = scalar_lea.vmem %s1573_s8, %s1004_s27  ;;  %s474_s15 = scalar_lea.vmem %s1574_s9, %s1004_s27 }
  0x53   : > { %1062 = vmatprep.subr.bf16.mxu0 %v1353_v0  ;;  %1074 = vmatprep.subr.bf16.mxu1 %v1353_v0  ;;  %v479_v10 = vpack.c.bf16 %v478_v9, %v477_v7  ;;  %v1023_v34 = vld [vmem:[#allocation7] ss:$0 sm:$0xff] }
  0x56   : > { %1063 = vmatpush3.bf16.msra.mxu0 %v1181_v5  ;;  %1075 = vmatpush3.bf16.msra.mxu1 %v1186_v8 }
  0x57   : > { %1064 = vmatprep.subr.bf16.mxu0 %v1353_v0  ;;  %1076 = vmatprep.subr.bf16.mxu1 %v1353_v0 }
  0x5a   : > { %1065 = vmatpush3.bf16.msra.mxu0 %v1183_v6  ;;  %1077 = vmatpush3.bf16.msra.mxu1 %v1188_v11 }
  0x5b   : > { %1082 = vmatprep.subr.bf16.mxu0 %v1353_v0 }
  0x5d   : > { %1067 = vmatmul.mubr.msk.bf16.vlgmr.msra.gmra.mxu0 %vm519_vm1, %v479_v10  ;;  %1079 = vmatmul.mubr.msk.bf16.vlgmr.msra.gmra.mxu1 %vm519_vm1, %v479_v10 }
  0x5e   : > { %1083 = vmatpush3.bf16.msra.mxu0 %v1185_v12  ;;  %1090 = vmatprep.mubr.msk.bf16.mxu0 %vm1354_vm0, %v1353_v0 }
  0x5f   : > { %1084 = vmatprep.subr.bf16.mxu0 %v1353_v0 }
  0x62   : > { %1085 = vmatpush3.bf16.msra.mxu0 %v1187_v13 }
  0x63   : > { %1086 = vmatprep.subr.bf16.mxu0 %v1353_v0 }
  0x66   : > { %1087 = vmatpush3.bf16.msra.mxu0 %v1189_v14 }
  0x67   : > { %1088 = vmatprep.subr.bf16.mxu0 %v1353_v0 }
  0x6a   : > { %1089 = vmatpush3.bf16.msra.mxu0 %v1190_v15 }
  0x6d   : > { %1091 = vmatmul.mubr.msk.bf16.vlgmr.msra.gmra.mxu0 %vm519_vm1, %v479_v10 }
 0x11d   : > { %v557_v17 = vpop.f32.mrf.mxu0  ;;  %v637_v22 = vpop.f32.mrf.mxu1 }
 0x11e   : > { %v558_v18 = vadd.f32 %v1011_v16, %v557_v17  ;;  %v638_v24 = vadd.f32 %v1017_v19, %v637_v22 }
 0x11f   : > { %v1068_v20 = vpop.f32.mrf.mxu0  ;;  %v1080_v26 = vpop.f32.mrf.mxu1 }
 0x120   : > { %v1037_v21 = vpack.c.bf16 %v558_v18, %v558_v18  ;;  %v1039_v28 = vpack.c.bf16 %v638_v24, %v638_v24 }
 0x121   : > { %v560_v23 = vpop.f32.mrf.mxu0  ;;  %v640_v30 = vpop.f32.mrf.mxu1 }
 0x122   : > { %733 = vst.msk [vmem:[%s454_s20] sm:$0xf] %vm732_vm2, %v1037_v21  ;;  %v561_v25 = vadd.f32 %v1011_v16, %v560_v23  ;;  %743 = vst.msk [vmem:[%s464_s19] sm:$0xf] %vm732_vm2, %v1039_v28  ;;  %v641_v31 = vadd.f32 %v1017_v19, %v640_v30 }
 0x123   : > { %v1069_v27 = vpop.f32.mrf.mxu0  ;;  %v1081_v32 = vpop.f32.mrf.mxu1 }
 0x124   : > { %v1038_v29 = vpack.c.bf16 %v561_v25, %v561_v25  ;;  %v1040_v33 = vpack.c.bf16 %v641_v31, %v641_v31 }
 0x126   : > { %734 = vst.msk [vmem:[%s454_s20 + $0x4] sm:$0xf] %vm732_vm2, %v1038_v29  ;;  %744 = vst.msk [vmem:[%s464_s19 + $0x4] sm:$0xf] %vm732_vm2, %v1040_v33 }
 0x12d   : > { %v717_v35 = vpop.f32.mrf.mxu0 }
 0x12e   : > { %v718_v36 = vadd.f32 %v1023_v34, %v717_v35 }
 0x12f   : > { %v1092_v37 = vpop.f32.mrf.mxu0 }
 0x130   : > { %v1041_v38 = vpack.c.bf16 %v718_v36, %v718_v36 }
 0x131   : > { %v720_v39 = vpop.f32.mrf.mxu0 }
 0x132   : > { %753 = vst.msk [vmem:[%s474_s15] sm:$0xf] %vm732_vm2, %v1041_v38  ;;  %v721_v40 = vadd.f32 %v1023_v34, %v720_v39 }
 0x133   : > { %v1093_v41 = vpop.f32.mrf.mxu0 }
 0x134   : > { %v1042_v42 = vpack.c.bf16 %v721_v40, %v721_v40 }
 0x136   : > { %754 = vst.msk [vmem:[%s474_s15 + $0x4] sm:$0xf] %vm732_vm2, %v1042_v42 }
 0x137 PF: > { %s23_s13 = sadd.s32 1, %s1345_s13   ;;  %s1578_s30 = smov %s1337_s11 }
 0x138   : > { %p20_p2 = scmp.ge.s32.totalorder %s23_s13, 6   ;;  %s1579_s10 = smov %s1341_s12 }
 0x139   : > { %s1580_s11 = smov %s1583_s25  ;;  %s1581_s12 = smov %s1587_s26 }
 0x13a   :  { %22 = sbr.rel (!%p20_p2) target bundleno = 5 (0x5), region = 119 }
 0x13f   :  { %835 = vsyncpa [#allocation3], 1 }
 0x140   :  { %837 = vsyncpa [#allocation3 + $0x1], 1 }
 0x141   :  { %838 = vsyncpa [#allocation5], 1 }
 0x142   :  { %839 = vsyncpa [#allocation8], 1 }

// kernel: alt_roberta_encoder.6
= control target key start
LH: loop header
LB: loop body
LE: loop exit
PB: predicated region body
PF: predicated region fallthrough
CT: control target
= control target key end

     0   :  { %s1134_s30 = smov 0   ;;  %s1136_s10 = smov 0   ;;  %s1259_s0 = inlined_call_operand.vmem [shape: f32[2,32,64], index: 0, kind: input, shape index: {}]   ;;  %s1260_s1 = inlined_call_operand.vmem [shape: bf16[64,64], index: 1, kind: input, shape index: {}]   ;;  %s1261_s2 = inlined_call_operand.vmem [shape: f32[1,64], index: 2, kind: input, shape index: {}]   ;;  %s1262_s3 = inlined_call_operand.vmem [shape: bf16[64,64], index: 3, kind: input, shape index: {}]   ;;  %s1263_s4 = inlined_call_operand.vmem [shape: f32[1,64], index: 4, kind: input, shape index: {}]   ;;  %s1264_s5 = inlined_call_operand.vmem [shape: bf16[64,64], index: 5, kind: input, shape index: {}]   ;;  %s1265_s6 = inlined_call_operand.vmem [shape: f32[1,64], index: 6, kind: input, shape index: {}]   ;;  %s1266_s7 = inlined_call_operand.vmem [shape: bf16[2,32,64], index: 7, kind: output, shape index: {0}]   ;;  %s1267_s8 = inlined_call_operand.vmem [shape: bf16[2,32,64], index: 8, kind: output, shape index: {1}]   ;;  %s1268_s9 = inlined_call_operand.vmem [shape: bf16[2,32,64], index: 9, kind: output, shape index: {2}]  }
   0x1   :  { %s1138_s11 = smov 0   ;;  %s1140_s12 = smov 0  }
   0x2   :  { %s1142_s13 = smov 0  }
   0x3 LB: > { %s29_s14 = sadd.s32 1, %s1072_s11  ;;  %s32_s15 = sadd.s32 1, %s1076_s12  ;;  %s1080_s13 = sphi %s1142_s13, %s20_s13   ;;  %s1076_s12 = sphi %s1140_s12, %s1272_s12   ;;  %s1072_s11 = sphi %s1138_s11, %s1271_s11   ;;  %s1068_s10 = sphi %s1136_s10, %s1270_s10   ;;  %s1064_s30 = sphi %s1134_s30, %s1269_s30  }
   0x4   : > { %p30_p0 = scmp.ge.s32.totalorder %s29_s14, 2  ;;  %p892_p1 = scmp.ge.s32.totalorder %s1080_s13, 1 }
   0x5   : > { %p317_p2 = scmp.lt.s32.totalorder %s1080_s13, 5 }
   0x6   : > { %s1274_s14 = smov (%p30_p0, %s29_s14), 0  ;;  %s1276_s15 = smov (!%p30_p0, %s32_s15), %s1076_s12 }
   0x7   : > { %p318_p3 = pnand %p892_p1, %p317_p2  ;;  %p34_p4 = scmp.ge.s32.totalorder %s1276_s15, 2 }
   0x8   : > { %s893_s20 = sshll.u32 (!%p318_p3), %s1064_s30, 1  ;;  %p380_p5 = scmp.lt.s32.totalorder (!%p318_p3), %s1068_s10, 1 }
   0x9   : > { %s1278_s15 = smov (%p34_p4, %s1276_s15), 0  ;;  %321 = sbr.rel (%p318_p3) target bundleno = 249 (0xf9), region = 48 }
   0xa   : > { %p382_p6 = scmp.lt.s32.totalorder (!%p318_p3), %s893_s20, 3 }
   0xe   : > { %v1030_v0 = vld [vmem:[%s1260_s1 + $0x18] sm:$0xff]   ;;  %v1082_v1 = vmov 0.0   ;;  %v1031_v2 = vld [vmem:[%s1260_s1 + $0x10] sm:$0xff]   ;;  %vm1083_vm0 = vmmov 0   ;;  %s1280_s10 = smov (!%p380_p5, %s1068_s10), 1  ;;  %v1032_v5 = vld [vmem:[%s1260_s1 + $0x8] sm:$0xff]  }
   0xf   : > { %952 = vmatprep.subr.bf16.mxu0 %v1082_v1  ;;  %964 = vmatprep.subr.bf16.mxu1 %v1082_v1  ;;  %v1033_v3 = vld [vmem:[%s1262_s3 + $0x18] sm:$0xff]   ;;  %v1035_v4 = vld [vmem:[%s1262_s3 + $0x10] sm:$0xff]   ;;  %s1282_s20 = smov (!%p382_p6, %s893_s20), 3  ;;  %s894_s27 = sshll.u32 %s1280_s10, 2  ;;  %v1037_v6 = vld [vmem:[%s1262_s3 + $0x8] sm:$0xff]   ;;  %vm462_vm1 = vcmask 523264  }
  0x10   : > { %953 = vmatpush3.bf16.msra.mxu0 %v1030_v0  ;;  %960 = vmatprep.mubr.msk.bf16.mxu0 %vm1083_vm0, %v1082_v1  ;;  %s1188_s28 = sadd.s32 %s894_s27, %s1282_s20  ;;  %v1034_v7 = vld [vmem:[%s1260_s1] sm:$0xff]   ;;  %v1036_v12 = vld [vmem:[%s1264_s5 + $0x18] sm:$0xff]   ;;  %v1038_v13 = vld [vmem:[%s1264_s5 + $0x10] sm:$0xff]   ;;  %vm675_vm2 = vcmask 519168  }
  0x11   : > { %954 = vmatprep.subr.bf16.mxu0 %v1082_v1  ;;  %972 = vmatprep.mubr.msk.bf16.mxu1 %vm1083_vm0, %v1082_v1  ;;  %s895_s29 = sshll.u32 %s1188_s28, 3  ;;  %v1039_v11 = vld [vmem:[%s1262_s3] sm:$0xff]   ;;  %v1040_v14 = vld [vmem:[%s1264_s5 + $0x8] sm:$0xff]   ;;  %s898_s19 = sshll.u32 %s1188_s28, 2 }
  0x12   : > { %965 = vmatpush3.bf16.msra.mxu1 %v1033_v3  ;;  %s387_s22 = scalar_lea.vmem %s1259_s0, %s895_s29  ;;  %v1041_v15 = vld [vmem:[%s1264_s5] sm:$0xff]   ;;  %s397_s23 = scalar_lea.vmem %s1266_s7, %s898_s19 }
  0x13   : > { %966 = vmatprep.subr.bf16.mxu1 %v1082_v1  ;;  %v420_v8 = vld [vmem:[%s387_s22] sm:$0xff]  ;;  %v421_v9 = vld [vmem:[%s387_s22 + $0x8] sm:$0xff]  ;;  %s407_s25 = scalar_lea.vmem %s1267_s8, %s898_s19  ;;  %s417_s16 = scalar_lea.vmem %s1268_s9, %s898_s19 }
  0x14   : > { %955 = vmatpush3.bf16.msra.mxu0 %v1031_v2  ;;  %v422_v10 = vpack.c.bf16 %v421_v9, %v420_v8  ;;  %v905_v16 = vld [vmem:[%s1261_s2] ss:$0 sm:$0xff] }
  0x15   : > { %956 = vmatprep.subr.bf16.mxu0 %v1082_v1  ;;  %v911_v19 = vld [vmem:[%s1263_s4] ss:$0 sm:$0xff] }
  0x16   : > { %967 = vmatpush3.bf16.msra.mxu1 %v1035_v4  ;;  %v917_v34 = vld [vmem:[%s1265_s6] ss:$0 sm:$0xff] }
  0x17   : > { %968 = vmatprep.subr.bf16.mxu1 %v1082_v1 }
  0x18   : > { %957 = vmatpush3.bf16.msra.mxu0 %v1032_v5 }
  0x19   : > { %958 = vmatprep.subr.bf16.mxu0 %v1082_v1 }
  0x1a   : > { %969 = vmatpush3.bf16.msra.mxu1 %v1037_v6 }
  0x1b   : > { %970 = vmatprep.subr.bf16.mxu1 %v1082_v1 }
  0x1c   : > { %959 = vmatpush3.bf16.msra.mxu0 %v1034_v7 }
  0x1d   : > { %976 = vmatprep.subr.bf16.mxu0 %v1082_v1 }
  0x1e   : > { %971 = vmatpush3.bf16.msra.mxu1 %v1039_v11 }
  0x1f   : > { %961 = vmatmul.mubr.msk.bf16.vlgmr.msra.gmra.mxu0 %vm462_vm1, %v422_v10 }
  0x20   : > { %977 = vmatpush3.bf16.msra.mxu0 %v1036_v12  ;;  %984 = vmatprep.mubr.msk.bf16.mxu0 %vm1083_vm0, %v1082_v1 }
  0x21   : > { %978 = vmatprep.subr.bf16.mxu0 %v1082_v1  ;;  %973 = vmatmul.mubr.msk.bf16.vlgmr.msra.gmra.mxu1 %vm462_vm1, %v422_v10 }
  0x24   : > { %979 = vmatpush3.bf16.msra.mxu0 %v1038_v13 }
  0x25   : > { %980 = vmatprep.subr.bf16.mxu0 %v1082_v1 }
  0x28   : > { %981 = vmatpush3.bf16.msra.mxu0 %v1040_v14 }
  0x29   : > { %982 = vmatprep.subr.bf16.mxu0 %v1082_v1 }
  0x2c   : > { %983 = vmatpush3.bf16.msra.mxu0 %v1041_v15 }
  0x2f   : > { %985 = vmatmul.mubr.msk.bf16.vlgmr.msra.gmra.mxu0 %vm462_vm1, %v422_v10 }
  0xdf   : > { %v500_v17 = vpop.f32.mrf.mxu0 }
  0xe0   : > { %v501_v18 = vadd.f32 %v905_v16, %v500_v17 }
  0xe1   : > { %v962_v20 = vpop.f32.mrf.mxu0  ;;  %v580_v22 = vpop.f32.mrf.mxu1 }
  0xe2   : > { %v931_v21 = vpack.c.bf16 %v501_v18, %v501_v18  ;;  %v581_v24 = vadd.f32 %v911_v19, %v580_v22 }
  0xe3   : > { %v503_v23 = vpop.f32.mrf.mxu0  ;;  %v974_v26 = vpop.f32.mrf.mxu1 }
  0xe4   : > { %676 = vst.msk [vmem:[%s397_s23] sm:$0xf] %vm675_vm2, %v931_v21  ;;  %v504_v25 = vadd.f32 %v905_v16, %v503_v23  ;;  %v933_v28 = vpack.c.bf16 %v581_v24, %v581_v24 }
  0xe5   : > { %v963_v27 = vpop.f32.mrf.mxu0  ;;  %v583_v30 = vpop.f32.mrf.mxu1 }
  0xe6   : > { %v932_v29 = vpack.c.bf16 %v504_v25, %v504_v25  ;;  %686 = vst.msk [vmem:[%s407_s25] sm:$0xf] %vm675_vm2, %v933_v28  ;;  %v584_v31 = vadd.f32 %v911_v19, %v583_v30 }
  0xe7   : > { %v975_v32 = vpop.f32.mrf.mxu1 }
  0xe8   : > { %677 = vst.msk [vmem:[%s397_s23 + $0x4] sm:$0xf] %vm675_vm2, %v932_v29  ;;  %v934_v33 = vpack.c.bf16 %v584_v31, %v584_v31 }
  0xea   : > { %687 = vst.msk [vmem:[%s407_s25 + $0x4] sm:$0xf] %vm675_vm2, %v934_v33 }
  0xef   : > { %v660_v35 = vpop.f32.mrf.mxu0 }
  0xf0   : > { %v661_v36 = vadd.f32 %v917_v34, %v660_v35 }
  0xf1   : > { %v986_v37 = vpop.f32.mrf.mxu0 }
  0xf2   : > { %v935_v38 = vpack.c.bf16 %v661_v36, %v661_v36 }
  0xf3   : > { %v663_v39 = vpop.f32.mrf.mxu0 }
  0xf4   : > { %696 = vst.msk [vmem:[%s417_s16] sm:$0xf] %vm675_vm2, %v935_v38  ;;  %v664_v40 = vadd.f32 %v917_v34, %v663_v39 }
  0xf5   : > { %v987_v41 = vpop.f32.mrf.mxu0 }
  0xf6   : > { %v936_v42 = vpack.c.bf16 %v664_v40, %v664_v40 }
  0xf8   : > { %697 = vst.msk [vmem:[%s417_s16 + $0x4] sm:$0xf] %vm675_vm2, %v936_v42 }
  0xf9 PF: > { %s20_s13 = sadd.s32 1, %s1080_s13   ;;  %s1269_s30 = smov %s1072_s11 }
  0xfa   : > { %p17_p7 = scmp.ge.s32.totalorder %s20_s13, 6   ;;  %s1270_s10 = smov %s1076_s12 }
  0xfb   : > { %s1271_s11 = smov %s1274_s14  ;;  %s1272_s12 = smov %s1278_s15 }
  0xfc   :  { %19 = sbr.rel (!%p17_p7) target bundleno = 3 (0x3), region = 102 }

// kernel: alt_roberta_encoder.5
= control target key start
LH: loop header
LB: loop body
LE: loop exit
PB: predicated region body
PF: predicated region fallthrough
CT: control target
= control target key end

     0   :  { %s2871_s0 = inlined_call_operand.vmem [shape: f32[2,32,64], index: 0, kind: input, shape index: {}]   ;;  %s2872_s1 = inlined_call_operand.vmem [shape: bf16[2,32,64], index: 1, kind: input, shape index: {}]   ;;  %s2873_s2 = inlined_call_operand.vmem [shape: bf16[2,32,64], index: 2, kind: input, shape index: {}]   ;;  %s2874_s3 = inlined_call_operand.vmem [shape: bf16[2,32,64], index: 3, kind: input, shape index: {}]   ;;  %s2875_s4 = inlined_call_operand.vmem [shape: f32[2,1,32], index: 4, kind: input, shape index: {}]   ;;  %s2876_s5 = inlined_call_operand.vmem [shape: bf16[64,64], index: 5, kind: input, shape index: {}]   ;;  %s2877_s6 = inlined_call_operand.vmem [shape: f32[1,64], index: 6, kind: input, shape index: {}]   ;;  %s2878_s7 = inlined_call_operand.vmem [shape: f32[1,64], index: 7, kind: input, shape index: {}]   ;;  %s2879_s8 = inlined_call_operand.vmem [shape: f32[1,64], index: 8, kind: input, shape index: {}]   ;;  %s2880_s9 = inlined_call_operand.vmem [shape: bf16[64,256], index: 9, kind: input, shape index: {}]   ;;  %s2881_s10 = inlined_call_operand.vmem [shape: f32[1,256], index: 10, kind: input, shape index: {}]   ;;  %s2882_s11 = inlined_call_operand.vmem [shape: bf16[256,64], index: 11, kind: input, shape index: {}]   ;;  %s2883_s12 = inlined_call_operand.vmem [shape: f32[1,64], index: 12, kind: input, shape index: {}]   ;;  %s2884_s13 = inlined_call_operand.vmem [shape: f32[1,64], index: 13, kind: input, shape index: {}]   ;;  %s2885_s14 = inlined_call_operand.vmem [shape: f32[1,64], index: 14, kind: input, shape index: {}]   ;;  %s2886_s15 = inlined_call_operand.vmem [shape: f32[2,32,64], index: 15, kind: output, shape index: {}]  }
   0x1   :  { %2893 = sst [smem:[#allocation15_spill]] %s2871_s0 }
   0x2   :  { %2894 = sst [smem:[#allocation16_spill]] %s2878_s7 }
   0x3   :  { %2895 = sst [smem:[#allocation17_spill]] %s2879_s8 }
   0x4   :  { %2896 = sst [smem:[#allocation18_spill]] %s2880_s9 }
   0x5   :  { %2897 = sst [smem:[#allocation19_spill]] %s2883_s12 }
   0x6   :  { %2898 = sst [smem:[#allocation20_spill]] %s2884_s13 }
   0x7   :  { %2899 = sst [smem:[#allocation21_spill]] %s2885_s14 }
   0x8   :  { %s2507_s18 = smov 0   ;;  %s2509_s19 = smov 0  }
   0x9   :  { %s2511_s20 = smov 0   ;;  %s2513_s21 = smov 0  }
   0xa   :  { %s2515_s22 = smov 0   ;;  %s2517_s23 = smov 0  }
   0xb   :  { %s2519_s24 = smov 0   ;;  %s2521_s25 = smov 0  }
   0xc   :  { %s2523_s26 = smov 0  }
   0xd LB: > { %2900 = sst [smem:[#allocation6_spill]] %s2387_s19  ;;  %s37_s27 = sadd.s32 1, %s2403_s23  ;;  %s2415_s26 = sphi %s2523_s26, %s25_s26   ;;  %s2411_s25 = sphi %s2521_s25, %s2924_s25   ;;  %s2407_s24 = sphi %s2519_s24, %s2923_s24   ;;  %s2403_s23 = sphi %s2517_s23, %s2922_s23   ;;  %s2399_s22 = sphi %s2515_s22, %s2921_s22   ;;  %s2395_s21 = sphi %s2513_s21, %s2920_s21   ;;  %s2391_s20 = sphi %s2511_s20, %s2919_s20   ;;  %s2387_s19 = sphi %s2509_s19, %s2918_s19   ;;  %s2383_s18 = sphi %s2507_s18, %s2917_s18  }
   0xe   : > { %2901 = sst [smem:[#allocation7_spill]] %s2403_s23  ;;  %p38_p0 = scmp.ge.s32.totalorder %s37_s27, 2 }
   0xf   : > { %2902 = sst [smem:[#allocation8_spill]] %s2407_s24  ;;  %s40_s28 = sadd.s32 1, %s2407_s24 }
  0x10   : > { %2903 = sst [smem:[#allocation9_spill]] %s2411_s25  ;;  %s44_s29 = sadd.s32 1, %s2411_s25 }
  0x11   : > { %2904 = sst [smem:[#allocation10_spill]] %s2415_s26  ;;  %p276_p1 = scmp.ne.s32.totalorder %s2387_s19, %s2383_s18 }
  0x12   : > { %s2926_s27 = smov (%p38_p0, %s37_s27), 0  ;;  %s2928_s28 = smov (!%p38_p0, %s40_s28), %s2407_s24 }
  0x13   : > { %2905 = sst [smem:[#allocation11_spill]] %s2926_s27  ;;  %s266_s30 = ssub.s32 %s2403_s23, %s2926_s27 }
  0x14   : > { %p277_p2 = scmp.eq.s32.totalorder %s2415_s26, 0  ;;  %p42_p3 = scmp.ge.s32.totalorder %s2928_s28, 2 }
  0x15   : > { %p267_p4 = scmp.eq.s32.totalorder %s266_s30, 0  ;;  %s269_s16 = sadd.s32 1, %s2387_s19 }
  0x16   : > { %p278_p5 = por %p277_p2, %p276_p1  ;;  %s2930_s28 = smov (%p42_p3, %s2928_s28), 0 }
  0x17   : > { %2906 = sst [smem:[#allocation12_spill]] %s2930_s28  ;;  %s2932_s29 = smov (!%p42_p3, %s44_s29), %s2411_s25 }
  0x18   : > { %s2568_s17 = scalar_select %p267_p4, %s2387_s19, %s269_s16  }
  0x19   : > { %p46_p6 = scmp.ge.s32.totalorder %s2932_s29, 2  ;;  %p1961_p7 = scmp.ge.s32.totalorder %s2415_s26, 8 }
  0x1a   : > { %2907 = sst [smem:[#allocation13_spill]] %s2568_s17 }
  0x1b   : > { %s2934_s29 = smov (%p46_p6, %s2932_s29), 0  ;;  %466 = sbr.rel (%p1961_p7) target bundleno = 47 (0x2f), region = 44 }
  0x1c   : > { %2908 = sst [smem:[#allocation14_spill]] %s2934_s29 }
  0x20   : > { %517 = sbr.rel (!%p278_p5) target bundleno = 47 (0x2f), region = 68  ;;  %s519_s27 = sand.u32 (%p278_p5), 1, %s2387_s19  }
  0x21   : > { %s1963_s24 = sshll.u32 (%p278_p5), %s2403_s23, 2  ;;  %s1962_s14 = sshll.u32 (%p278_p5), %s519_s27, 5 }
  0x22   : > { %s2909_s9 = sld [smem:[#allocation18_spill]] (%p278_p5)  ;;  %s521_s16 = scalar_lea.vmem (%p278_p5), [#allocation5], %s1962_s14 }
  0x28   : > { %s523_s12 = scalar_lea.vmem %s2909_s9, %s1963_s24 }
  0x29   : > { %v540_v0 = vld [vmem:[%s523_s12] sm:$0xf]  ;;  %v542_v1 = vld [vmem:[%s523_s12 + $0x8] sm:$0xf]  ;;  %v544_v2 = vld [vmem:[%s523_s12 + $0x10] sm:$0xf] }
  0x2a   : > { %541 = vst [vmem:[%s521_s16] sm:$0xf] %v540_v0  ;;  %543 = vst [vmem:[%s521_s16 + $0x4] sm:$0xf] %v542_v1  ;;  %v546_v3 = vld [vmem:[%s523_s12 + $0x18] sm:$0xf] }
  0x2b   : > { %v548_v4 = vld [vmem:[%s523_s12 + $0x20] sm:$0xf]  ;;  %545 = vst [vmem:[%s521_s16 + $0x8] sm:$0xf] %v544_v2  ;;  %547 = vst [vmem:[%s521_s16 + $0xc] sm:$0xf] %v546_v3 }
  0x2c   : > { %549 = vst [vmem:[%s521_s16 + $0x10] sm:$0xf] %v548_v4  ;;  %v550_v5 = vld [vmem:[%s523_s12 + $0x28] sm:$0xf]  ;;  %v552_v6 = vld [vmem:[%s523_s12 + $0x30] sm:$0xf] }
  0x2d   : > { %v554_v7 = vld [vmem:[%s523_s12 + $0x38] sm:$0xf]  ;;  %551 = vst [vmem:[%s521_s16 + $0x14] sm:$0xf] %v550_v5  ;;  %553 = vst [vmem:[%s521_s16 + $0x18] sm:$0xf] %v552_v6 }
  0x2e   : > { %555 = vst [vmem:[%s521_s16 + $0x1c] sm:$0xf] %v554_v7 }
  0x2f PF: > { %p1964_p8 = scmp.ge.s32.totalorder %s2415_s26, 1  ;;  %p609_p9 = scmp.lt.s32.totalorder %s2415_s26, 9 }
  0x31   : > { %p610_p10 = pnand %p1964_p8, %p609_p9 }
  0x32   : > { %s616_s13 = sand.u32 (!%p610_p10), 1, %s2383_s18   ;;  %s1966_s14 = sshll.u32 (!%p610_p10), %s2395_s21, 1 }
  0x33   : > { %613 = sbr.rel (%p610_p10) target bundleno = 3316 (0xcf4), region = 117  ;;  %s1965_s24 = sshll.u32 (!%p610_p10), %s616_s13, 5 }
  0x34   : > { %p707_p11 = scmp.lt.s32.totalorder (!%p610_p10), %s2399_s22, 1  ;;  %p709_p12 = scmp.lt.s32.totalorder (!%p610_p10), %s1966_s14, 3 }
  0x35   : > { %s2910_s0 = sld [smem:[#allocation15_spill]] (!%p610_p10)  ;;  %p739_p13 = scmp.lt.s32.totalorder (!%p610_p10), %s2391_s20, 1 }
  0x36   : > { %p1981_p1 = scmp.ne.s32.totalorder (!%p610_p10), %s2391_s20, 0 }
  0x38   : > { %s2936_s22 = smov (!%p707_p11, %s2399_s22), 1  ;;  %s2938_s14 = smov (!%p709_p12, %s1966_s14), 3 }
  0x39   : > { %s1967_s12 = sshll.u32 %s2936_s22, 2  ;;  %s2027_s27 = sshll.u32 %s2936_s22, 4 }
  0x3a   : > { %s712_s30 = sadd.s32 %s1967_s12, %s2938_s14  ;;  %s730_s18 = scalar_lea.vmem %s2873_s2, %s2027_s27 }
  0x3b   : > { %s1968_s21 = sshll.u32 %s712_s30, 3  ;;  %s1971_s29 = sshll.u32 %s712_s30, 2 }
  0x3c   : > { %s2594_s25 = scalar_lea.vmem %s2910_s0, %s1968_s21  ;;  %s724_s19 = scalar_lea.vmem %s2872_s1, %s1971_s29 }
  0x3d   : > { %s2602_s7 = scalar_lea.vmem %s2874_s3, %s2027_s27  ;;  %s738_s9 = scalar_lea.vmem %s2875_s4, %s2936_s22 }
  0x3e   : > { %s1976_s30 = sshll.u32 %s2391_s20, 4  ;;  %s2613_s13 = scalar_lea.vmem %s2886_s15, %s1968_s21 }
  0x3f   : > { %p743_p0 = scmp.lt.s32.totalorder %s1976_s30, 31  ;;  %s2627_s12 = scalar_lea.vmem [#allocation5], %s1965_s24 }
  0x40   : > { %s2616_s0 = scalar_select %p739_p13, %s2391_s20, 1 }
  0x41   : > { %s2940_s30 = smov (!%p743_p0, %s1976_s30), 31  ;;  %762 = sbr.rel (%p1981_p1) target bundleno = 2558 (0x9fe), region = 125 }
  0x42   : > { %s741_s26 = scalar_lea.vmem %s2881_s10, %s2616_s0  ;;  %s1977_s29 = sshll.u32 %s2940_s30, 2 }
  0x43   : > { %s2625_s14 = scalar_lea.vmem %s2882_s11, %s1977_s29  ;;  %s2420_s22 = smov (!%p1981_p1), 96  }
  0x44   : > { %s2422_s21 = smov (!%p1981_p1), 16   ;;  %s2424_s24 = smov (!%p1981_p1), 48  }
  0x45   : > { %s2912_s30 = sld [smem:[#allocation17_spill]] (!%p1981_p1) }
  0x46   : > { %v2630_v8 = vld [vmem:[%s730_s18 + $0x8] sm:$0xff]   ;;  %v2417_v9 = vmov 0.0   ;;  %vm797_vm0 = vcmask 130048   ;;  %v2636_v11 = vld [vmem:[%s730_s18] sm:$0xff]   ;;  %vm2418_vm1 = vmmov 0   ;;  %vm848_vm2 = vcmask 261120  }
  0x47   : > { %2074 = vmatprep.subr.bf16.mxu0 %v2417_v9  ;;  %2082 = vmatprep.subr.bf16.mxu1 %v2417_v9  ;;  %v805_v10 = vsel %vm797_vm0, %v2630_v8, 0  ;;  %v802_v12 = vsel %vm797_vm0, %v2636_v11, 0  ;;  %v2646_v13 = vld [vmem:[%s724_s19] sm:$0xff]   ;;  %s2419_s19 = smov 112   ;;  %v2670_v33 = vld [vmem:[%s2602_s7 + $0x8] sm:$0xff]   ;;  %vm1386_vm3 = vcmask 523264  }
  0x48   : > { %2075 = vmatpush3.bf16.xpose.msra.mxu0 %v805_v10  ;;  %2078 = vmatprep.mubr.msk.bf16.mxu0 %vm2418_vm1, %v2417_v9  ;;  %v2657_v14 = vld [vmem:[%s738_s9] ss:$0 sm:$0xff]  ;;  %s2423_s9 = smov 32   ;;  %1491 = vst.msk [vmem:[#allocation4] sm:$0xff] %vm1386_vm3, %v2417_v9  ;;  %1492 = vst.msk [vmem:[#allocation4 + $0x8] sm:$0xff] %vm1386_vm3, %v2417_v9  ;;  %vm1343_vm4 = vcmask 392192  }
  0x49   : > { %2076 = vmatprep.subr.bf16.mxu0 %v2417_v9  ;;  %2086 = vmatprep.mubr.msk.bf16.mxu1 %vm2418_vm1, %v2417_v9  ;;  %v2675_v34 = vld [vmem:[%s2602_s7] sm:$0xff]   ;;  %s2421_s7 = smov 80   ;;  %vm1488_vm5 = vcmask 519168  }
  0x4a   : > { %2083 = vmatpush3.bf16.msra.mxu1 %v2670_v33 }
  0x4b   : > { %2084 = vmatprep.subr.bf16.mxu1 %v2417_v9 }
  0x4e   : > { %2085 = vmatpush3.bf16.msra.mxu1 %v2675_v34 }
  0x4f   : > { %2090 = vmatprep.subr.bf16.mxu1 %v2417_v9 }
  0x50   : > { %2077 = vmatpush3.bf16.xpose.msra.mxu0 %v802_v12 }
  0x51   : > { %2106 = vmatprep.subr.bf16.mxu0 %v2417_v9 }
  0x57   : > { %2079 = vmatmul.mubr.msk.bf16.vlgmr.msra.gmra.mxu0 %vm797_vm0, %v2646_v13 }
  0x58   : > { %2110 = vmatprep.mubr.msk.bf16.mxu0 %vm2418_vm1, %v2417_v9 }
 0x117   : > { %v841_v15 = vpop.f32.mrf.mxu0 }
 0x118   : > { %v842_v16 = vadd.f32 %v2657_v14, %v841_v15 }
 0x119   : > { %v2080_v17 = vpop.f32.mrf.mxu0 }
 0x11a   : > { %v849_v18 = vsel %vm848_vm2, %v842_v16, -inf }
 0x11b   : > { %850 = vmax.xlane.f32.xlu0 %v849_v18  ;;  %v844_v19 = vpop.f32.mrf.mxu0 }
 0x11c   : > { %v845_v20 = vadd.f32 %v2657_v14, %v844_v19 }
 0x11d   : > { %v2081_v21 = vpop.f32.mrf.mxu0 }
 0x11e   : > { %v852_v22 = vsel %vm848_vm2, %v845_v20, -inf }
 0x11f   : > { %853 = vmax.xlane.f32.xlu0 %v852_v22 }
 0x135   : > { %932 = vrot.lane.b32.xlu0 %v2630_v8, %s2419_s19 }
 0x139   : > { %1059 = vrot.lane.b32.xlu0 %v2636_v11, %s2420_s22 }
 0x1a4   : > { %v851_v23 = vpop.xlane.xlu0 %850 }
 0x1a5   : > { %v855_v24 = vsub.f32 %v842_v16, %v851_v23 }
 0x1a7   : > { %v857_v25 = vmul.f32 1.442695, %v855_v24 }
 0x1a8   : > { %v854_v26 = vpop.xlane.xlu0 %853 }
 0x1a9   : > { %2288 = vpow2.f32 %v857_v25  ;;  %v856_v27 = vsub.f32 %v845_v20, %v854_v26 }
 0x1ab   : > { %v859_v28 = vmul.f32 1.442695, %v856_v27 }
 0x1ac   : > { %v933_v39 = vpop.permute.xlu0 %932 }
 0x1ad   : > { %2290 = vpow2.f32 %v859_v28  ;;  %v941_v48 = vsel %vm797_vm0, %v933_v39, 0 }
 0x1b0   : > { %v1060_v42 = vpop.permute.xlu0 %1059 }
 0x1b1   : > { %v1067_v46 = vsel %vm797_vm0, %v1060_v42, 0 }
 0x1b6   : > { %v2289_v29 = vpop.eup %2288 }
 0x1b7   : > { %v861_v30 = vsel %vm848_vm2, %v2289_v29, 0.0 }
 0x1b8   : > { %862 = vadd.xlane.f32.xlu1 %v861_v30 }
 0x1ba   : > { %v2291_v31 = vpop.eup %2290 }
 0x1bb   : > { %v864_v32 = vsel %vm848_vm2, %v2291_v31, 0.0 }
 0x1bc   : > { %865 = vadd.xlane.f32.xlu1 %v864_v32 }
 0x1cd   : > { %930 = vrot.lane.b32.xlu1 %v2636_v11, %s2419_s19 }
 0x1d1   : > { %1061 = vrot.lane.b32.xlu1 %v2630_v8, %s2420_s22 }
 0x1d5   : > { %928 = vrot.lane.b32.xlu1 %v2646_v13, %s2419_s19 }
 0x1d9   : > { %1057 = vrot.lane.b32.xlu1 %v2646_v13, %s2420_s22 }
 0x241   : > { %v863_v35 = vpop.xlane.xlu1 %862 }
 0x242   : > { %2292 = vrcp.f32 %v863_v35 }
 0x245   : > { %v866_v36 = vpop.xlane.xlu1 %865 }
 0x246   : > { %2294 = vrcp.f32 %v866_v36 }
 0x249   : > { %v931_v37 = vpop.permute.xlu1 %930 }
 0x24a   : > { %v938_v51 = vsel %vm797_vm0, %v931_v37, 0 }
 0x24d   : > { %v1062_v38 = vpop.permute.xlu1 %1061 }
 0x24e   : > { %v1070_v40 = vsel %vm797_vm0, %v1062_v38, 0 }
 0x24f   : > { %2107 = vmatpush3.bf16.xpose.msra.mxu0 %v1070_v40  ;;  %v2293_v41 = vpop.eup %2292 }
 0x250   : > { %2108 = vmatprep.subr.bf16.mxu0 %v2417_v9  ;;  %v869_v44 = vmul.f32 %v2293_v41, %v2289_v29 }
 0x251   : > { %v929_v47 = vpop.permute.xlu1 %928 }
 0x253   : > { %v2295_v43 = vpop.eup %2294 }
 0x254   : > { %v870_v45 = vmul.f32 %v2295_v43, %v2291_v31 }
 0x255   : > { %v1058_v50 = vpop.permute.xlu1 %1057 }
 0x256   : > { %v871_v49 = vpack.c.bf16 %v870_v45, %v869_v44 }
 0x257   : > { %2109 = vmatpush3.bf16.xpose.msra.mxu0 %v1067_v46 }
 0x258   : > { %2087 = vmatmul.mubr.msk.bf16.vlgmr.msra.gmra.mxu1 %vm848_vm2, %v871_v49  ;;  %2130 = vmatprep.subr.bf16.mxu0 %v2417_v9 }
 0x259   : > { %2091 = vmatpush3.bf16.xpose.msra.mxu1 %v941_v48  ;;  %2094 = vmatprep.mubr.msk.bf16.mxu1 %vm2418_vm1, %v2417_v9 }
 0x25a   : > { %2092 = vmatprep.subr.bf16.mxu1 %v2417_v9 }
 0x25e   : > { %2111 = vmatmul.mubr.msk.bf16.vlgmr.msra.gmra.mxu0 %vm797_vm0, %v1058_v50 }
 0x25f   : > { %2134 = vmatprep.mubr.msk.bf16.mxu0 %vm2418_vm1, %v2417_v9 }
 0x261   : > { %2093 = vmatpush3.bf16.xpose.msra.mxu1 %v938_v51 }
 0x262   : > { %2098 = vmatprep.subr.bf16.mxu1 %v2417_v9 }
 0x268   : > { %2095 = vmatmul.mubr.msk.bf16.vlgmr.msra.gmra.mxu1 %vm797_vm0, %v929_v47 }
 0x269   : > { %2102 = vmatprep.mubr.msk.bf16.mxu1 %vm2418_vm1, %v2417_v9 }
 0x318   : > { %v2704_v52 = vpop.f32.mrf.mxu1 }
 0x31a   : > { %v2088_v53 = vpop.f32.mrf.mxu1 }
 0x31c   : > { %v2706_v54 = vpop.f32.mrf.mxu1 }
 0x31e   : > { %v2089_v55 = vpop.f32.mrf.mxu1  ;;  %v1106_v56 = vpop.f32.mrf.mxu0 }
 0x31f   : > { %v1107_v61 = vadd.f32 %v2657_v14, %v1106_v56 }
 0x320   : > { %v2112_v57 = vpop.f32.mrf.mxu0 }
 0x321   : > { %v1113_v3 = vsel %vm848_vm2, %v1107_v61, -inf }
 0x322   : > { %v1109_v58 = vpop.f32.mrf.mxu0 }
 0x323   : > { %v1110_v5 = vadd.f32 %v2657_v14, %v1109_v58 }
 0x324   : > { %v2113_v59 = vpop.f32.mrf.mxu0 }
 0x325   : > { %v1116_v7 = vsel %vm848_vm2, %v1110_v5, -inf }
 0x328   : > { %v977_v60 = vpop.f32.mrf.mxu1 }
 0x329   : > { %v978_v62 = vadd.f32 %v2657_v14, %v977_v60 }
 0x32a   : > { %v2096_v63 = vpop.f32.mrf.mxu1 }
 0x32b   : > { %v984_v0 = vsel %vm848_vm2, %v978_v62, -inf }
 0x32c   : > { %985 = vmax.xlane.f32.xlu0 %v984_v0  ;;  %v980_v1 = vpop.f32.mrf.mxu1 }
 0x32d   : > { %v981_v2 = vadd.f32 %v2657_v14, %v980_v1 }
 0x32e   : > { %v2097_v4 = vpop.f32.mrf.mxu1 }
 0x32f   : > { %v987_v6 = vsel %vm848_vm2, %v981_v2, -inf }
 0x330   : > { %988 = vmax.xlane.f32.xlu1 %v987_v6  ;;  %1114 = vmax.xlane.f32.xlu0 %v1113_v3 }
 0x334   : > { %1117 = vmax.xlane.f32.xlu0 %v1116_v7 }
 0x3b5   : > { %v986_v10 = vpop.xlane.xlu0 %985 }
 0x3b6   : > { %v990_v12 = vsub.f32 %v978_v62, %v986_v10 }
 0x3b8   : > { %v992_v18 = vmul.f32 1.442695, %v990_v12 }
 0x3b9   : > { %v1115_v15 = vpop.xlane.xlu0 %1114  ;;  %v989_v28 = vpop.xlane.xlu1 %988 }
 0x3ba   : > { %v1119_v16 = vsub.f32 %v1107_v61, %v1115_v15  ;;  %v991_v29 = vsub.f32 %v981_v2, %v989_v28 }
 0x3bc   : > { %v1121_v17 = vmul.f32 1.442695, %v1119_v16  ;;  %v994_v30 = vmul.f32 1.442695, %v991_v29 }
 0x3bd   : > { %v1118_v19 = vpop.xlane.xlu0 %1117 }
 0x3be   : > { %v1120_v20 = vsub.f32 %v1110_v5, %v1118_v19  ;;  %2296 = vpow2.f32 %v1121_v17 }
 0x3bf   : > { %2298 = vpow2.f32 %v992_v18 }
 0x3c0   : > { %v1123_v21 = vmul.f32 1.442695, %v1120_v20 }
 0x3c2   : > { %2300 = vpow2.f32 %v1123_v21 }
 0x3c3   : > { %2302 = vpow2.f32 %v994_v30 }
 0x3cb   : > { %v2297_v22 = vpop.eup %2296 }
 0x3cc   : > { %v1125_v23 = vsel %vm848_vm2, %v2297_v22, 0.0  ;;  %v2299_v24 = vpop.eup %2298 }
 0x3cd   : > { %1126 = vadd.xlane.f32.xlu0 %v1125_v23  ;;  %v996_v27 = vsel %vm848_vm2, %v2299_v24, 0.0 }
 0x3cf   : > { %v2301_v25 = vpop.eup %2300 }
 0x3d0   : > { %v1128_v26 = vsel %vm848_vm2, %v2301_v25, 0.0  ;;  %v2303_v31 = vpop.eup %2302 }
 0x3d1   : > { %1129 = vadd.xlane.f32.xlu1 %v1128_v26  ;;  %997 = vadd.xlane.f32.xlu0 %v996_v27  ;;  %v999_v32 = vsel %vm848_vm2, %v2303_v31, 0.0 }
 0x3e2   : > { %1007 = vrot.lane.b32.xlu1 %v2675_v34, %s2419_s19 }
 0x3e6   : > { %1138 = vrot.lane.b32.xlu1 %v2670_v33, %s2420_s22 }
 0x3e7   : > { %1009 = vrot.lane.b32.xlu0 %v2670_v33, %s2419_s19 }
 0x3eb   : > { %1190 = vrot.lane.b32.xlu0 %v2630_v8, %s2421_s7 }
 0x3ef   : > { %1186 = vrot.lane.b32.xlu0 %v2646_v13, %s2421_s7 }
 0x40a   : > { %1000 = vadd.xlane.f32.xlu1 %v999_v32 }
 0x41b   : > { %1136 = vrot.lane.b32.xlu1 %v2675_v34, %s2420_s22 }
 0x41f   : > { %1188 = vrot.lane.b32.xlu1 %v2636_v11, %s2421_s7 }
 0x456   : > { %v1127_v35 = vpop.xlane.xlu0 %1126 }
 0x45a   : > { %v998_v36 = vpop.xlane.xlu0 %997  ;;  %v1130_v8 = vpop.xlane.xlu1 %1129 }
 0x45b   : > { %2304 = vrcp.f32 %v998_v36  ;;  %v2286_v36 = vld [vmem:[%s2876_s5 + $0x8] sm:$0xff]  }
 0x45e   : > { %v1010_v37 = vpop.permute.xlu0 %1009  ;;  %v1008_v13 = vpop.permute.xlu1 %1007 }
 0x45f   : > { %2099 = vmatpush3.bf16.msra.mxu1 %v1010_v37 }
 0x460   : > { %2100 = vmatprep.subr.bf16.mxu1 %v2417_v9 }
 0x462   : > { %v1139_v38 = vpop.permute.xlu1 %1138  ;;  %v1191_v48 = vpop.permute.xlu0 %1190 }
 0x463   : > { %2101 = vmatpush3.bf16.msra.mxu1 %v1008_v13  ;;  %v1199_v50 = vsel %vm797_vm0, %v1191_v48, 0 }
 0x464   : > { %2114 = vmatprep.subr.bf16.mxu1 %v2417_v9 }
 0x466   : > { %v1187_v56 = vpop.permute.xlu0 %1186 }
 0x468   : > { %v2305_v40 = vpop.eup %2304 }
 0x469   : > { %v1004_v11 = vmul.f32 %v2305_v40, %v2299_v24 }
 0x493   : > { %v1001_v39 = vpop.xlane.xlu1 %1000 }
 0x494   : > { %2306 = vrcp.f32 %v1001_v39 }
 0x495   : > { %2308 = vrcp.f32 %v1130_v8  ;;  %v2287_v8 = vld [vmem:[%s2876_s5] sm:$0xff]  }
 0x496   : > { %2310 = vrcp.f32 %v1127_v35  ;;  %v2285_v35 = vld [vmem:[%s2876_s5 + $0x10] sm:$0xff]  }
 0x497   : > { %v1137_v46 = vpop.permute.xlu1 %1136 }
 0x49b   : > { %v1189_v53 = vpop.permute.xlu1 %1188 }
 0x49c   : > { %v1196_v55 = vsel %vm797_vm0, %v1189_v53, 0 }
 0x4a1   : > { %v2307_v41 = vpop.eup %2306 }
 0x4a2   : > { %v1005_v42 = vmul.f32 %v2307_v41, %v2303_v31  ;;  %v2309_v44 = vpop.eup %2308 }
 0x4a3   : > { %v2311_v45 = vpop.eup %2310  ;;  %v1134_v47 = vmul.f32 %v2309_v44, %v2301_v25 }
 0x4a4   : > { %v1006_v43 = vpack.c.bf16 %v1005_v42, %v1004_v11  ;;  %v1133_v49 = vmul.f32 %v2311_v45, %v2297_v22 }
 0x4a6   : > { %2103 = vmatmul.mubr.msk.bf16.vlgmr.msra.gmra.mxu1 %vm848_vm2, %v1006_v43  ;;  %v1135_v51 = vpack.c.bf16 %v1134_v47, %v1133_v49 }
 0x4a7   : > { %2115 = vmatpush3.bf16.msra.mxu1 %v1139_v38  ;;  %2118 = vmatprep.mubr.msk.bf16.mxu1 %vm2418_vm1, %v2417_v9 }
 0x4a8   : > { %2116 = vmatprep.subr.bf16.mxu1 %v2417_v9 }
 0x4ab   : > { %2117 = vmatpush3.bf16.msra.mxu1 %v1137_v46 }
 0x4ac   : > { %2122 = vmatprep.subr.bf16.mxu1 %v2417_v9 }
 0x4ae   : > { %2119 = vmatmul.mubr.msk.bf16.vlgmr.msra.gmra.mxu1 %vm848_vm2, %v1135_v51 }
 0x4af   : > { %2123 = vmatpush3.bf16.xpose.msra.mxu1 %v1199_v50  ;;  %2126 = vmatprep.mubr.msk.bf16.mxu1 %vm2418_vm1, %v2417_v9 }
 0x4b0   : > { %2124 = vmatprep.subr.bf16.mxu1 %v2417_v9 }
 0x4b7   : > { %2125 = vmatpush3.bf16.xpose.msra.mxu1 %v1196_v55 }
 0x4be   : > { %2127 = vmatmul.mubr.msk.bf16.vlgmr.msra.gmra.mxu1 %vm797_vm0, %v1187_v56 }
 0x566   : > { %v1050_v57 = vpop.f32.mrf.mxu1 }
 0x568   : > { %v2104_v58 = vpop.f32.mrf.mxu1 }
 0x569   : > { %v763_v58 = vld [vmem:[%s2594_s25] sm:$0xff] }
 0x56a   : > { %v1053_v59 = vpop.f32.mrf.mxu1 }
 0x56b   : > { %v2264_v12 = vpack.i.bf16 %v1053_v59, %v1050_v57  ;;  %v1996_v57 = vld [vmem:[%s2877_s6] ss:$0 sm:$0xff] }
 0x56c   : > { %v2105_v60 = vpop.f32.mrf.mxu1 }
 0x56e   : > { %v1179_v61 = vpop.f32.mrf.mxu1 }
 0x570   : > { %v2120_v62 = vpop.f32.mrf.mxu1 }
 0x571   : > { %v764_v62 = vld [vmem:[%s2594_s25 + $0x8] sm:$0xff] }
 0x572   : > { %v1182_v63 = vpop.f32.mrf.mxu1 }
 0x573   : > { %v2269_v15 = vpack.i.bf16 %v1182_v63, %v1179_v61 }
 0x574   : > { %v2121_v0 = vpop.f32.mrf.mxu1 }
 0x57e   : > { %v1235_v1 = vpop.f32.mrf.mxu1 }
 0x57f   : > { %v1236_v2 = vadd.f32 %v2657_v14, %v1235_v1 }
 0x580   : > { %v2128_v3 = vpop.f32.mrf.mxu1 }
 0x581   : > { %v1242_v4 = vsel %vm848_vm2, %v1236_v2, -inf }
 0x582   : > { %1243 = vmax.xlane.f32.xlu1 %v1242_v4  ;;  %v1238_v5 = vpop.f32.mrf.mxu1 }
 0x583   : > { %v1239_v6 = vadd.f32 %v2657_v14, %v1238_v5 }
 0x584   : > { %v2129_v7 = vpop.f32.mrf.mxu1 }
 0x585   : > { %v1245_v10 = vsel %vm848_vm2, %v1239_v6, -inf }
 0x586   : > { %1246 = vmax.xlane.f32.xlu0 %v1245_v10 }
 0x593   : > { %1267 = vrot.lane.b32.xlu1 %v2670_v33, %s2421_s7 }
 0x597   : > { %2265 = vrot.lane.b32.xlu1 %v2264_v12, %s2422_s21 }
 0x59b   : > { %2270 = vrot.lane.b32.xlu1 %v2269_v15, %s2423_s9 }
 0x60b   : > { %v1244_v16 = vpop.xlane.xlu1 %1243 }
 0x60c   : > { %v1248_v17 = vsub.f32 %v1236_v2, %v1244_v16 }
 0x60e   : > { %v1250_v18 = vmul.f32 1.442695, %v1248_v17 }
 0x60f   : > { %v1268_v19 = vpop.permute.xlu1 %1267  ;;  %v1247_v20 = vpop.xlane.xlu0 %1246 }
 0x610   : > { %2312 = vpow2.f32 %v1250_v18  ;;  %v1249_v14 = vsub.f32 %v1239_v6, %v1247_v20  ;;  %2131 = vmatpush3.bf16.msra.mxu0 %v1268_v19 }
 0x611   : > { %2132 = vmatprep.subr.bf16.mxu0 %v2417_v9 }
 0x612   : > { %v1252_v21 = vmul.f32 1.442695, %v1249_v14 }
 0x613   : > { %v2266_v41 = vpop.permute.xlu1 %2265 }
 0x614   : > { %2314 = vpow2.f32 %v1252_v21  ;;  %v2268_v42 = vunpack.i.h.bf16 %v2266_v41  ;;  %v2267_v43 = vunpack.i.l.bf16 %v2266_v41 }
 0x616   : > { %v1340_v47 = vsel %vm797_vm0, %v2706_v54, %v2268_v42 }
 0x617   : > { %v2271_v11 = vpop.permute.xlu1 %2270 }
 0x618   : > { %v2273_v44 = vunpack.i.h.bf16 %v2271_v11  ;;  %v2272_v45 = vunpack.i.l.bf16 %v2271_v11 }
 0x61a   : > { %v1342_v51 = vsel %vm848_vm2, %v1340_v47, %v2273_v44 }
 0x61d   : > { %v2313_v22 = vpop.eup %2312 }
 0x61e   : > { %v1254_v33 = vsel %vm848_vm2, %v2313_v22, 0.0 }
 0x61f   : > { %1255 = vadd.xlane.f32.xlu0 %v1254_v33 }
 0x621   : > { %v2315_v23 = vpop.eup %2314 }
 0x622   : > { %v1257_v24 = vsel %vm848_vm2, %v2315_v23, 0.0 }
 0x623   : > { %1258 = vadd.xlane.f32.xlu0 %v1257_v24 }
 0x639   : > { %1265 = vrot.lane.b32.xlu0 %v2675_v34, %s2421_s7  ;;  %v2284_v34 = vld [vmem:[%s2876_s5 + $0x18] sm:$0xff]   ;;  %s2911_s7 = sld [smem:[#allocation16_spill]] }
 0x63f   : > { %v2002_v24 = vld [vmem:[%s2911_s7] ss:$0 sm:$0xff] }
 0x6a8   : > { %v1256_v25 = vpop.xlane.xlu0 %1255 }
 0x6a9   : > { %2316 = vrcp.f32 %v1256_v25 }
 0x6ac   : > { %v1259_v26 = vpop.xlane.xlu0 %1258 }
 0x6ad   : > { %2318 = vrcp.f32 %v1259_v26  ;;  %v2003_v26 = vld [vmem:[%s2912_s30] ss:$0 sm:$0xff] }
 0x6b0   : > { %v1266_v27 = vpop.permute.xlu0 %1265 }
 0x6b1   : > { %2133 = vmatpush3.bf16.msra.mxu0 %v1266_v27 }
 0x6b2   : > { %2138 = vmatprep.subr.bf16.mxu0 %v2417_v9 }
 0x6b6   : > { %v2317_v28 = vpop.eup %2316 }
 0x6b7   : > { %v1262_v30 = vmul.f32 %v2317_v28, %v2313_v22 }
 0x6ba   : > { %v2319_v29 = vpop.eup %2318 }
 0x6bb   : > { %v1263_v31 = vmul.f32 %v2319_v29, %v2315_v23 }
 0x6bd   : > { %v1264_v32 = vpack.c.bf16 %v1263_v31, %v1262_v30 }
 0x6bf   : > { %2135 = vmatmul.mubr.msk.bf16.vlgmr.msra.gmra.mxu0 %vm848_vm2, %v1264_v32 }
 0x6c0   : > { %2146 = vmatprep.mubr.msk.bf16.mxu0 %vm2418_vm1, %v2417_v9  ;;  %2139 = vmatpush3.bf16.msra.mxu0 %v2284_v34 }
 0x6c1   : > { %2140 = vmatprep.subr.bf16.mxu0 %v2417_v9 }
 0x6c4   : > { %2141 = vmatpush3.bf16.msra.mxu0 %v2285_v35 }
 0x6c5   : > { %2142 = vmatprep.subr.bf16.mxu0 %v2417_v9 }
 0x6c8   : > { %2143 = vmatpush3.bf16.msra.mxu0 %v2286_v36 }
 0x6c9   : > { %2144 = vmatprep.subr.bf16.mxu0 %v2417_v9  ;;  %v1339_v9 = vsel %vm797_vm0, %v2704_v52, %v2267_v43 }
 0x6ca   : > { %v1341_v50 = vsel %vm848_vm2, %v1339_v9, %v2272_v45 }
 0x6cc   : > { %2145 = vmatpush3.bf16.msra.mxu0 %v2287_v8 }
 0x77f   : > { %v1308_v37 = vpop.f32.mrf.mxu0 }
 0x781   : > { %v2136_v13 = vpop.f32.mrf.mxu0 }
 0x783   : > { %v1311_v38 = vpop.f32.mrf.mxu0 }
 0x784   : > { %v2274_v39 = vpack.i.bf16 %v1311_v38, %v1308_v37 }
 0x785   : > { %v2137_v40 = vpop.f32.mrf.mxu0 }
 0x786   : > { %2275 = vrot.lane.b32.xlu1 %v2274_v39, %s2424_s24 }
 0x7f8   : > { %v2276_v46 = vpop.permute.xlu1 %2275 }
 0x7f9   : > { %v2278_v48 = vunpack.i.h.bf16 %v2276_v46  ;;  %v2277_v49 = vunpack.i.l.bf16 %v2276_v46 }
 0x7fb   : > { %v1345_v53 = vsel %vm1343_vm4, %v1342_v51, %v2278_v48  ;;  %v1344_v55 = vsel %vm1343_vm4, %v1341_v50, %v2277_v49 }
 0x7fc   : > { %v1346_v56 = vpack.c.bf16 %v1345_v53, %v1344_v55 }
 0x7fe   : > { %2147 = vmatmul.mubr.msk.bf16.vlgmr.msra.gmra.mxu0 %vm1386_vm3, %v1346_v56 }
 0x8be   : > { %v1424_v54 = vpop.f32.mrf.mxu0 }
 0x8bf   : > { %v1425_v59 = vadd.f32 %v1996_v57, %v1424_v54 }
 0x8c0   : > { %v2148_v52 = vpop.f32.mrf.mxu0 }
 0x8c1   : > { %v1431_v60 = vadd.f32 %v1425_v59, %v763_v58 }
 0x8c2   : > { %v1427_v61 = vpop.f32.mrf.mxu0 }
 0x8c3   : > { %v1428_v63 = vadd.f32 %v1996_v57, %v1427_v61  ;;  %v1435_v0 = vsel %vm1386_vm3, %v1431_v60, 0.0 }
 0x8c4   : > { %v2149_v1 = vpop.f32.mrf.mxu0  ;;  %1436 = vadd.xlane.f32.xlu0 %v1435_v0 }
 0x8c5   : > { %v1432_v2 = vadd.f32 %v1428_v63, %v764_v62 }
 0x8c7   : > { %v1438_v3 = vsel %vm1386_vm3, %v1432_v2, 0.0 }
 0x8c8   : > { %1439 = vadd.xlane.f32.xlu1 %v1438_v3 }
 0x94d   : > { %v1437_v4 = vpop.xlane.xlu0 %1436 }
 0x94e   : > { %v1442_v5 = vmul.f32 0.015625, %v1437_v4 }
 0x950   : > { %v1444_v6 = vsub.f32 %v1431_v60, %v1442_v5 }
 0x951   : > { %v1440_v7 = vpop.xlane.xlu1 %1439 }
 0x952   : > { %v1443_v10 = vmul.f32 0.015625, %v1440_v7  ;;  %v1446_v12 = vmul.f32 %v1444_v6, %v1444_v6 }
 0x954   : > { %v1445_v15 = vsub.f32 %v1432_v2, %v1443_v10  ;;  %v1448_v16 = vsel %vm1386_vm3, %v1446_v12, 0.0 }
 0x955   : > { %1449 = vadd.xlane.f32.xlu0 %v1448_v16 }
 0x956   : > { %v1447_v17 = vmul.f32 %v1445_v15, %v1445_v15 }
 0x958   : > { %v1451_v18 = vsel %vm1386_vm3, %v1447_v17, 0.0 }
 0x959   : > { %1452 = vadd.xlane.f32.xlu0 %v1451_v18 }
 0x9de   : > { %v1450_v19 = vpop.xlane.xlu0 %1449 }
 0x9df   : > { %v1454_v20 = vmul.f32 0.015625, %v1450_v19 }
 0x9e1   : > { %v1456_v14 = vadd.f32 1e-12, %v1454_v20 }
 0x9e2   : > { %v1453_v21 = vpop.xlane.xlu0 %1452 }
 0x9e3   : > { %2320 = vrsqrt.f32 %v1456_v14  ;;  %v1455_v22 = vmul.f32 0.015625, %v1453_v21 }
 0x9e5   : > { %v1457_v33 = vadd.f32 1e-12, %v1455_v22 }
 0x9e7   : > { %2322 = vrsqrt.f32 %v1457_v33 }
 0x9f0   : > { %v2321_v23 = vpop.eup %2320 }
 0x9f1   : > { %v1460_v25 = vmul.f32 %v2321_v23, %v1444_v6 }
 0x9f3   : > { %v1468_v27 = vmul.f32 %v2002_v24, %v1460_v25 }
 0x9f4   : > { %v2323_v28 = vpop.eup %2322 }
 0x9f5   : > { %v1476_v29 = vadd.f32 %v2003_v26, %v1468_v27  ;;  %v1461_v30 = vmul.f32 %v2323_v28, %v1445_v15 }
 0x9f7   : > { %1478 = vst.msk [vmem:[#allocation2] sm:$0xff] %vm1386_vm3, %v1476_v29  ;;  %v2029_v31 = vpack.c.bf16 %v1476_v29, %v1476_v29  ;;  %v1469_v32 = vmul.f32 %v2002_v24, %v1461_v30 }
 0x9f9   : > { %1489 = vst.msk [vmem:[#allocation3] sm:$0xf] %vm1488_vm5, %v2029_v31  ;;  %v1477_v34 = vadd.f32 %v2003_v26, %v1469_v32 }
 0x9fb   : > { %1479 = vst.msk [vmem:[#allocation2 + $0x8] sm:$0xff] %vm1386_vm3, %v1477_v34  ;;  %v2030_v35 = vpack.c.bf16 %v1477_v34, %v1477_v34 }
 0x9fd   : > { %1490 = vst.msk [vmem:[#allocation3 + $0x4] sm:$0xf] %vm1488_vm5, %v2030_v35 }
 0x9fe PF: > { %v2324_v36 = vld [vmem:[%s2627_s12 + $0x18] sm:$0xff]   ;;  %v2425_v8 = vmov 0.0   ;;  %v2325_v37 = vld [vmem:[%s2627_s12 + $0x10] sm:$0xff]   ;;  %vm2426_vm6 = vmmov 0   ;;  %v2326_v38 = vld [vmem:[%s2627_s12 + $0x8] sm:$0xff]   ;;  %vm1539_vm7 = vcmask 523264  }
 0x9ff   : > { %2150 = vmatprep.subr.bf16.mxu0 %v2425_v8  ;;  %2162 = vmatprep.subr.bf16.mxu1 %v2425_v8  ;;  %v2329_v13 = vld [vmem:[%s2625_s14 + $0x38] sm:$0xff]   ;;  %v2327_v39 = vld [vmem:[%s2627_s12] sm:$0xff]   ;;  %v2330_v41 = vld [vmem:[%s2625_s14 + $0x30] sm:$0xff]   ;;  %p2021_p2 = scmp.ne.s32.totalorder %s2391_s20, 1 }
 0xa00   : > { %2151 = vmatpush3.bf16.msra.mxu0 %v2324_v36  ;;  %2158 = vmatprep.mubr.msk.bf16.mxu0 %vm2426_vm6, %v2425_v8  ;;  %v2331_v11 = vld [vmem:[%s2625_s14 + $0x28] sm:$0xff]   ;;  %v2332_v42 = vld [vmem:[%s2625_s14 + $0x20] sm:$0xff]   ;;  %v2333_v43 = vld [vmem:[%s2625_s14 + $0x18] sm:$0xff]   ;;  %s2914_s23 = sld [smem:[#allocation20_spill]] (!%p2021_p2) }
 0xa01   : > { %2152 = vmatprep.subr.bf16.mxu0 %v2425_v8  ;;  %2178 = vmatprep.mubr.msk.bf16.mxu1 %vm2426_vm6, %v2425_v8  ;;  %v2334_v44 = vld [vmem:[%s2625_s14 + $0x10] sm:$0xff]   ;;  %v2335_v45 = vld [vmem:[%s2625_s14 + $0x8] sm:$0xff]   ;;  %v2336_v46 = vld [vmem:[%s2625_s14] sm:$0xff]   ;;  %s2913_s14 = sld [smem:[#allocation19_spill]] (!%p2021_p2) }
 0xa02   : > { %2163 = vmatpush3.bf16.msra.mxu1 %v2329_v13  ;;  %v2006_v47 = vld [vmem:[%s741_s26] ss:$0 sm:$0xff]  ;;  %v1594_v0 = vld [vmem:[#allocation4] sm:$0xff]  ;;  %s2915_s17 = sld [smem:[#allocation21_spill]] (!%p2021_p2) }
 0xa03   : > { %2164 = vmatprep.subr.bf16.mxu1 %v2425_v8  ;;  %v1595_v4 = vld [vmem:[#allocation4 + $0x8] sm:$0xff] }
 0xa04   : > { %2153 = vmatpush3.bf16.msra.mxu0 %v2325_v37  ;;  %v2328_v40 = vld [vmem:[#allocation3] sm:$0xff]  }
 0xa05   : > { %2154 = vmatprep.subr.bf16.mxu0 %v2425_v8 }
 0xa06   : > { %2165 = vmatpush3.bf16.msra.mxu1 %v2330_v41 }
 0xa07   : > { %2166 = vmatprep.subr.bf16.mxu1 %v2425_v8 }
 0xa08   : > { %2155 = vmatpush3.bf16.msra.mxu0 %v2326_v38 }
 0xa09   : > { %2156 = vmatprep.subr.bf16.mxu0 %v2425_v8 }
 0xa0a   : > { %2167 = vmatpush3.bf16.msra.mxu1 %v2331_v11 }
 0xa0b   : > { %2168 = vmatprep.subr.bf16.mxu1 %v2425_v8 }
 0xa0c   : > { %2157 = vmatpush3.bf16.msra.mxu0 %v2327_v39 }
 0xa0e   : > { %2169 = vmatpush3.bf16.msra.mxu1 %v2332_v42 }
 0xa0f   : > { %2159 = vmatmul.mubr.msk.bf16.vlgmr.msra.gmra.mxu0 %vm1539_vm7, %v2328_v40  ;;  %2170 = vmatprep.subr.bf16.mxu1 %v2425_v8 }
 0xa12   : > { %2171 = vmatpush3.bf16.msra.mxu1 %v2333_v43 }
 0xa13   : > { %2172 = vmatprep.subr.bf16.mxu1 %v2425_v8 }
 0xa16   : > { %2173 = vmatpush3.bf16.msra.mxu1 %v2334_v44 }
 0xa17   : > { %2174 = vmatprep.subr.bf16.mxu1 %v2425_v8 }
 0xa1a   : > { %2175 = vmatpush3.bf16.msra.mxu1 %v2335_v45 }
 0xa1b   : > { %2176 = vmatprep.subr.bf16.mxu1 %v2425_v8 }
 0xa1e   : > { %2177 = vmatpush3.bf16.msra.mxu1 %v2336_v46 }
 0xacf   : > { %v1577_v9 = vpop.f32.mrf.mxu0 }
 0xad0   : > { %v1578_v48 = vadd.f32 %v2006_v47, %v1577_v9 }
 0xad1   : > { %v2160_v49 = vpop.f32.mrf.mxu0 }
 0xad2   : > { %v1586_v50 = vmul.f32 0.70710677, %v1578_v48  ;;  %v1584_v59 = vmul.f32 0.5, %v1578_v48 }
 0xad3   : > { %v1580_v51 = vpop.f32.mrf.mxu0 }
 0xad4   : > { %2337 = verf.f32 %v1586_v50  ;;  %v1581_v53 = vadd.f32 %v2006_v47, %v1580_v51 }
 0xad5   : > { %v2161_v55 = vpop.f32.mrf.mxu0 }
 0xad6   : > { %v1587_v56 = vmul.f32 0.70710677, %v1581_v53  ;;  %v1585_v52 = vmul.f32 0.5, %v1581_v53 }
 0xad8   : > { %2339 = verf.f32 %v1587_v56 }
 0xae1   : > { %v2338_v57 = vpop.eup %2337 }
 0xae2   : > { %v1590_v54 = vadd.f32 1.0, %v2338_v57 }
 0xae4   : > { %v1592_v61 = vmul.f32 %v1590_v54, %v1584_v59 }
 0xae5   : > { %v2340_v58 = vpop.eup %2339 }
 0xae6   : > { %v1591_v60 = vadd.f32 1.0, %v2340_v58 }
 0xae8   : > { %v1593_v62 = vmul.f32 %v1591_v60, %v1585_v52 }
 0xaea   : > { %v1596_v63 = vpack.c.bf16 %v1593_v62, %v1592_v61 }
 0xaec   : > { %2179 = vmatmul.mubr.bf16.vlgmr.msra.gmra.mxu1 %v1596_v63 }
 0xbac   : > { %v1695_v1 = vpop.f32.mrf.mxu1 }
 0xbad   : > { %v1702_v2 = vadd.f32 %v1695_v1, %v1594_v0 }
 0xbae   : > { %v2180_v3 = vpop.f32.mrf.mxu1 }
 0xbaf   : > { %1704 = vst.msk [vmem:[#allocation4] sm:$0xff] %vm1539_vm7, %v1702_v2  ;;  %1709 = sbr.rel (%p2021_p2) target bundleno = 3316 (0xcf4), region = 129 }
 0xbb0   : > { %v1698_v5 = vpop.f32.mrf.mxu1 }
 0xbb1   : > { %v1703_v6 = vadd.f32 %v1698_v5, %v1595_v4 }
 0xbb2   : > { %v2181_v7 = vpop.f32.mrf.mxu1 }
 0xbb3   : > { %1705 = vst.msk [vmem:[#allocation4 + $0x8] sm:$0xff] %vm1539_vm7, %v1703_v6 }
 0xbb4   : > { %v2022_v12 = vld [vmem:[%s2913_s14] ss:$0 sm:$0xff]  ;;  %v1722_v18 = vld [vmem:[#allocation2 + $0x8] sm:$0xff] }
 0xbb5   : > { %v1721_v15 = vld [vmem:[#allocation2] sm:$0xff] }
 0xbb6   : > { %v1710_v10 = vld [vmem:[#allocation4] sm:$0xff]  ;;  %v2023_v38 = vld [vmem:[%s2914_s23] ss:$0 sm:$0xff] }
 0xbb7   : > { %v1719_v16 = vadd.f32 %v2022_v12, %v1710_v10  ;;  %v2024_v40 = vld [vmem:[%s2915_s17] ss:$0 sm:$0xff] }
 0xbb9   : > { %v1723_v20 = vadd.f32 %v1721_v15, %v1719_v16 }
 0xbba   : > { %v1711_v17 = vld [vmem:[#allocation4 + $0x8] sm:$0xff] }
 0xbbb   : > { %v1720_v19 = vadd.f32 %v2022_v12, %v1711_v17  ;;  %v1727_v21 = vsel %vm1539_vm7, %v1723_v20, 0.0 }
 0xbbc   : > { %1728 = vadd.xlane.f32.xlu0 %v1727_v21 }
 0xbbd   : > { %v1724_v14 = vadd.f32 %v1722_v18, %v1720_v19 }
 0xbbf   : > { %v1730_v22 = vsel %vm1539_vm7, %v1724_v14, 0.0 }
 0xbc0   : > { %1731 = vadd.xlane.f32.xlu0 %v1730_v22 }
 0xc45   : > { %v1729_v33 = vpop.xlane.xlu0 %1728 }
 0xc46   : > { %v1734_v23 = vmul.f32 0.015625, %v1729_v33 }
 0xc48   : > { %v1736_v24 = vsub.f32 %v1723_v20, %v1734_v23 }
 0xc49   : > { %v1732_v25 = vpop.xlane.xlu0 %1731 }
 0xc4a   : > { %v1735_v26 = vmul.f32 0.015625, %v1732_v25  ;;  %v1738_v27 = vmul.f32 %v1736_v24, %v1736_v24 }
 0xc4c   : > { %v1737_v28 = vsub.f32 %v1724_v14, %v1735_v26  ;;  %v1740_v29 = vsel %vm1539_vm7, %v1738_v27, 0.0 }
 0xc4d   : > { %1741 = vadd.xlane.f32.xlu1 %v1740_v29 }
 0xc4e   : > { %v1739_v30 = vmul.f32 %v1737_v28, %v1737_v28 }
 0xc50   : > { %v1743_v31 = vsel %vm1539_vm7, %v1739_v30, 0.0 }
 0xc51   : > { %1744 = vadd.xlane.f32.xlu1 %v1743_v31 }
 0xcd6   : > { %v1742_v32 = vpop.xlane.xlu1 %1741 }
 0xcd7   : > { %v1746_v34 = vmul.f32 0.015625, %v1742_v32 }
 0xcd9   : > { %v1748_v35 = vadd.f32 1e-12, %v1746_v34 }
 0xcda   : > { %v1745_v36 = vpop.xlane.xlu1 %1744 }
 0xcdb   : > { %2341 = vrsqrt.f32 %v1748_v35  ;;  %v1747_v8 = vmul.f32 0.015625, %v1745_v36 }
 0xcdd   : > { %v1749_v37 = vadd.f32 1e-12, %v1747_v8 }
 0xcdf   : > { %2343 = vrsqrt.f32 %v1749_v37 }
 0xce8   : > { %v2342_v13 = vpop.eup %2341 }
 0xce9   : > { %v1752_v39 = vmul.f32 %v2342_v13, %v1736_v24 }
 0xceb   : > { %v1760_v41 = vmul.f32 %v2023_v38, %v1752_v39 }
 0xcec   : > { %v2344_v11 = vpop.eup %2343 }
 0xced   : > { %v1768_v42 = vadd.f32 %v2024_v40, %v1760_v41  ;;  %v1753_v43 = vmul.f32 %v2344_v11, %v1737_v28 }
 0xcef   : > { %1770 = vst.msk [vmem:[%s2613_s13] sm:$0xff] %vm1539_vm7, %v1768_v42  ;;  %v1761_v44 = vmul.f32 %v2023_v38, %v1753_v43 }
 0xcf1   : > { %v1769_v45 = vadd.f32 %v2024_v40, %v1761_v44 }
 0xcf3   : > { %1771 = vst.msk [vmem:[%s2613_s13 + $0x8] sm:$0xff] %vm1539_vm7, %v1769_v45 }
 0xcf4 PF: > { %s2916_s27 = sld [smem:[#allocation10_spill]] }
 0xcf5   : > { %s2917_s18 = sld [smem:[#allocation6_spill]] }
 0xcf6   : > { %s2918_s19 = sld [smem:[#allocation13_spill]] }
 0xcf7   : > { %s2919_s20 = sld [smem:[#allocation7_spill]] }
 0xcf8   : > { %s2920_s21 = sld [smem:[#allocation8_spill]] }
 0xcf9   : > { %s2921_s22 = sld [smem:[#allocation9_spill]] }
 0xcfa   : > { %s25_s26 = sadd.s32 1, %s2916_s27   ;;  %s2922_s23 = sld [smem:[#allocation11_spill]] }
 0xcfb   : > { %p22_p3 = scmp.ge.s32.totalorder %s25_s26, 10   ;;  %s2923_s24 = sld [smem:[#allocation12_spill]] }
 0xcfc   : > { %s2924_s25 = sld [smem:[#allocation14_spill]] }
 0xcfd   :  { %24 = sbr.rel (!%p22_p3) target bundleno = 13 (0xd), region = 185 }

// kernel: alt_roberta_encoder.7
= control target key start
LH: loop header
LB: loop body
LE: loop exit
PB: predicated region body
PF: predicated region fallthrough
CT: control target
= control target key end

     0   :  { %s3051_s0 = inlined_call_operand.vmem [shape: f32[2,32,64], index: 0, kind: input, shape index: {}]   ;;  %s3052_s1 = inlined_call_operand.vmem [shape: bf16[2,32,64], index: 1, kind: input, shape index: {}]   ;;  %s3053_s2 = inlined_call_operand.vmem [shape: bf16[2,32,64], index: 2, kind: input, shape index: {}]   ;;  %s3054_s3 = inlined_call_operand.vmem [shape: bf16[2,32,64], index: 3, kind: input, shape index: {}]   ;;  %s3055_s4 = inlined_call_operand.vmem [shape: f32[2,1,32], index: 4, kind: input, shape index: {}]   ;;  %s3056_s5 = inlined_call_operand.vmem [shape: bf16[64,64], index: 5, kind: input, shape index: {}]   ;;  %s3057_s6 = inlined_call_operand.vmem [shape: f32[1,64], index: 6, kind: input, shape index: {}]   ;;  %s3058_s7 = inlined_call_operand.vmem [shape: f32[1,64], index: 7, kind: input, shape index: {}]   ;;  %s3059_s8 = inlined_call_operand.vmem [shape: f32[1,64], index: 8, kind: input, shape index: {}]   ;;  %s3060_s9 = inlined_call_operand.vmem [shape: bf16[64,256], index: 9, kind: input, shape index: {}]   ;;  %s3061_s10 = inlined_call_operand.vmem [shape: f32[1,256], index: 10, kind: input, shape index: {}]   ;;  %s3062_s11 = inlined_call_operand.vmem [shape: bf16[256,64], index: 11, kind: input, shape index: {}]   ;;  %s3063_s12 = inlined_call_operand.vmem [shape: f32[1,64], index: 12, kind: input, shape index: {}]   ;;  %s3064_s13 = inlined_call_operand.vmem [shape: f32[1,64], index: 13, kind: input, shape index: {}]   ;;  %s3065_s14 = inlined_call_operand.vmem [shape: f32[1,64], index: 14, kind: input, shape index: {}]   ;;  %s3066_s15 = inlined_call_operand.hbm [shape: f32[2,32,64], index: 15, kind: output, shape index: {}]  }
   0x1   :  { %3084 = sst [smem:[#allocation23_spill]] %s3056_s5 }
   0x2   :  { %3085 = sst [smem:[#allocation24_spill]] %s3057_s6 }
   0x3   :  { %3086 = sst [smem:[#allocation25_spill]] %s3058_s7 }
   0x4   :  { %3087 = sst [smem:[#allocation26_spill]] %s3059_s8 }
   0x5   :  { %3088 = sst [smem:[#allocation27_spill]] %s3060_s9 }
   0x6   :  { %3089 = sst [smem:[#allocation28_spill]] %s3062_s11 }
   0x7   :  { %3090 = sst [smem:[#allocation29_spill]] %s3063_s12 }
   0x8   :  { %3091 = sst [smem:[#allocation30_spill]] %s3064_s13 }
   0x9   :  { %3092 = sst [smem:[#allocation31_spill]] %s3065_s14 }
   0xa   :  { %3093 = sst [smem:[#allocation32_spill]] %s3066_s15 }
   0xb   :  { %20 = vsyncpa [#allocation7], 0 }
   0xc   :  { %22 = vsyncpa [#allocation7 + $0x1], 0  ;;  %s2597_s18 = smov 0   ;;  %s2599_s19 = smov 0  }
   0xd   :  { %s2601_s20 = smov 0   ;;  %s2603_s21 = smov 0  }
   0xe   :  { %s2605_s22 = smov 0   ;;  %s2607_s23 = smov 0  }
   0xf   :  { %s2609_s24 = smov 0   ;;  %s2611_s25 = smov 0  }
  0x10   :  { %s2613_s26 = smov 0   ;;  %s2615_s27 = smov 0  }
  0x11   :  { %s2617_s28 = smov 0   ;;  %s2619_s29 = smov 0  }
  0x12 LB: > { %3094 = sst [smem:[#allocation9_spill]] %s2458_s18  ;;  %s1956_s30 = sadd.s32 4294967295, %s2502_s29   ;;  %s2502_s29 = sphi %s2619_s29, %s28_s29   ;;  %s2498_s28 = sphi %s2617_s28, %s3136_s28   ;;  %s2494_s27 = sphi %s2615_s27, %s3135_s27   ;;  %s2490_s26 = sphi %s2613_s26, %s3134_s26   ;;  %s2486_s25 = sphi %s2611_s25, %s3133_s25   ;;  %s2482_s24 = sphi %s2609_s24, %s3132_s24   ;;  %s2478_s23 = sphi %s2607_s23, %s3131_s23   ;;  %s2474_s22 = sphi %s2605_s22, %s3130_s22   ;;  %s2470_s21 = sphi %s2603_s21, %s3129_s21   ;;  %s2466_s20 = sphi %s2601_s20, %s3128_s20   ;;  %s2462_s19 = sphi %s2599_s19, %s3138_s19   ;;  %s2458_s18 = sphi %s2597_s18, %s3137_s18  }
  0x13   : > { %3095 = sst [smem:[#allocation10_spill]] %s2466_s20  ;;  %s1957_s16 = sadd.s32 4294967294, %s2502_s29  }
  0x14   : > { %3096 = sst [smem:[#allocation11_spill]] %s2474_s22  ;;  %s40_s17 = sadd.s32 1, %s2490_s26 }
  0x15   : > { %3097 = sst [smem:[#allocation12_spill]] %s2490_s26  ;;  %p41_p0 = scmp.ge.s32.totalorder %s40_s17, 2 }
  0x16   : > { %3098 = sst [smem:[#allocation13_spill]] %s2494_s27  ;;  %s43_s15 = sadd.s32 1, %s2494_s27 }
  0x17   : > { %3099 = sst [smem:[#allocation14_spill]] %s2498_s28  ;;  %s47_s14 = sadd.s32 1, %s2498_s28 }
  0x18   : > { %3100 = sst [smem:[#allocation15_spill]] %s2502_s29  ;;  %p279_p1 = scmp.ne.s32.totalorder %s2474_s22, %s2470_s21 }
  0x19   : > { %s3140_s17 = smov (%p41_p0, %s40_s17), 0  ;;  %s3142_s15 = smov (!%p41_p0, %s43_s15), %s2494_s27 }
  0x1a   : > { %3101 = sst [smem:[#allocation16_spill]] %s3140_s17  ;;  %s269_s13 = ssub.s32 %s2490_s26, %s3140_s17 }
  0x1b   : > { %p280_p2 = scmp.eq.s32.totalorder %s2502_s29, 0  ;;  %p45_p3 = scmp.ge.s32.totalorder %s3142_s15, 2 }
  0x1c   : > { %p270_p4 = scmp.eq.s32.totalorder %s269_s13, 0  ;;  %s272_s12 = sadd.s32 1, %s2474_s22 }
  0x1d   : > { %p2671_p5 = por %p280_p2, %p279_p1  ;;  %s3144_s15 = smov (%p45_p3, %s3142_s15), 0 }
  0x1e   : > { %3103 = sst [smem:[#allocation17_spill]] %s3144_s15  ;;  %s3146_s14 = smov (!%p45_p3, %s47_s14), %s2498_s28 }
  0x1f   : > { %s2679_s7 = scalar_select %p270_p4, %s2474_s22, %s272_s12  }
  0x20   : > { %p49_p6 = scmp.ge.s32.totalorder %s3146_s14, 2  ;;  %s411_s6 = ssub.s32 %s2494_s27, %s3144_s15 }
  0x21   : > { %3104 = sst [smem:[#allocation18_spill]] %s2679_s7  ;;  %p425_p7 = scmp.ne.s32.totalorder %s2466_s20, %s2462_s19 }
  0x22   : > { %p426_p8 = scmp.eq.s32.totalorder %s1956_s30, 7  ;;  %s3148_s14 = smov (%p49_p6, %s3146_s14), 0 }
  0x23   : > { %3105 = sst [smem:[#allocation19_spill]] %s3148_s14  ;;  %p431_p10 = scmp.ne.s32.totalorder %s2462_s19, %s2458_s18 }
  0x24   : > { %p2687_p9 = por %p426_p8, %p425_p7  ;;  %s410_s17 = ssub.s32 %s2498_s28, %s3148_s14 }
  0x25   : > { %p432_p11 = scmp.eq.s32.totalorder %s1957_s16, 7  ;;  %s412_s5 = sor.u32 %s411_s6, %s410_s17 }
  0x26   : > { %s3106_s13 = scalar_select %p2687_p9, 1, 0 }
  0x27   : > { %s415_s11 = sadd.s32 1, %s2466_s20  ;;  %p413_p12 = scmp.eq.s32.totalorder %s412_s5, 0 }
  0x28   : > { %3107 = sst [smem:[#allocation20_spill]] %s3106_s13  ;;  %p2696_p13 = por %p432_p11, %p431_p10 }
  0x29   : > { %s2701_s15 = scalar_select %p413_p12, %s2466_s20, %s415_s11  }
  0x2a   : > { %s3108_s12 = scalar_select %p2696_p13, 1, 0 }
  0x2b   : > { %3110 = sst [smem:[#allocation22_spill]] %s2701_s15  ;;  %p1959_p0 = scmp.ge.s32.totalorder %s2502_s29, 8 }
  0x2c   : > { %3109 = sst [smem:[#allocation21_spill]] %s3108_s12 }
  0x2d   : > { %469 = sbr.rel (%p1959_p0) target bundleno = 65 (0x41), region = 44 }
  0x32   : > { %520 = sbr.rel (!%p2671_p5) target bundleno = 65 (0x41), region = 68  ;;  %s522_s30 = sand.u32 (%p2671_p5), 1, %s2474_s22  }
  0x33   : > { %s1961_s14 = sshll.u32 (%p2671_p5), %s2490_s26, 2  ;;  %s1960_s16 = sshll.u32 (%p2671_p5), %s522_s30, 5 }
  0x34   : > { %s3111_s9 = sld [smem:[#allocation27_spill]] (%p2671_p5)  ;;  %s524_s28 = scalar_lea.vmem (%p2671_p5), [#allocation5], %s1960_s16 }
  0x3a   : > { %s526_s5 = scalar_lea.vmem %s3111_s9, %s1961_s14 }
  0x3b   : > { %v543_v0 = vld [vmem:[%s526_s5] sm:$0xf]  ;;  %v545_v1 = vld [vmem:[%s526_s5 + $0x8] sm:$0xf]  ;;  %v547_v2 = vld [vmem:[%s526_s5 + $0x10] sm:$0xf] }
  0x3c   : > { %544 = vst [vmem:[%s524_s28] sm:$0xf] %v543_v0  ;;  %546 = vst [vmem:[%s524_s28 + $0x4] sm:$0xf] %v545_v1  ;;  %v549_v3 = vld [vmem:[%s526_s5 + $0x18] sm:$0xf] }
  0x3d   : > { %v551_v4 = vld [vmem:[%s526_s5 + $0x20] sm:$0xf]  ;;  %548 = vst [vmem:[%s524_s28 + $0x8] sm:$0xf] %v547_v2  ;;  %550 = vst [vmem:[%s524_s28 + $0xc] sm:$0xf] %v549_v3 }
  0x3e   : > { %552 = vst [vmem:[%s524_s28 + $0x10] sm:$0xf] %v551_v4  ;;  %v553_v5 = vld [vmem:[%s526_s5 + $0x28] sm:$0xf]  ;;  %v555_v6 = vld [vmem:[%s526_s5 + $0x30] sm:$0xf] }
  0x3f   : > { %v557_v7 = vld [vmem:[%s526_s5 + $0x38] sm:$0xf]  ;;  %554 = vst [vmem:[%s524_s28 + $0x14] sm:$0xf] %v553_v5  ;;  %556 = vst [vmem:[%s524_s28 + $0x18] sm:$0xf] %v555_v6 }
  0x40   : > { %558 = vst [vmem:[%s524_s28 + $0x1c] sm:$0xf] %v557_v7 }
  0x41 PF: > { %p1962_p1 = scmp.ge.s32.totalorder %s2502_s29, 1  ;;  %p612_p2 = scmp.lt.s32.totalorder %s2502_s29, 9 }
  0x43   : > { %p613_p3 = pnand %p1962_p1, %p612_p2 }
  0x44   : > { %s619_s8 = sand.u32 (!%p613_p3), 1, %s2470_s21   ;;  %s3073_s11 = sand.u32 (!%p613_p3), 1, %s2462_s19  }
  0x45   : > { %616 = sbr.rel (%p613_p3) target bundleno = 3363 (0xd23), region = 117  ;;  %s1963_s14 = sshll.u32 (!%p613_p3), %s619_s8, 5 }
  0x46   : > { %s1964_s28 = sshll.u32 (!%p613_p3), %s3073_s11, 4  ;;  %s2718_s30 = sshll.u32 (!%p613_p3), %s2482_s24, 1 }
  0x47   : > { %p706_p4 = scmp.lt.s32.totalorder (!%p613_p3), %s2486_s25, 1  ;;  %p708_p5 = scmp.lt.s32.totalorder (!%p613_p3), %s2718_s30, 3 }
  0x48   : > { %p738_p6 = scmp.lt.s32.totalorder (!%p613_p3), %s2478_s23, 1  ;;  %s3112_s18 = sld [smem:[#allocation28_spill]] (!%p613_p3) }
  0x49   : > { %p1977_p8 = scmp.ne.s32.totalorder (!%p613_p3), %s2478_s23, 0 }
  0x4a   : > { %s2724_s16 = scalar_select %p706_p4, %s2486_s25, 1 }
  0x4b   : > { %s709_s6 = scalar_select %p708_p5, %s2718_s30, 3 }
  0x4c   : > { %s1966_s21 = sshll.u32 %s2724_s16, 2  ;;  %s2027_s17 = sshll.u32 %s2724_s16, 4 }
  0x4d   : > { %s711_s5 = sadd.s32 %s1966_s21, %s709_s6  ;;  %s729_s24 = scalar_lea.vmem %s3053_s2, %s2027_s17 }
  0x4e   : > { %s1967_s9 = sshll.u32 %s711_s5, 3  ;;  %s1970_s27 = sshll.u32 %s711_s5, 2 }
  0x4f   : > { %s2735_s22 = scalar_lea.vmem %s3051_s0, %s1967_s9  ;;  %s723_s12 = scalar_lea.vmem %s3052_s1, %s1970_s27 }
  0x50   : > { %s2743_s13 = scalar_lea.vmem %s3054_s3, %s2027_s17  ;;  %s737_s11 = scalar_lea.vmem %s3055_s4, %s2724_s16 }
  0x51   : > { %s2750_s8 = scalar_select %p738_p6, %s2478_s23, 1 }
  0x52   : > { %s1975_s5 = sshll.u32 %s2478_s23, 4  ;;  %s2762_s17 = scalar_lea.vmem [#allocation5], %s1963_s14 }
  0x53   : > { %s740_s26 = scalar_lea.vmem %s3061_s10, %s2750_s8  ;;  %p742_p7 = scmp.lt.s32.totalorder %s1975_s5, 31 }
  0x54   : > { %s2764_s6 = scalar_lea.vmem [#allocation6], %s1964_s28  ;;  %752 = sbr.rel (%p1977_p8) target bundleno = 2577 (0xa11), region = 125 }
  0x55   : > { %s3150_s5 = smov (!%p742_p7, %s1975_s5), 31  ;;  %s2507_s14 = smov (!%p1977_p8), 96  }
  0x56   : > { %s1976_s15 = sshll.u32 %s3150_s5, 2  ;;  %s2509_s28 = smov (!%p1977_p8), 16  }
  0x57   : > { %s2760_s29 = scalar_lea.vmem %s3112_s18, %s1976_s15  ;;  %s2510_s16 = smov (!%p1977_p8), 32  }
  0x58   : > { %s2511_s18 = smov (!%p1977_p8), 48   ;;  %s3116_s5 = sld [smem:[#allocation26_spill]] (!%p1977_p8) }
  0x59   : > { %v2767_v8 = vld [vmem:[%s729_s24 + $0x8] sm:$0xff]   ;;  %v2504_v9 = vmov 0.0   ;;  %vm787_vm0 = vcmask 130048   ;;  %v2773_v11 = vld [vmem:[%s729_s24] sm:$0xff]   ;;  %vm2505_vm1 = vmmov 0   ;;  %vm838_vm2 = vcmask 261120  }
  0x5a   : > { %2074 = vmatprep.subr.bf16.mxu0 %v2504_v9  ;;  %2082 = vmatprep.subr.bf16.mxu1 %v2504_v9  ;;  %v795_v10 = vsel %vm787_vm0, %v2767_v8, 0  ;;  %v792_v12 = vsel %vm787_vm0, %v2773_v11, 0  ;;  %v2783_v13 = vld [vmem:[%s723_s12] sm:$0xff]   ;;  %s2506_s12 = smov 112   ;;  %v2802_v33 = vld [vmem:[%s2743_s13 + $0x8] sm:$0xff]   ;;  %vm1376_vm3 = vcmask 523264  }
  0x5b   : > { %2075 = vmatpush3.bf16.xpose.msra.mxu0 %v795_v10  ;;  %2078 = vmatprep.mubr.msk.bf16.mxu0 %vm2505_vm1, %v2504_v9  ;;  %v2789_v14 = vld [vmem:[%s737_s11] ss:$0 sm:$0xff]  ;;  %s3113_s11 = sld [smem:[#allocation23_spill]]  ;;  %1481 = vst.msk [vmem:[#allocation4] sm:$0xff] %vm1376_vm3, %v2504_v9  ;;  %1482 = vst.msk [vmem:[#allocation4 + $0x8] sm:$0xff] %vm1376_vm3, %v2504_v9  ;;  %vm1333_vm4 = vcmask 392192  }
  0x5c   : > { %2076 = vmatprep.subr.bf16.mxu0 %v2504_v9  ;;  %2086 = vmatprep.mubr.msk.bf16.mxu1 %vm2505_vm1, %v2504_v9  ;;  %v2807_v34 = vld [vmem:[%s2743_s13] sm:$0xff]   ;;  %s2508_s13 = smov 80   ;;  %vm1478_vm5 = vcmask 519168  }
  0x5d   : > { %2083 = vmatpush3.bf16.msra.mxu1 %v2802_v33 }
  0x5e   : > { %2084 = vmatprep.subr.bf16.mxu1 %v2504_v9 }
  0x61   : > { %2085 = vmatpush3.bf16.msra.mxu1 %v2807_v34 }
  0x62   : > { %2090 = vmatprep.subr.bf16.mxu1 %v2504_v9 }
  0x63   : > { %2077 = vmatpush3.bf16.xpose.msra.mxu0 %v792_v12 }
  0x64   : > { %2106 = vmatprep.subr.bf16.mxu0 %v2504_v9 }
  0x6a   : > { %2079 = vmatmul.mubr.msk.bf16.vlgmr.msra.gmra.mxu0 %vm787_vm0, %v2783_v13 }
  0x6b   : > { %2110 = vmatprep.mubr.msk.bf16.mxu0 %vm2505_vm1, %v2504_v9 }
 0x12a   : > { %v831_v15 = vpop.f32.mrf.mxu0 }
 0x12b   : > { %v832_v16 = vadd.f32 %v2789_v14, %v831_v15 }
 0x12c   : > { %v2080_v17 = vpop.f32.mrf.mxu0 }
 0x12d   : > { %v839_v18 = vsel %vm838_vm2, %v832_v16, -inf }
 0x12e   : > { %840 = vmax.xlane.f32.xlu0 %v839_v18  ;;  %v834_v19 = vpop.f32.mrf.mxu0 }
 0x12f   : > { %v835_v20 = vadd.f32 %v2789_v14, %v834_v19 }
 0x130   : > { %v2081_v21 = vpop.f32.mrf.mxu0 }
 0x131   : > { %v842_v22 = vsel %vm838_vm2, %v835_v20, -inf }
 0x132   : > { %843 = vmax.xlane.f32.xlu0 %v842_v22 }
 0x148   : > { %922 = vrot.lane.b32.xlu0 %v2767_v8, %s2506_s12 }
 0x14c   : > { %1049 = vrot.lane.b32.xlu0 %v2773_v11, %s2507_s14 }
 0x1b7   : > { %v841_v23 = vpop.xlane.xlu0 %840 }
 0x1b8   : > { %v845_v24 = vsub.f32 %v832_v16, %v841_v23 }
 0x1ba   : > { %v847_v25 = vmul.f32 1.442695, %v845_v24 }
 0x1bb   : > { %v844_v26 = vpop.xlane.xlu0 %843 }
 0x1bc   : > { %2321 = vpow2.f32 %v847_v25  ;;  %v846_v27 = vsub.f32 %v835_v20, %v844_v26 }
 0x1be   : > { %v849_v28 = vmul.f32 1.442695, %v846_v27 }
 0x1bf   : > { %v923_v39 = vpop.permute.xlu0 %922 }
 0x1c0   : > { %2323 = vpow2.f32 %v849_v28  ;;  %v931_v48 = vsel %vm787_vm0, %v923_v39, 0 }
 0x1c3   : > { %v1050_v42 = vpop.permute.xlu0 %1049 }
 0x1c4   : > { %v1057_v46 = vsel %vm787_vm0, %v1050_v42, 0 }
 0x1c9   : > { %v2322_v29 = vpop.eup %2321 }
 0x1ca   : > { %v851_v30 = vsel %vm838_vm2, %v2322_v29, 0.0 }
 0x1cb   : > { %852 = vadd.xlane.f32.xlu1 %v851_v30 }
 0x1cd   : > { %v2324_v31 = vpop.eup %2323 }
 0x1ce   : > { %v854_v32 = vsel %vm838_vm2, %v2324_v31, 0.0 }
 0x1cf   : > { %855 = vadd.xlane.f32.xlu1 %v854_v32 }
 0x1e0   : > { %920 = vrot.lane.b32.xlu1 %v2773_v11, %s2506_s12 }
 0x1e4   : > { %1051 = vrot.lane.b32.xlu1 %v2767_v8, %s2507_s14 }
 0x1e8   : > { %918 = vrot.lane.b32.xlu1 %v2783_v13, %s2506_s12 }
 0x1ec   : > { %1047 = vrot.lane.b32.xlu1 %v2783_v13, %s2507_s14 }
 0x254   : > { %v853_v35 = vpop.xlane.xlu1 %852 }
 0x255   : > { %2325 = vrcp.f32 %v853_v35 }
 0x258   : > { %v856_v36 = vpop.xlane.xlu1 %855 }
 0x259   : > { %2327 = vrcp.f32 %v856_v36 }
 0x25c   : > { %v921_v37 = vpop.permute.xlu1 %920 }
 0x25d   : > { %v928_v51 = vsel %vm787_vm0, %v921_v37, 0 }
 0x260   : > { %v1052_v38 = vpop.permute.xlu1 %1051 }
 0x261   : > { %v1060_v40 = vsel %vm787_vm0, %v1052_v38, 0 }
 0x262   : > { %2107 = vmatpush3.bf16.xpose.msra.mxu0 %v1060_v40  ;;  %v2326_v41 = vpop.eup %2325 }
 0x263   : > { %2108 = vmatprep.subr.bf16.mxu0 %v2504_v9  ;;  %v859_v44 = vmul.f32 %v2326_v41, %v2322_v29 }
 0x264   : > { %v919_v47 = vpop.permute.xlu1 %918 }
 0x266   : > { %v2328_v43 = vpop.eup %2327 }
 0x267   : > { %v860_v45 = vmul.f32 %v2328_v43, %v2324_v31 }
 0x268   : > { %v1048_v50 = vpop.permute.xlu1 %1047 }
 0x269   : > { %v861_v49 = vpack.c.bf16 %v860_v45, %v859_v44 }
 0x26a   : > { %2109 = vmatpush3.bf16.xpose.msra.mxu0 %v1057_v46 }
 0x26b   : > { %2087 = vmatmul.mubr.msk.bf16.vlgmr.msra.gmra.mxu1 %vm838_vm2, %v861_v49  ;;  %2130 = vmatprep.subr.bf16.mxu0 %v2504_v9 }
 0x26c   : > { %2091 = vmatpush3.bf16.xpose.msra.mxu1 %v931_v48  ;;  %2094 = vmatprep.mubr.msk.bf16.mxu1 %vm2505_vm1, %v2504_v9 }
 0x26d   : > { %2092 = vmatprep.subr.bf16.mxu1 %v2504_v9 }
 0x271   : > { %2111 = vmatmul.mubr.msk.bf16.vlgmr.msra.gmra.mxu0 %vm787_vm0, %v1048_v50 }
 0x272   : > { %2134 = vmatprep.mubr.msk.bf16.mxu0 %vm2505_vm1, %v2504_v9 }
 0x274   : > { %2093 = vmatpush3.bf16.xpose.msra.mxu1 %v928_v51 }
 0x275   : > { %2098 = vmatprep.subr.bf16.mxu1 %v2504_v9 }
 0x27b   : > { %2095 = vmatmul.mubr.msk.bf16.vlgmr.msra.gmra.mxu1 %vm787_vm0, %v919_v47 }
 0x27c   : > { %2102 = vmatprep.mubr.msk.bf16.mxu1 %vm2505_vm1, %v2504_v9 }
 0x32b   : > { %v2836_v52 = vpop.f32.mrf.mxu1 }
 0x32d   : > { %v2088_v53 = vpop.f32.mrf.mxu1 }
 0x32f   : > { %v2838_v54 = vpop.f32.mrf.mxu1 }
 0x331   : > { %v2089_v55 = vpop.f32.mrf.mxu1  ;;  %v1096_v56 = vpop.f32.mrf.mxu0 }
 0x332   : > { %v1097_v61 = vadd.f32 %v2789_v14, %v1096_v56 }
 0x333   : > { %v2112_v57 = vpop.f32.mrf.mxu0 }
 0x334   : > { %v1103_v3 = vsel %vm838_vm2, %v1097_v61, -inf }
 0x335   : > { %v1099_v58 = vpop.f32.mrf.mxu0 }
 0x336   : > { %v1100_v5 = vadd.f32 %v2789_v14, %v1099_v58 }
 0x337   : > { %v2113_v59 = vpop.f32.mrf.mxu0 }
 0x338   : > { %v1106_v7 = vsel %vm838_vm2, %v1100_v5, -inf }
 0x33b   : > { %v967_v60 = vpop.f32.mrf.mxu1 }
 0x33c   : > { %v968_v62 = vadd.f32 %v2789_v14, %v967_v60 }
 0x33d   : > { %v2096_v63 = vpop.f32.mrf.mxu1 }
 0x33e   : > { %v974_v0 = vsel %vm838_vm2, %v968_v62, -inf }
 0x33f   : > { %975 = vmax.xlane.f32.xlu0 %v974_v0  ;;  %v970_v1 = vpop.f32.mrf.mxu1 }
 0x340   : > { %v971_v2 = vadd.f32 %v2789_v14, %v970_v1 }
 0x341   : > { %v2097_v4 = vpop.f32.mrf.mxu1 }
 0x342   : > { %v977_v6 = vsel %vm838_vm2, %v971_v2, -inf }
 0x343   : > { %978 = vmax.xlane.f32.xlu1 %v977_v6  ;;  %1104 = vmax.xlane.f32.xlu0 %v1103_v3 }
 0x347   : > { %1107 = vmax.xlane.f32.xlu0 %v1106_v7 }
 0x3c8   : > { %v976_v10 = vpop.xlane.xlu0 %975 }
 0x3c9   : > { %v980_v12 = vsub.f32 %v968_v62, %v976_v10 }
 0x3cb   : > { %v982_v18 = vmul.f32 1.442695, %v980_v12 }
 0x3cc   : > { %v1105_v15 = vpop.xlane.xlu0 %1104  ;;  %v979_v28 = vpop.xlane.xlu1 %978 }
 0x3cd   : > { %v1109_v16 = vsub.f32 %v1097_v61, %v1105_v15  ;;  %v981_v29 = vsub.f32 %v971_v2, %v979_v28 }
 0x3cf   : > { %v1111_v17 = vmul.f32 1.442695, %v1109_v16  ;;  %v984_v30 = vmul.f32 1.442695, %v981_v29 }
 0x3d0   : > { %v1108_v19 = vpop.xlane.xlu0 %1107 }
 0x3d1   : > { %v1110_v20 = vsub.f32 %v1100_v5, %v1108_v19  ;;  %2329 = vpow2.f32 %v1111_v17 }
 0x3d2   : > { %2331 = vpow2.f32 %v982_v18 }
 0x3d3   : > { %v1113_v21 = vmul.f32 1.442695, %v1110_v20 }
 0x3d5   : > { %2333 = vpow2.f32 %v1113_v21 }
 0x3d6   : > { %2335 = vpow2.f32 %v984_v30 }
 0x3de   : > { %v2330_v22 = vpop.eup %2329 }
 0x3df   : > { %v1115_v23 = vsel %vm838_vm2, %v2330_v22, 0.0  ;;  %v2332_v24 = vpop.eup %2331 }
 0x3e0   : > { %1116 = vadd.xlane.f32.xlu0 %v1115_v23  ;;  %v986_v27 = vsel %vm838_vm2, %v2332_v24, 0.0 }
 0x3e2   : > { %v2334_v25 = vpop.eup %2333 }
 0x3e3   : > { %v1118_v26 = vsel %vm838_vm2, %v2334_v25, 0.0  ;;  %v2336_v31 = vpop.eup %2335 }
 0x3e4   : > { %1119 = vadd.xlane.f32.xlu1 %v1118_v26  ;;  %987 = vadd.xlane.f32.xlu0 %v986_v27  ;;  %v989_v32 = vsel %vm838_vm2, %v2336_v31, 0.0 }
 0x3f5   : > { %997 = vrot.lane.b32.xlu1 %v2807_v34, %s2506_s12 }
 0x3f9   : > { %1128 = vrot.lane.b32.xlu1 %v2802_v33, %s2507_s14 }
 0x3fa   : > { %999 = vrot.lane.b32.xlu0 %v2802_v33, %s2506_s12 }
 0x3fe   : > { %1180 = vrot.lane.b32.xlu0 %v2767_v8, %s2508_s13 }
 0x402   : > { %1176 = vrot.lane.b32.xlu0 %v2783_v13, %s2508_s13 }
 0x41d   : > { %990 = vadd.xlane.f32.xlu1 %v989_v32 }
 0x42e   : > { %1126 = vrot.lane.b32.xlu1 %v2807_v34, %s2507_s14 }
 0x432   : > { %1178 = vrot.lane.b32.xlu1 %v2773_v11, %s2508_s13 }
 0x469   : > { %v1117_v35 = vpop.xlane.xlu0 %1116 }
 0x46d   : > { %v988_v36 = vpop.xlane.xlu0 %987  ;;  %v1120_v8 = vpop.xlane.xlu1 %1119 }
 0x46e   : > { %2337 = vrcp.f32 %v988_v36  ;;  %v2319_v36 = vld [vmem:[%s3113_s11 + $0x8] sm:$0xff]  }
 0x471   : > { %v1000_v37 = vpop.permute.xlu0 %999  ;;  %v998_v13 = vpop.permute.xlu1 %997 }
 0x472   : > { %2099 = vmatpush3.bf16.msra.mxu1 %v1000_v37 }
 0x473   : > { %2100 = vmatprep.subr.bf16.mxu1 %v2504_v9 }
 0x475   : > { %v1129_v38 = vpop.permute.xlu1 %1128  ;;  %v1181_v48 = vpop.permute.xlu0 %1180 }
 0x476   : > { %2101 = vmatpush3.bf16.msra.mxu1 %v998_v13  ;;  %v1189_v50 = vsel %vm787_vm0, %v1181_v48, 0 }
 0x477   : > { %2114 = vmatprep.subr.bf16.mxu1 %v2504_v9 }
 0x479   : > { %v1177_v56 = vpop.permute.xlu0 %1176 }
 0x47b   : > { %v2338_v40 = vpop.eup %2337 }
 0x47c   : > { %v994_v11 = vmul.f32 %v2338_v40, %v2332_v24 }
 0x4a6   : > { %v991_v39 = vpop.xlane.xlu1 %990 }
 0x4a7   : > { %2339 = vrcp.f32 %v991_v39 }
 0x4a8   : > { %2341 = vrcp.f32 %v1120_v8  ;;  %v2320_v8 = vld [vmem:[%s3113_s11] sm:$0xff]  }
 0x4a9   : > { %2343 = vrcp.f32 %v1117_v35  ;;  %v2318_v35 = vld [vmem:[%s3113_s11 + $0x10] sm:$0xff]  }
 0x4aa   : > { %v1127_v46 = vpop.permute.xlu1 %1126 }
 0x4ae   : > { %v1179_v53 = vpop.permute.xlu1 %1178 }
 0x4af   : > { %v1186_v55 = vsel %vm787_vm0, %v1179_v53, 0 }
 0x4b4   : > { %v2340_v41 = vpop.eup %2339 }
 0x4b5   : > { %v995_v42 = vmul.f32 %v2340_v41, %v2336_v31  ;;  %v2342_v44 = vpop.eup %2341 }
 0x4b6   : > { %v2344_v45 = vpop.eup %2343  ;;  %v1124_v47 = vmul.f32 %v2342_v44, %v2334_v25 }
 0x4b7   : > { %v996_v43 = vpack.c.bf16 %v995_v42, %v994_v11  ;;  %v1123_v49 = vmul.f32 %v2344_v45, %v2330_v22 }
 0x4b9   : > { %2103 = vmatmul.mubr.msk.bf16.vlgmr.msra.gmra.mxu1 %vm838_vm2, %v996_v43  ;;  %v1125_v51 = vpack.c.bf16 %v1124_v47, %v1123_v49 }
 0x4ba   : > { %2115 = vmatpush3.bf16.msra.mxu1 %v1129_v38  ;;  %2118 = vmatprep.mubr.msk.bf16.mxu1 %vm2505_vm1, %v2504_v9 }
 0x4bb   : > { %2116 = vmatprep.subr.bf16.mxu1 %v2504_v9 }
 0x4be   : > { %2117 = vmatpush3.bf16.msra.mxu1 %v1127_v46 }
 0x4bf   : > { %2122 = vmatprep.subr.bf16.mxu1 %v2504_v9 }
 0x4c1   : > { %2119 = vmatmul.mubr.msk.bf16.vlgmr.msra.gmra.mxu1 %vm838_vm2, %v1125_v51 }
 0x4c2   : > { %2123 = vmatpush3.bf16.xpose.msra.mxu1 %v1189_v50  ;;  %2126 = vmatprep.mubr.msk.bf16.mxu1 %vm2505_vm1, %v2504_v9 }
 0x4c3   : > { %2124 = vmatprep.subr.bf16.mxu1 %v2504_v9 }
 0x4ca   : > { %2125 = vmatpush3.bf16.xpose.msra.mxu1 %v1186_v55 }
 0x4d1   : > { %2127 = vmatmul.mubr.msk.bf16.vlgmr.msra.gmra.mxu1 %vm787_vm0, %v1177_v56 }
 0x579   : > { %v1040_v57 = vpop.f32.mrf.mxu1 }
 0x57b   : > { %v2104_v58 = vpop.f32.mrf.mxu1 }
 0x57c   : > { %v753_v58 = vld [vmem:[%s2735_s22] sm:$0xff] }
 0x57d   : > { %v1043_v59 = vpop.f32.mrf.mxu1 }
 0x57e   : > { %v2297_v12 = vpack.i.bf16 %v1043_v59, %v1040_v57 }
 0x57f   : > { %v2105_v60 = vpop.f32.mrf.mxu1 }
 0x581   : > { %v1169_v61 = vpop.f32.mrf.mxu1 }
 0x583   : > { %v2120_v62 = vpop.f32.mrf.mxu1 }
 0x584   : > { %v754_v62 = vld [vmem:[%s2735_s22 + $0x8] sm:$0xff] }
 0x585   : > { %v1172_v63 = vpop.f32.mrf.mxu1 }
 0x586   : > { %v2302_v15 = vpack.i.bf16 %v1172_v63, %v1169_v61 }
 0x587   : > { %v2121_v0 = vpop.f32.mrf.mxu1 }
 0x591   : > { %v1225_v1 = vpop.f32.mrf.mxu1 }
 0x592   : > { %v1226_v2 = vadd.f32 %v2789_v14, %v1225_v1 }
 0x593   : > { %v2128_v3 = vpop.f32.mrf.mxu1 }
 0x594   : > { %v1232_v4 = vsel %vm838_vm2, %v1226_v2, -inf }
 0x595   : > { %1233 = vmax.xlane.f32.xlu1 %v1232_v4  ;;  %v1228_v5 = vpop.f32.mrf.mxu1 }
 0x596   : > { %v1229_v6 = vadd.f32 %v2789_v14, %v1228_v5 }
 0x597   : > { %v2129_v7 = vpop.f32.mrf.mxu1 }
 0x598   : > { %v1235_v10 = vsel %vm838_vm2, %v1229_v6, -inf }
 0x599   : > { %1236 = vmax.xlane.f32.xlu0 %v1235_v10 }
 0x5a6   : > { %1257 = vrot.lane.b32.xlu1 %v2802_v33, %s2508_s13 }
 0x5aa   : > { %2298 = vrot.lane.b32.xlu1 %v2297_v12, %s2509_s28 }
 0x5ae   : > { %2303 = vrot.lane.b32.xlu1 %v2302_v15, %s2510_s16  ;;  %s3115_s16 = sld [smem:[#allocation25_spill]] }
 0x61e   : > { %v1234_v16 = vpop.xlane.xlu1 %1233 }
 0x61f   : > { %v1238_v17 = vsub.f32 %v1226_v2, %v1234_v16 }
 0x621   : > { %v1240_v18 = vmul.f32 1.442695, %v1238_v17 }
 0x622   : > { %v1258_v19 = vpop.permute.xlu1 %1257  ;;  %v1237_v20 = vpop.xlane.xlu0 %1236 }
 0x623   : > { %2345 = vpow2.f32 %v1240_v18  ;;  %v1239_v14 = vsub.f32 %v1229_v6, %v1237_v20  ;;  %2131 = vmatpush3.bf16.msra.mxu0 %v1258_v19 }
 0x624   : > { %2132 = vmatprep.subr.bf16.mxu0 %v2504_v9 }
 0x625   : > { %v1242_v21 = vmul.f32 1.442695, %v1239_v14 }
 0x626   : > { %v2299_v41 = vpop.permute.xlu1 %2298 }
 0x627   : > { %2347 = vpow2.f32 %v1242_v21  ;;  %v2301_v42 = vunpack.i.h.bf16 %v2299_v41  ;;  %v2300_v43 = vunpack.i.l.bf16 %v2299_v41 }
 0x629   : > { %v1330_v47 = vsel %vm787_vm0, %v2838_v54, %v2301_v42 }
 0x62a   : > { %v2304_v11 = vpop.permute.xlu1 %2303 }
 0x62b   : > { %v2306_v44 = vunpack.i.h.bf16 %v2304_v11  ;;  %v2305_v45 = vunpack.i.l.bf16 %v2304_v11 }
 0x62d   : > { %v1332_v51 = vsel %vm838_vm2, %v1330_v47, %v2306_v44 }
 0x630   : > { %v2346_v22 = vpop.eup %2345 }
 0x631   : > { %v1244_v33 = vsel %vm838_vm2, %v2346_v22, 0.0 }
 0x632   : > { %1245 = vadd.xlane.f32.xlu0 %v1244_v33 }
 0x634   : > { %v2348_v23 = vpop.eup %2347 }
 0x635   : > { %v1247_v24 = vsel %vm838_vm2, %v2348_v23, 0.0 }
 0x636   : > { %1248 = vadd.xlane.f32.xlu0 %v1247_v24  ;;  %v1998_v24 = vld [vmem:[%s3115_s16] ss:$0 sm:$0xff] }
 0x64c   : > { %1255 = vrot.lane.b32.xlu0 %v2807_v34, %s2508_s13  ;;  %v2317_v34 = vld [vmem:[%s3113_s11 + $0x18] sm:$0xff]   ;;  %s3114_s13 = sld [smem:[#allocation24_spill]] }
 0x652   : > { %v1992_v57 = vld [vmem:[%s3114_s13] ss:$0 sm:$0xff] }
 0x6bb   : > { %v1246_v25 = vpop.xlane.xlu0 %1245 }
 0x6bc   : > { %2349 = vrcp.f32 %v1246_v25 }
 0x6bf   : > { %v1249_v26 = vpop.xlane.xlu0 %1248 }
 0x6c0   : > { %2351 = vrcp.f32 %v1249_v26  ;;  %v1999_v26 = vld [vmem:[%s3116_s5] ss:$0 sm:$0xff] }
 0x6c3   : > { %v1256_v27 = vpop.permute.xlu0 %1255 }
 0x6c4   : > { %2133 = vmatpush3.bf16.msra.mxu0 %v1256_v27 }
 0x6c5   : > { %2138 = vmatprep.subr.bf16.mxu0 %v2504_v9 }
 0x6c9   : > { %v2350_v28 = vpop.eup %2349 }
 0x6ca   : > { %v1252_v30 = vmul.f32 %v2350_v28, %v2346_v22 }
 0x6cd   : > { %v2352_v29 = vpop.eup %2351 }
 0x6ce   : > { %v1253_v31 = vmul.f32 %v2352_v29, %v2348_v23 }
 0x6d0   : > { %v1254_v32 = vpack.c.bf16 %v1253_v31, %v1252_v30 }
 0x6d2   : > { %2135 = vmatmul.mubr.msk.bf16.vlgmr.msra.gmra.mxu0 %vm838_vm2, %v1254_v32 }
 0x6d3   : > { %2146 = vmatprep.mubr.msk.bf16.mxu0 %vm2505_vm1, %v2504_v9  ;;  %2139 = vmatpush3.bf16.msra.mxu0 %v2317_v34 }
 0x6d4   : > { %2140 = vmatprep.subr.bf16.mxu0 %v2504_v9 }
 0x6d7   : > { %2141 = vmatpush3.bf16.msra.mxu0 %v2318_v35 }
 0x6d8   : > { %2142 = vmatprep.subr.bf16.mxu0 %v2504_v9 }
 0x6db   : > { %2143 = vmatpush3.bf16.msra.mxu0 %v2319_v36 }
 0x6dc   : > { %2144 = vmatprep.subr.bf16.mxu0 %v2504_v9  ;;  %v1329_v9 = vsel %vm787_vm0, %v2836_v52, %v2300_v43 }
 0x6dd   : > { %v1331_v50 = vsel %vm838_vm2, %v1329_v9, %v2305_v45 }
 0x6df   : > { %2145 = vmatpush3.bf16.msra.mxu0 %v2320_v8 }
 0x792   : > { %v1298_v37 = vpop.f32.mrf.mxu0 }
 0x794   : > { %v2136_v13 = vpop.f32.mrf.mxu0 }
 0x796   : > { %v1301_v38 = vpop.f32.mrf.mxu0 }
 0x797   : > { %v2307_v39 = vpack.i.bf16 %v1301_v38, %v1298_v37 }
 0x798   : > { %v2137_v40 = vpop.f32.mrf.mxu0 }
 0x799   : > { %2308 = vrot.lane.b32.xlu1 %v2307_v39, %s2511_s18 }
 0x80b   : > { %v2309_v46 = vpop.permute.xlu1 %2308 }
 0x80c   : > { %v2311_v48 = vunpack.i.h.bf16 %v2309_v46  ;;  %v2310_v49 = vunpack.i.l.bf16 %v2309_v46 }
 0x80e   : > { %v1335_v53 = vsel %vm1333_vm4, %v1332_v51, %v2311_v48  ;;  %v1334_v55 = vsel %vm1333_vm4, %v1331_v50, %v2310_v49 }
 0x80f   : > { %v1336_v56 = vpack.c.bf16 %v1335_v53, %v1334_v55 }
 0x811   : > { %2147 = vmatmul.mubr.msk.bf16.vlgmr.msra.gmra.mxu0 %vm1376_vm3, %v1336_v56 }
 0x8d1   : > { %v1414_v54 = vpop.f32.mrf.mxu0 }
 0x8d2   : > { %v1415_v59 = vadd.f32 %v1992_v57, %v1414_v54 }
 0x8d3   : > { %v2148_v52 = vpop.f32.mrf.mxu0 }
 0x8d4   : > { %v1421_v60 = vadd.f32 %v1415_v59, %v753_v58 }
 0x8d5   : > { %v1417_v61 = vpop.f32.mrf.mxu0 }
 0x8d6   : > { %v1418_v63 = vadd.f32 %v1992_v57, %v1417_v61  ;;  %v1425_v0 = vsel %vm1376_vm3, %v1421_v60, 0.0 }
 0x8d7   : > { %v2149_v1 = vpop.f32.mrf.mxu0  ;;  %1426 = vadd.xlane.f32.xlu0 %v1425_v0 }
 0x8d8   : > { %v1422_v2 = vadd.f32 %v1418_v63, %v754_v62 }
 0x8da   : > { %v1428_v3 = vsel %vm1376_vm3, %v1422_v2, 0.0 }
 0x8db   : > { %1429 = vadd.xlane.f32.xlu1 %v1428_v3 }
 0x960   : > { %v1427_v4 = vpop.xlane.xlu0 %1426 }
 0x961   : > { %v1432_v5 = vmul.f32 0.015625, %v1427_v4 }
 0x963   : > { %v1434_v6 = vsub.f32 %v1421_v60, %v1432_v5 }
 0x964   : > { %v1430_v7 = vpop.xlane.xlu1 %1429 }
 0x965   : > { %v1433_v10 = vmul.f32 0.015625, %v1430_v7  ;;  %v1436_v12 = vmul.f32 %v1434_v6, %v1434_v6 }
 0x967   : > { %v1435_v15 = vsub.f32 %v1422_v2, %v1433_v10  ;;  %v1438_v16 = vsel %vm1376_vm3, %v1436_v12, 0.0 }
 0x968   : > { %1439 = vadd.xlane.f32.xlu0 %v1438_v16 }
 0x969   : > { %v1437_v17 = vmul.f32 %v1435_v15, %v1435_v15 }
 0x96b   : > { %v1441_v18 = vsel %vm1376_vm3, %v1437_v17, 0.0 }
 0x96c   : > { %1442 = vadd.xlane.f32.xlu0 %v1441_v18 }
 0x9f1   : > { %v1440_v19 = vpop.xlane.xlu0 %1439 }
 0x9f2   : > { %v1444_v20 = vmul.f32 0.015625, %v1440_v19 }
 0x9f4   : > { %v1446_v14 = vadd.f32 1e-12, %v1444_v20 }
 0x9f5   : > { %v1443_v21 = vpop.xlane.xlu0 %1442 }
 0x9f6   : > { %2353 = vrsqrt.f32 %v1446_v14  ;;  %v1445_v22 = vmul.f32 0.015625, %v1443_v21 }
 0x9f8   : > { %v1447_v33 = vadd.f32 1e-12, %v1445_v22 }
 0x9fa   : > { %2355 = vrsqrt.f32 %v1447_v33 }
 0xa03   : > { %v2354_v23 = vpop.eup %2353 }
 0xa04   : > { %v1450_v25 = vmul.f32 %v2354_v23, %v1434_v6 }
 0xa06   : > { %v1458_v27 = vmul.f32 %v1998_v24, %v1450_v25 }
 0xa07   : > { %v2356_v28 = vpop.eup %2355 }
 0xa08   : > { %v1466_v29 = vadd.f32 %v1999_v26, %v1458_v27  ;;  %v1451_v30 = vmul.f32 %v2356_v28, %v1435_v15 }
 0xa0a   : > { %1468 = vst.msk [vmem:[#allocation2] sm:$0xff] %vm1376_vm3, %v1466_v29  ;;  %v2029_v31 = vpack.c.bf16 %v1466_v29, %v1466_v29  ;;  %v1459_v32 = vmul.f32 %v1998_v24, %v1451_v30 }
 0xa0c   : > { %1479 = vst.msk [vmem:[#allocation3] sm:$0xf] %vm1478_vm5, %v2029_v31  ;;  %v1467_v34 = vadd.f32 %v1999_v26, %v1459_v32 }
 0xa0e   : > { %1469 = vst.msk [vmem:[#allocation2 + $0x8] sm:$0xff] %vm1376_vm3, %v1467_v34  ;;  %v2030_v35 = vpack.c.bf16 %v1467_v34, %v1467_v34 }
 0xa10   : > { %1480 = vst.msk [vmem:[#allocation3 + $0x4] sm:$0xf] %vm1478_vm5, %v2030_v35 }
 0xa11 PF: > { %v2357_v36 = vld [vmem:[%s2762_s17 + $0x18] sm:$0xff]   ;;  %v2512_v8 = vmov 0.0   ;;  %v2358_v37 = vld [vmem:[%s2762_s17 + $0x10] sm:$0xff]   ;;  %vm2513_vm6 = vmmov 0   ;;  %v2359_v38 = vld [vmem:[%s2762_s17 + $0x8] sm:$0xff]   ;;  %vm1529_vm7 = vcmask 523264  }
 0xa12   : > { %2150 = vmatprep.subr.bf16.mxu0 %v2512_v8  ;;  %2162 = vmatprep.subr.bf16.mxu1 %v2512_v8  ;;  %v2362_v13 = vld [vmem:[%s2760_s29 + $0x38] sm:$0xff]   ;;  %v2360_v39 = vld [vmem:[%s2762_s17] sm:$0xff]   ;;  %v2363_v41 = vld [vmem:[%s2760_s29 + $0x30] sm:$0xff]   ;;  %p2017_p10 = scmp.ne.s32.totalorder %s2478_s23, 1 }
 0xa13   : > { %2151 = vmatpush3.bf16.msra.mxu0 %v2357_v36  ;;  %2158 = vmatprep.mubr.msk.bf16.mxu0 %vm2513_vm6, %v2512_v8  ;;  %v2364_v11 = vld [vmem:[%s2760_s29 + $0x28] sm:$0xff]   ;;  %v2365_v42 = vld [vmem:[%s2760_s29 + $0x20] sm:$0xff]   ;;  %v2366_v43 = vld [vmem:[%s2760_s29 + $0x18] sm:$0xff]   ;;  %s3118_s15 = sld [smem:[#allocation30_spill]] (!%p2017_p10) }
 0xa14   : > { %2152 = vmatprep.subr.bf16.mxu0 %v2512_v8  ;;  %2178 = vmatprep.mubr.msk.bf16.mxu1 %vm2513_vm6, %v2512_v8  ;;  %v2367_v44 = vld [vmem:[%s2760_s29 + $0x10] sm:$0xff]   ;;  %v2368_v45 = vld [vmem:[%s2760_s29 + $0x8] sm:$0xff]   ;;  %v2369_v46 = vld [vmem:[%s2760_s29] sm:$0xff]   ;;  %s3117_s29 = sld [smem:[#allocation29_spill]] (!%p2017_p10) }
 0xa15   : > { %2163 = vmatpush3.bf16.msra.mxu1 %v2362_v13  ;;  %v2002_v47 = vld [vmem:[%s740_s26] ss:$0 sm:$0xff]  ;;  %v1584_v0 = vld [vmem:[#allocation4] sm:$0xff]  ;;  %s3119_s18 = sld [smem:[#allocation31_spill]] (!%p2017_p10) }
 0xa16   : > { %2164 = vmatprep.subr.bf16.mxu1 %v2512_v8  ;;  %v1585_v4 = vld [vmem:[#allocation4 + $0x8] sm:$0xff] }
 0xa17   : > { %2153 = vmatpush3.bf16.msra.mxu0 %v2358_v37  ;;  %v2361_v40 = vld [vmem:[#allocation3] sm:$0xff]  }
 0xa18   : > { %2154 = vmatprep.subr.bf16.mxu0 %v2512_v8 }
 0xa19   : > { %2165 = vmatpush3.bf16.msra.mxu1 %v2363_v41 }
 0xa1a   : > { %2166 = vmatprep.subr.bf16.mxu1 %v2512_v8 }
 0xa1b   : > { %2155 = vmatpush3.bf16.msra.mxu0 %v2359_v38 }
 0xa1c   : > { %2156 = vmatprep.subr.bf16.mxu0 %v2512_v8 }
 0xa1d   : > { %2167 = vmatpush3.bf16.msra.mxu1 %v2364_v11 }
 0xa1e   : > { %2168 = vmatprep.subr.bf16.mxu1 %v2512_v8 }
 0xa1f   : > { %2157 = vmatpush3.bf16.msra.mxu0 %v2360_v39 }
 0xa21   : > { %2169 = vmatpush3.bf16.msra.mxu1 %v2365_v42 }
 0xa22   : > { %2159 = vmatmul.mubr.msk.bf16.vlgmr.msra.gmra.mxu0 %vm1529_vm7, %v2361_v40  ;;  %2170 = vmatprep.subr.bf16.mxu1 %v2512_v8 }
 0xa25   : > { %2171 = vmatpush3.bf16.msra.mxu1 %v2366_v43 }
 0xa26   : > { %2172 = vmatprep.subr.bf16.mxu1 %v2512_v8 }
 0xa29   : > { %2173 = vmatpush3.bf16.msra.mxu1 %v2367_v44 }
 0xa2a   : > { %2174 = vmatprep.subr.bf16.mxu1 %v2512_v8 }
 0xa2d   : > { %2175 = vmatpush3.bf16.msra.mxu1 %v2368_v45 }
 0xa2e   : > { %2176 = vmatprep.subr.bf16.mxu1 %v2512_v8 }
 0xa31   : > { %2177 = vmatpush3.bf16.msra.mxu1 %v2369_v46 }
 0xae2   : > { %v1567_v9 = vpop.f32.mrf.mxu0 }
 0xae3   : > { %v1568_v48 = vadd.f32 %v2002_v47, %v1567_v9 }
 0xae4   : > { %v2160_v49 = vpop.f32.mrf.mxu0 }
 0xae5   : > { %v1576_v50 = vmul.f32 0.70710677, %v1568_v48  ;;  %v1574_v59 = vmul.f32 0.5, %v1568_v48 }
 0xae6   : > { %v1570_v51 = vpop.f32.mrf.mxu0 }
 0xae7   : > { %2370 = verf.f32 %v1576_v50  ;;  %v1571_v53 = vadd.f32 %v2002_v47, %v1570_v51 }
 0xae8   : > { %v2161_v55 = vpop.f32.mrf.mxu0 }
 0xae9   : > { %v1577_v56 = vmul.f32 0.70710677, %v1571_v53  ;;  %v1575_v52 = vmul.f32 0.5, %v1571_v53 }
 0xaeb   : > { %2372 = verf.f32 %v1577_v56 }
 0xaf4   : > { %v2371_v57 = vpop.eup %2370 }
 0xaf5   : > { %v1580_v54 = vadd.f32 1.0, %v2371_v57 }
 0xaf7   : > { %v1582_v61 = vmul.f32 %v1580_v54, %v1574_v59 }
 0xaf8   : > { %v2373_v58 = vpop.eup %2372 }
 0xaf9   : > { %v1581_v60 = vadd.f32 1.0, %v2373_v58 }
 0xafb   : > { %v1583_v62 = vmul.f32 %v1581_v60, %v1575_v52 }
 0xafd   : > { %v1586_v63 = vpack.c.bf16 %v1583_v62, %v1582_v61 }
 0xaff   : > { %2179 = vmatmul.mubr.bf16.vlgmr.msra.gmra.mxu1 %v1586_v63 }
 0xbbf   : > { %v1685_v1 = vpop.f32.mrf.mxu1 }
 0xbc0   : > { %v1692_v2 = vadd.f32 %v1685_v1, %v1584_v0 }
 0xbc1   : > { %v2180_v3 = vpop.f32.mrf.mxu1 }
 0xbc2   : > { %1694 = vst.msk [vmem:[#allocation4] sm:$0xff] %vm1529_vm7, %v1692_v2  ;;  %1699 = sbr.rel (%p2017_p10) target bundleno = 3335 (0xd07), region = 129 }
 0xbc3   : > { %v1688_v5 = vpop.f32.mrf.mxu1 }
 0xbc4   : > { %v1693_v6 = vadd.f32 %v1688_v5, %v1585_v4 }
 0xbc5   : > { %v2181_v7 = vpop.f32.mrf.mxu1 }
 0xbc6   : > { %1695 = vst.msk [vmem:[#allocation4 + $0x8] sm:$0xff] %vm1529_vm7, %v1693_v6 }
 0xbc7   : > { %v2018_v12 = vld [vmem:[%s3117_s29] ss:$0 sm:$0xff]  ;;  %v1712_v18 = vld [vmem:[#allocation2 + $0x8] sm:$0xff] }
 0xbc8   : > { %v1711_v15 = vld [vmem:[#allocation2] sm:$0xff] }
 0xbc9   : > { %v1700_v10 = vld [vmem:[#allocation4] sm:$0xff]  ;;  %v2019_v38 = vld [vmem:[%s3118_s15] ss:$0 sm:$0xff] }
 0xbca   : > { %v1709_v16 = vadd.f32 %v2018_v12, %v1700_v10  ;;  %v2020_v40 = vld [vmem:[%s3119_s18] ss:$0 sm:$0xff] }
 0xbcc   : > { %v1713_v20 = vadd.f32 %v1711_v15, %v1709_v16 }
 0xbcd   : > { %v1701_v17 = vld [vmem:[#allocation4 + $0x8] sm:$0xff] }
 0xbce   : > { %v1710_v19 = vadd.f32 %v2018_v12, %v1701_v17  ;;  %v1717_v21 = vsel %vm1529_vm7, %v1713_v20, 0.0 }
 0xbcf   : > { %1718 = vadd.xlane.f32.xlu0 %v1717_v21 }
 0xbd0   : > { %v1714_v14 = vadd.f32 %v1712_v18, %v1710_v19 }
 0xbd2   : > { %v1720_v22 = vsel %vm1529_vm7, %v1714_v14, 0.0 }
 0xbd3   : > { %1721 = vadd.xlane.f32.xlu0 %v1720_v22 }
 0xc58   : > { %v1719_v33 = vpop.xlane.xlu0 %1718 }
 0xc59   : > { %v1724_v23 = vmul.f32 0.015625, %v1719_v33 }
 0xc5b   : > { %v1726_v24 = vsub.f32 %v1713_v20, %v1724_v23 }
 0xc5c   : > { %v1722_v25 = vpop.xlane.xlu0 %1721 }
 0xc5d   : > { %v1725_v26 = vmul.f32 0.015625, %v1722_v25  ;;  %v1728_v27 = vmul.f32 %v1726_v24, %v1726_v24 }
 0xc5f   : > { %v1727_v28 = vsub.f32 %v1714_v14, %v1725_v26  ;;  %v1730_v29 = vsel %vm1529_vm7, %v1728_v27, 0.0 }
 0xc60   : > { %1731 = vadd.xlane.f32.xlu1 %v1730_v29 }
 0xc61   : > { %v1729_v30 = vmul.f32 %v1727_v28, %v1727_v28 }
 0xc63   : > { %v1733_v31 = vsel %vm1529_vm7, %v1729_v30, 0.0 }
 0xc64   : > { %1734 = vadd.xlane.f32.xlu1 %v1733_v31 }
 0xce9   : > { %v1732_v32 = vpop.xlane.xlu1 %1731 }
 0xcea   : > { %v1736_v34 = vmul.f32 0.015625, %v1732_v32 }
 0xcec   : > { %v1738_v35 = vadd.f32 1e-12, %v1736_v34 }
 0xced   : > { %v1735_v36 = vpop.xlane.xlu1 %1734 }
 0xcee   : > { %2374 = vrsqrt.f32 %v1738_v35  ;;  %v1737_v8 = vmul.f32 0.015625, %v1735_v36 }
 0xcf0   : > { %v1739_v37 = vadd.f32 1e-12, %v1737_v8 }
 0xcf2   : > { %2376 = vrsqrt.f32 %v1739_v37 }
 0xcfb   : > { %v2375_v13 = vpop.eup %2374 }
 0xcfc   : > { %v1742_v39 = vmul.f32 %v2375_v13, %v1726_v24 }
 0xcfe   : > { %v1750_v41 = vmul.f32 %v2019_v38, %v1742_v39 }
 0xcff   : > { %v2377_v11 = vpop.eup %2376 }
 0xd00   : > { %v1758_v42 = vadd.f32 %v2020_v40, %v1750_v41  ;;  %v1743_v43 = vmul.f32 %v2377_v11, %v1727_v28 }
 0xd02   : > { %1760 = vst.msk [vmem:[%s2764_s6] sm:$0xff] %vm1529_vm7, %v1758_v42  ;;  %v1751_v44 = vmul.f32 %v2019_v38, %v1743_v43 }
 0xd04   : > { %v1759_v45 = vadd.f32 %v2020_v40, %v1751_v44 }
 0xd06   : > { %1761 = vst.msk [vmem:[%s2764_s6 + $0x8] sm:$0xff] %vm1529_vm7, %v1759_v45 }
 0xd07 PF: > { %s2023_s14 = sshll.u32 %s2486_s25, 2  ;;  %s1778_s22 = sshll.u32 %s2764_s6, 4  ;;  %s2979_s22 = int_to_ptr.vmem [resolvable:$true] %s1778_s22 }
 0xd08   : > { %s1775_s13 = sadd.s32 %s2023_s14, %s2718_s30  ;;  %s3121_s21 = sld [smem:[#allocation32_spill]] }
 0xd09   : > { %s2024_s28 = sshll.u32 %s1775_s13, 7  ;;  %s3123_s7 = sand.u32 1, %s2462_s19  }
 0xd0a   : > { %s2988_s8 = scalar_lea.sflag [#allocation7], %s3123_s7  ;;  %s2378_s26 = scalar_lea.vmem %s2979_s22, 256 }
 0xd0b   : > { %p2379_p11 = scmp.ne.s32.totalorder %s2979_s22, %s2378_s26  ;;  %s2514_s25 = smov [#allocation6]  }
 0xd0c   : > { %s2382_s30 = sshll.u32 %s2514_s25, 4  ;;  %s2383_s30 = int_to_ptr.vmem [resolvable:$false] %s2382_s30 }
 0xd0d   : > { %p2380_p12 = pnand %p2379_p11, %p2687_p9  ;;  %s2384_s6 = scalar_lea.vmem %s2383_s30, 512 }
 0xd0e   : > { %s3122_s5 = smov %s3121_s21  ;;  %s2984_s17 = scalar_lea.hbm %s3121_s21, %s2024_s28 }
 0xd0f   : > { %p2381_p0 = pneg %p2380_p12  ;;  %p2385_p1 = scmp.lt.s32.totalorder %s2979_s22, %s2383_s30 }
 0xd10   : > { %p2386_p2 = scmp.lt.s32.totalorder %s2384_s6, %s2378_s26 }
 0xd12   : > { %p2387_p3 = por %p2386_p2, %p2385_p1 }
 0xd14   : > { %p2388_p4 = pnand %p2387_p3, %p2381_p0 }
 0xd16   : > { %2391 = shalt.err (!%p2388_p4)
}
 0xd17   : > { %s2392_s29 = scalar_lea.hbm %s2984_s17, 256  ;;  %s2396_s15 = scalar_lea.hbm %s3122_s5, 1024 }
 0xd18   : > { %p2393_p5 = scmp.ne.s32.totalorder %s2984_s17, %s2392_s29  ;;  %p2397_p8 = scmp.lt.s32.totalorder %s2984_s17, %s3122_s5 }
 0xd19   : > { %p2398_p10 = scmp.lt.s32.totalorder %s2396_s15, %s2392_s29 }
 0xd1a   : > { %p2394_p6 = pnand %p2393_p5, %p2687_p9 }
 0xd1b   : > { %p2399_p11 = por %p2398_p10, %p2397_p8 }
 0xd1c   : > { %p2395_p7 = pneg %p2394_p6 }
 0xd1e   : > { %p2400_p12 = pnand %p2399_p11, %p2395_p7 }
 0xd20   : > { %2403 = shalt.err (!%p2400_p12)
}
 0xd21   : > { %s2515_s18 = smov 128   ;;  %s2516_s14 = smov 8  }
 0xd22   : > { %2182 = dma.vmem_to_hbm [thread:$0]  (%p2687_p9), %s2979_s22, 256, %s2984_s17, %s2988_s8, %s2515_s18, %s2515_s18, %s2516_s14  }
 0xd23 PF: > { %s3124_s13 = sld [smem:[#allocation15_spill]] }
 0xd24   : > { %s3125_s28 = sld [smem:[#allocation9_spill]] }
 0xd29   : > { %p2188_p0 = scmp.ge.s32.totalorder %s3124_s13, 2 }
 0xd2a   : > { %s1793_s24 = sand.u32 1, %s3125_s28  }
 0xd2b   : > { %p2185_p1 = pnand %p2188_p0, %p2696_p13  ;;  %s1794_s21 = scalar_lea.sflag [#allocation7], %s1793_s24 }
 0xd2d   : > { %p2186_p2 = pneg %p2185_p1 }
 0xd2f   : > { %2453 = dma.done.wait (%p2186_p2), %s1794_s21, 256  }
 0xd30   : > { %2455 = vsyncadd (%p2186_p2), %s1794_s21, 4294967040  ;;  %s28_s29 = sadd.s32 1, %s3124_s13   ;;  %s3127_s7 = sld [smem:[#allocation10_spill]] }
 0xd31   : > { %p25_p3 = scmp.ge.s32.totalorder %s28_s29, 10   ;;  %s3128_s20 = sld [smem:[#allocation22_spill]] }
 0xd32   : > { %s3129_s21 = sld [smem:[#allocation11_spill]]  ;;  %s3137_s18 = smov %s2462_s19 }
 0xd33   : > { %s3130_s22 = sld [smem:[#allocation18_spill]] }
 0xd34   : > { %s3131_s23 = sld [smem:[#allocation12_spill]] }
 0xd35   : > { %s3132_s24 = sld [smem:[#allocation13_spill]]  ;;  %27 = sbr.rel (!%p25_p3) target bundleno = 18 (0x12), region = 190 }
 0xd36   : > { %s3133_s25 = sld [smem:[#allocation14_spill]]  ;;  %s3138_s19 = smov %s3127_s7 }
 0xd37   : > { %s3134_s26 = sld [smem:[#allocation16_spill]] }
 0xd38   : > { %s3135_s27 = sld [smem:[#allocation17_spill]] }
 0xd39   : > { %s3136_s28 = sld [smem:[#allocation19_spill]] }
 0xd3a   :  { %1799 = vsyncpa [#allocation7], 1 }
 0xd3b   :  { %1801 = vsyncpa [#allocation7 + $0x1], 1 }

</bundles_post_ra>
